<compile_context>
chip_gen: v7x
topology: tpu7x:2x2x1
jax: 0.10.0
libtpu: 0.0.40
codegen_flags: <defaults>
</compile_context>

<pallas_src>
import functools

import jax
import jax.numpy as jnp
from jax.experimental import pallas as pl
from jax.experimental.pallas import tpu as pltpu

EPS = 1e-5
VMEM_LIMIT = 32 * 1024 * 1024  # fits v5e/v6e/v7x scoped-VMEM budgets


# ---------------------------------------------------------------------------
# Pass 1: conv3x3 + bias + ReLU + per-tile BN partial sums
# ---------------------------------------------------------------------------
def _conv_relu_stats_kernel(x_ref, w_ref, b_ref, y_ref, stats_ref, taps_ref):
    # x_ref    : (1, TH+2, W+2, Cin)  halo tile of the zero-padded input
    # w_ref    : (9*Cin, Cout)        folded 3x3 conv weights
    # b_ref    : (1, Cout)            conv bias (f32)
    # y_ref    : (TH*W, Cout)         conv+bias+ReLU output tile (f32)
    # stats_ref: (1, 2, Cout)         per-tile [sum(y), sum(y*y)] (f32)
    # taps_ref : VMEM scratch (TH*W, 9*Cin) im2col taps for this tile
    th = x_ref.shape[1] - 2
    w = x_ref.shape[2] - 2
    cin = x_ref.shape[3]
    tm = th * w

    # In-kernel im2col: nine shifted views of the resident halo tile, packed
    # along the contraction dim so the conv is a single K = 9*Cin matmul.
    for dy in range(3):
        for dx in range(3):
            k = dy * 3 + dx
            tap = x_ref[0, dy:dy + th, dx:dx + w, :]          # (TH, W, Cin)
            taps_ref[:, k * cin:(k + 1) * cin] = tap.reshape(tm, cin)

    y = jnp.dot(taps_ref[...], w_ref[...],
                preferred_element_type=jnp.float32)           # one MXU matmul
    y = jnp.maximum(y + b_ref[...], 0.0)                      # bias + ReLU
    y_ref[...] = y

    # Per-tile BatchNorm partials via the (otherwise idle) MXU.
    ones = jnp.ones((1, tm), jnp.float32)
    stats_ref[0, 0:1, :] = jnp.dot(ones, y, preferred_element_type=jnp.float32)
    stats_ref[0, 1:2, :] = jnp.dot(ones, y * y,
                                   preferred_element_type=jnp.float32)


def _conv_relu_stats(tiles, w_mat, bias, *, th, w, cout):
    t, _, _, cin = tiles.shape
    tm = th * w
    grid_spec = pltpu.PrefetchScalarGridSpec(
        num_scalar_prefetch=0,
        grid=(t,),
        in_specs=[
            pl.BlockSpec((1, th + 2, w + 2, cin), lambda i: (i, 0, 0, 0)),
            pl.BlockSpec((9 * cin, cout), lambda i: (0, 0)),   # resident
            pl.BlockSpec((1, cout), lambda i: (0, 0)),         # resident
        ],
        out_specs=[
            pl.BlockSpec((tm, cout), lambda i: (i, 0)),
            pl.BlockSpec((1, 2, cout), lambda i: (i, 0, 0)),
        ],
        scratch_shapes=[pltpu.VMEM((tm, 9 * cin), tiles.dtype)],
    )
    y, stats = pl.pallas_call(
        _conv_relu_stats_kernel,
        out_shape=(jax.ShapeDtypeStruct((t * tm, cout), jnp.float32),
                   jax.ShapeDtypeStruct((t, 2, cout), jnp.float32)),
        grid_spec=grid_spec,
        compiler_params=pltpu.CompilerParams(
            dimension_semantics=("parallel",),
            vmem_limit_bytes=VMEM_LIMIT),
    )(tiles, w_mat, bias)
    return y, stats


# ---------------------------------------------------------------------------
# Pass 2: folded BatchNorm affine  (y * scale + shift)
# ---------------------------------------------------------------------------
def _bn_apply_kernel(y_ref, scale_ref, shift_ref, o_ref):
    o_ref[...] = y_ref[...] * scale_ref[...] + shift_ref[...]


def _bn_apply(y, scale, shift, *, tm):
    m, cout = y.shape
    grid_spec = pltpu.PrefetchScalarGridSpec(
        num_scalar_prefetch=0,
        grid=(m // tm,),
        in_specs=[
            pl.BlockSpec((tm, cout), lambda i: (i, 0)),
            pl.BlockSpec((1, cout), lambda i: (0, 0)),
            pl.BlockSpec((1, cout), lambda i: (0, 0)),
        ],
        out_specs=pl.BlockSpec((tm, cout), lambda i: (i, 0)),
    )
    return pl.pallas_call(
        _bn_apply_kernel,
        out_shape=jax.ShapeDtypeStruct((m, cout), jnp.float32),
        grid_spec=grid_spec,
        compiler_params=pltpu.CompilerParams(
            dimension_semantics=("parallel",),
            vmem_limit_bytes=VMEM_LIMIT),
    )(y, scale, shift)


# ---------------------------------------------------------------------------
# Wrapper glue (layout only, no FLOPs)
# ---------------------------------------------------------------------------
def _pick_tile_h(h, max_th=32):
    if h <= max_th:
        return h
    for th in range(max_th, 0, -1):
        if h % th == 0:
            return th
    return h


def _halo_tiles(x_nhwc, th):
    # (N, H, W, C) -> (N * H//th, th+2, W+2, C): zero-padded row tiles with a
    # 1-row halo each side.  Only 2 rows per th are duplicated in HBM (vs the
    # 9x expansion of a materialized im2col).
    n, h, w, c = x_nhwc.shape
    xp = jnp.pad(x_nhwc, ((0, 0), (1, 1), (1, 1), (0, 0)))
    nt = h // th
    tiles = jnp.stack([xp[:, j * th:j * th + th + 2] for j in range(nt)],
                      axis=1)
    return tiles.reshape(n * nt, th + 2, w + 2, c)


def _conv_bn_relu_layer(x_nhwc, w_oihw, b, gamma, beta, *, compute_dtype):
    n, h, w, cin = x_nhwc.shape
    cout = w_oihw.shape[0]
    th = _pick_tile_h(h)
    tm = th * w

    tiles = _halo_tiles(x_nhwc, th).astype(compute_dtype)
    # PyTorch (Cout, Cin, 3, 3) -> (9*Cin, Cout), matching the in-kernel tap
    # packing order (dy, dx, cin).
    w_mat = jnp.transpose(w_oihw, (2, 3, 1, 0)).reshape(9 * cin, cout)
    w_mat = w_mat.astype(compute_dtype)
    bias = b.reshape(1, cout).astype(jnp.float32)

    y, stats = _conv_relu_stats(tiles, w_mat, bias, th=th, w=w, cout=cout)

    # Combine per-tile partials -> batch statistics (training-mode BN, biased
    # variance, eps=1e-5), then fold the affine into one scale/shift pair.
    # TODO(synk): for very large N*H*W prefer a Welford-style combine; plain
    # sum / sum-of-squares in f32 can lose precision.
    m = float(n * h * w)
    s1 = jnp.sum(stats[:, 0, :], axis=0)
    s2 = jnp.sum(stats[:, 1, :], axis=0)
    mean = s1 / m
    var = s2 / m - mean * mean
    scale = gamma * jax.lax.rsqrt(var + EPS)
    shift = beta - mean * scale

    z = _bn_apply(y, scale.reshape(1, cout).astype(jnp.float32),
                  shift.reshape(1, cout).astype(jnp.float32), tm=tm)
    return z.reshape(n, h, w, cout)


def conv_block(x_nchw, params, *, compute_dtype=jnp.float32):
    # One (gamma, beta) pair is shared by both BN applications -- faithful to
    # the PyTorch module, which reuses a single self.batch_norm instance.
    w1, b1, w2, b2, gamma, beta = params
    x = jnp.transpose(x_nchw, (0, 2, 3, 1))                  # NCHW -> NHWC
    x = _conv_bn_relu_layer(x, w1, b1, gamma, beta, compute_dtype=compute_dtype)
    x = _conv_bn_relu_layer(x, w2, b2, gamma, beta, compute_dtype=compute_dtype)
    return jnp.transpose(x, (0, 3, 1, 2))                    # NHWC -> NCHW


# ---------------------------------------------------------------------------
# Pure-JAX reference matching the PyTorch forward (fresh module, training mode)
# ---------------------------------------------------------------------------
def reference(x_nchw, params):
    w1, b1, w2, b2, gamma, beta = params

    def conv(x, w, b):
        y = jax.lax.conv_general_dilated(
            x, w, window_strides=(1, 1), padding=((1, 1), (1, 1)),
            dimension_numbers=("NCHW", "OIHW", "NCHW"))
        return y + b[None, :, None, None]

    def bn(x):
        mean = jnp.mean(x, axis=(0, 2, 3), keepdims=True)
        var = jnp.mean((x - mean) ** 2, axis=(0, 2, 3), keepdims=True)
        xhat = (x - mean) * jax.lax.rsqrt(var + EPS)
        return xhat * gamma[None, :, None, None] + beta[None, :, None, None]

    x = bn(jax.nn.relu(conv(x_nchw, w1, b1)))
    x = bn(jax.nn.relu(conv(x, w2, b2)))
    return x


if __name__ == "__main__":
    key = jax.random.PRNGKey(0)
    kx, k1, kb1, k2, kb2 = jax.random.split(key, 5)
    N, Cin, Cout, H, W = 2, 4, 8, 16, 16

    x = jax.random.normal(kx, (N, Cin, H, W), jnp.float32)
    # Deterministic synthetic parameters (shapes per ConvBlock.__init__).
    w1 = 0.1 * jax.random.normal(k1, (Cout, Cin, 3, 3), jnp.float32)
    b1 = 0.1 * jax.random.normal(kb1, (Cout,), jnp.float32)
    w2 = 0.1 * jax.random.normal(k2, (Cout, Cout, 3, 3), jnp.float32)
    b2 = 0.1 * jax.random.normal(kb2, (Cout,), jnp.float32)
    gamma = jnp.ones((Cout,), jnp.float32)    # BatchNorm2d default weight
    beta = jnp.zeros((Cout,), jnp.float32)    # BatchNorm2d default bias
    params = (w1, b1, w2, b2, gamma, beta)

    ref = reference(x, params)

    # Strict-parity path: f32 taps/weights, f32 accumulation.
    out = jax.block_until_ready(jax.jit(conv_block)(x, params))
    assert out.shape == (N, Cout, H, W), out.shape
    assert jnp.allclose(out, ref, atol=1e-4, rtol=1e-4), \
        float(jnp.max(jnp.abs(out - ref)))

    # Bandwidth path (v6e/v7x review item): bf16 taps/weights, f32 accum + BN
    # stats.  Loose sanity tolerance reflects bf16 input quantization.
    conv_block_bf16 = jax.jit(
        functools.partial(conv_block, compute_dtype=jnp.bfloat16))
    out_bf16 = jax.block_until_ready(conv_block_bf16(x, params))
    assert float(jnp.max(jnp.abs(out_bf16 - ref))) < 0.1

    print("KERNEL_OK")
</pallas_src>

<mosaic_0001>
module attributes {stable_mosaic.version = 11 : i64} {
  func.func @_conv_relu_stats_kernel(%arg0: i32, %arg1: memref<1x18x18x4xf32, #tpu.memory_space<vmem>>, %arg2: memref<36x8xf32, #tpu.memory_space<vmem>>, %arg3: memref<1x8xf32, #tpu.memory_space<vmem>>, %arg4: memref<256x8xf32, #tpu.memory_space<vmem>>, %arg5: memref<1x2x8xf32, #tpu.memory_space<vmem>>, %arg6: memref<256x36xf32, #tpu.memory_space<vmem>>) attributes {dimension_semantics = [#tpu.dimension_semantics<parallel>], iteration_bounds = array<i64: 2>, scalar_prefetch = 0 : i64, scratch_operands = 1 : i64, tpu.core_type = #tpu.core_type<tc>, window_params = [{transform_indices = @transform_0, window_bounds = array<i64: 1, 18, 18, 4>}, {pipeline_mode = #tpu.pipeline_mode<synchronous>, transform_indices = @transform_1, window_bounds = array<i64: 36, 8>}, {pipeline_mode = #tpu.pipeline_mode<synchronous>, transform_indices = @transform_2, window_bounds = array<i64: 1, 8>}, {transform_indices = @transform_3, window_bounds = array<i64: 256, 8>}, {transform_indices = @transform_4, window_bounds = array<i64: 1, 2, 8>}]} {
    %c0 = arith.constant 0 : index
    %c0_0 = arith.constant 0 : index
    %c0_1 = arith.constant 0 : index
    %c0_2 = arith.constant 0 : index
    %0 = vector.load %arg1[%c0, %c0_0, %c0_1, %c0_2] : memref<1x18x18x4xf32, #tpu.memory_space<vmem>>, vector<1x16x16x4xf32>
    %1 = vector.shape_cast %0 : vector<1x16x16x4xf32> to vector<16x16x4xf32>
    %2 = vector.shape_cast %1 : vector<16x16x4xf32> to vector<256x4xf32>
    %c0_3 = arith.constant 0 : index
    %c0_4 = arith.constant 0 : index
    %3 = vector.load %arg6[%c0_3, %c0_4] : memref<256x36xf32, #tpu.memory_space<vmem>>, vector<256x4xf32>
    tpu.vector_store %arg6[%c0_3, %c0_4], %2 {strides = array<i32>} : memref<256x36xf32, #tpu.memory_space<vmem>>, vector<256x4xf32>,
    %c0_5 = arith.constant 0 : index
    %c0_6 = arith.constant 0 : index
    %c1 = arith.constant 1 : index
    %c0_7 = arith.constant 0 : index
    %4 = vector.load %arg1[%c0_5, %c0_6, %c1, %c0_7] : memref<1x18x18x4xf32, #tpu.memory_space<vmem>>, vector<1x16x16x4xf32>
    %5 = vector.shape_cast %4 : vector<1x16x16x4xf32> to vector<16x16x4xf32>
    %6 = vector.shape_cast %5 : vector<16x16x4xf32> to vector<256x4xf32>
    %c0_8 = arith.constant 0 : index
    %c4 = arith.constant 4 : index
    %7 = vector.load %arg6[%c0_8, %c4] : memref<256x36xf32, #tpu.memory_space<vmem>>, vector<256x4xf32>
    tpu.vector_store %arg6[%c0_8, %c4], %6 {strides = array<i32>} : memref<256x36xf32, #tpu.memory_space<vmem>>, vector<256x4xf32>,
    %c0_9 = arith.constant 0 : index
    %c0_10 = arith.constant 0 : index
    %c2 = arith.constant 2 : index
    %c0_11 = arith.constant 0 : index
    %8 = vector.load %arg1[%c0_9, %c0_10, %c2, %c0_11] : memref<1x18x18x4xf32, #tpu.memory_space<vmem>>, vector<1x16x16x4xf32>
    %9 = vector.shape_cast %8 : vector<1x16x16x4xf32> to vector<16x16x4xf32>
    %10 = vector.shape_cast %9 : vector<16x16x4xf32> to vector<256x4xf32>
    %c0_12 = arith.constant 0 : index
    %c8 = arith.constant 8 : index
    %11 = vector.load %arg6[%c0_12, %c8] : memref<256x36xf32, #tpu.memory_space<vmem>>, vector<256x4xf32>
    tpu.vector_store %arg6[%c0_12, %c8], %10 {strides = array<i32>} : memref<256x36xf32, #tpu.memory_space<vmem>>, vector<256x4xf32>,
    %c0_13 = arith.constant 0 : index
    %c1_14 = arith.constant 1 : index
    %c0_15 = arith.constant 0 : index
    %c0_16 = arith.constant 0 : index
    %12 = vector.load %arg1[%c0_13, %c1_14, %c0_15, %c0_16] : memref<1x18x18x4xf32, #tpu.memory_space<vmem>>, vector<1x16x16x4xf32>
    %13 = vector.shape_cast %12 : vector<1x16x16x4xf32> to vector<16x16x4xf32>
    %14 = vector.shape_cast %13 : vector<16x16x4xf32> to vector<256x4xf32>
    %c0_17 = arith.constant 0 : index
    %c12 = arith.constant 12 : index
    %15 = vector.load %arg6[%c0_17, %c12] : memref<256x36xf32, #tpu.memory_space<vmem>>, vector<256x4xf32>
    tpu.vector_store %arg6[%c0_17, %c12], %14 {strides = array<i32>} : memref<256x36xf32, #tpu.memory_space<vmem>>, vector<256x4xf32>,
    %c0_18 = arith.constant 0 : index
    %c1_19 = arith.constant 1 : index
    %c1_20 = arith.constant 1 : index
    %c0_21 = arith.constant 0 : index
    %16 = vector.load %arg1[%c0_18, %c1_19, %c1_20, %c0_21] : memref<1x18x18x4xf32, #tpu.memory_space<vmem>>, vector<1x16x16x4xf32>
    %17 = vector.shape_cast %16 : vector<1x16x16x4xf32> to vector<16x16x4xf32>
    %18 = vector.shape_cast %17 : vector<16x16x4xf32> to vector<256x4xf32>
    %c0_22 = arith.constant 0 : index
    %c16 = arith.constant 16 : index
    %19 = vector.load %arg6[%c0_22, %c16] : memref<256x36xf32, #tpu.memory_space<vmem>>, vector<256x4xf32>
    tpu.vector_store %arg6[%c0_22, %c16], %18 {strides = array<i32>} : memref<256x36xf32, #tpu.memory_space<vmem>>, vector<256x4xf32>,
    %c0_23 = arith.constant 0 : index
    %c1_24 = arith.constant 1 : index
    %c2_25 = arith.constant 2 : index
    %c0_26 = arith.constant 0 : index
    %20 = vector.load %arg1[%c0_23, %c1_24, %c2_25, %c0_26] : memref<1x18x18x4xf32, #tpu.memory_space<vmem>>, vector<1x16x16x4xf32>
    %21 = vector.shape_cast %20 : vector<1x16x16x4xf32> to vector<16x16x4xf32>
    %22 = vector.shape_cast %21 : vector<16x16x4xf32> to vector<256x4xf32>
    %c0_27 = arith.constant 0 : index
    %c20 = arith.constant 20 : index
    %23 = vector.load %arg6[%c0_27, %c20] : memref<256x36xf32, #tpu.memory_space<vmem>>, vector<256x4xf32>
    tpu.vector_store %arg6[%c0_27, %c20], %22 {strides = array<i32>} : memref<256x36xf32, #tpu.memory_space<vmem>>, vector<256x4xf32>,
    %c0_28 = arith.constant 0 : index
    %c2_29 = arith.constant 2 : index
    %c0_30 = arith.constant 0 : index
    %c0_31 = arith.constant 0 : index
    %24 = vector.load %arg1[%c0_28, %c2_29, %c0_30, %c0_31] : memref<1x18x18x4xf32, #tpu.memory_space<vmem>>, vector<1x16x16x4xf32>
    %25 = vector.shape_cast %24 : vector<1x16x16x4xf32> to vector<16x16x4xf32>
    %26 = vector.shape_cast %25 : vector<16x16x4xf32> to vector<256x4xf32>
    %c0_32 = arith.constant 0 : index
    %c24 = arith.constant 24 : index
    %27 = vector.load %arg6[%c0_32, %c24] : memref<256x36xf32, #tpu.memory_space<vmem>>, vector<256x4xf32>
    tpu.vector_store %arg6[%c0_32, %c24], %26 {strides = array<i32>} : memref<256x36xf32, #tpu.memory_space<vmem>>, vector<256x4xf32>,
    %c0_33 = arith.constant 0 : index
    %c2_34 = arith.constant 2 : index
    %c1_35 = arith.constant 1 : index
    %c0_36 = arith.constant 0 : index
    %28 = vector.load %arg1[%c0_33, %c2_34, %c1_35, %c0_36] : memref<1x18x18x4xf32, #tpu.memory_space<vmem>>, vector<1x16x16x4xf32>
    %29 = vector.shape_cast %28 : vector<1x16x16x4xf32> to vector<16x16x4xf32>
    %30 = vector.shape_cast %29 : vector<16x16x4xf32> to vector<256x4xf32>
    %c0_37 = arith.constant 0 : index
    %c28 = arith.constant 28 : index
    %31 = vector.load %arg6[%c0_37, %c28] : memref<256x36xf32, #tpu.memory_space<vmem>>, vector<256x4xf32>
    tpu.vector_store %arg6[%c0_37, %c28], %30 {strides = array<i32>} : memref<256x36xf32, #tpu.memory_space<vmem>>, vector<256x4xf32>,
    %c0_38 = arith.constant 0 : index
    %c2_39 = arith.constant 2 : index
    %c2_40 = arith.constant 2 : index
    %c0_41 = arith.constant 0 : index
    %32 = vector.load %arg1[%c0_38, %c2_39, %c2_40, %c0_41] : memref<1x18x18x4xf32, #tpu.memory_space<vmem>>, vector<1x16x16x4xf32>
    %33 = vector.shape_cast %32 : vector<1x16x16x4xf32> to vector<16x16x4xf32>
    %34 = vector.shape_cast %33 : vector<16x16x4xf32> to vector<256x4xf32>
    %c0_42 = arith.constant 0 : index
    %c32 = arith.constant 32 : index
    %35 = vector.load %arg6[%c0_42, %c32] : memref<256x36xf32, #tpu.memory_space<vmem>>, vector<256x4xf32>
    tpu.vector_store %arg6[%c0_42, %c32], %34 {strides = array<i32>} : memref<256x36xf32, #tpu.memory_space<vmem>>, vector<256x4xf32>,
    %c0_43 = arith.constant 0 : index
    %c0_44 = arith.constant 0 : index
    %36 = vector.load %arg6[%c0_43, %c0_44] : memref<256x36xf32, #tpu.memory_space<vmem>>, vector<256x36xf32>
    %c0_45 = arith.constant 0 : index
    %c0_46 = arith.constant 0 : index
    %37 = vector.load %arg2[%c0_45, %c0_46] : memref<36x8xf32, #tpu.memory_space<vmem>>, vector<36x8xf32>
    %cst = arith.constant dense<0.000000e+00> : vector<256x8xf32>
    %38 = tpu.matmul %36, %37, %cst {dimension_numbers = #tpu.dot_dimension_numbers<[1], [0], [0], [1], [0, 0, 1, 1], [], []>} : vector<256x36xf32>, vector<36x8xf32>, vector<256x8xf32> -> vector<256x8xf32>
    %c0_47 = arith.constant 0 : index
    %c0_48 = arith.constant 0 : index
    %39 = vector.load %arg3[%c0_47, %c0_48] : memref<1x8xf32, #tpu.memory_space<vmem>>, vector<1x8xf32>
    %40 = vector.broadcast %39 : vector<1x8xf32> to vector<256x8xf32>
    %41 = arith.addf %38, %40 : vector<256x8xf32>
    %cst_49 = arith.constant 0.000000e+00 : f32
    %42 = vector.broadcast %cst_49 : f32 to vector<256x8xf32>
    %43 = arith.maximumf %41, %42 : vector<256x8xf32>
    %c0_50 = arith.constant 0 : index
    %c0_51 = arith.constant 0 : index
    %44 = vector.load %arg4[%c0_50, %c0_51] : memref<256x8xf32, #tpu.memory_space<vmem>>, vector<256x8xf32>
    tpu.vector_store %arg4[%c0_50, %c0_51], %43 {strides = array<i32>} : memref<256x8xf32, #tpu.memory_space<vmem>>, vector<256x8xf32>,
    %cst_52 = arith.constant 1.000000e+00 : f32
    %45 = vector.broadcast %cst_52 : f32 to vector<1x256xf32>
    %cst_53 = arith.constant dense<0.000000e+00> : vector<1x8xf32>
    %46 = tpu.matmul %45, %43, %cst_53 {dimension_numbers = #tpu.dot_dimension_numbers<[1], [0], [0], [1], [0, 0, 1, 1], [], []>} : vector<1x256xf32>, vector<256x8xf32>, vector<1x8xf32> -> vector<1x8xf32>
    %c0_54 = arith.constant 0 : index
    %c0_55 = arith.constant 0 : index
    %c0_56 = arith.constant 0 : index
    %47 = vector.load %arg5[%c0_54, %c0_55, %c0_56] : memref<1x2x8xf32, #tpu.memory_space<vmem>>, vector<1x1x8xf32>
    %48 = vector.shape_cast %47 : vector<1x1x8xf32> to vector<1x8xf32>
    %49 = vector.shape_cast %46 : vector<1x8xf32> to vector<1x1x8xf32>
    tpu.vector_store %arg5[%c0_54, %c0_55, %c0_56], %49 {strides = array<i32>} : memref<1x2x8xf32, #tpu.memory_space<vmem>>, vector<1x1x8xf32>,
    %50 = arith.mulf %43, %43 : vector<256x8xf32>
    %cst_57 = arith.constant dense<0.000000e+00> : vector<1x8xf32>
    %51 = tpu.matmul %45, %50, %cst_57 {dimension_numbers = #tpu.dot_dimension_numbers<[1], [0], [0], [1], [0, 0, 1, 1], [], []>} : vector<1x256xf32>, vector<256x8xf32>, vector<1x8xf32> -> vector<1x8xf32>
    %c0_58 = arith.constant 0 : index
    %c1_59 = arith.constant 1 : index
    %c0_60 = arith.constant 0 : index
    %52 = vector.load %arg5[%c0_58, %c1_59, %c0_60] : memref<1x2x8xf32, #tpu.memory_space<vmem>>, vector<1x1x8xf32>
    %53 = vector.shape_cast %52 : vector<1x1x8xf32> to vector<1x8xf32>
    %54 = vector.shape_cast %51 : vector<1x8xf32> to vector<1x1x8xf32>
    tpu.vector_store %arg5[%c0_58, %c1_59, %c0_60], %54 {strides = array<i32>} : memref<1x2x8xf32, #tpu.memory_space<vmem>>, vector<1x1x8xf32>,
    return
  }
  func.func @transform_0(%arg0: i32) -> (i32, i32, i32, i32) {
    %c0_i32 = arith.constant 0 : i32
    %c0_i32_0 = arith.constant 0 : i32
    %c0_i32_1 = arith.constant 0 : i32
    %c0_i32_2 = arith.constant 0 : i32
    return %arg0, %c0_i32, %c0_i32_0, %c0_i32_1 : i32, i32, i32, i32
  }
  func.func @transform_1(%arg0: i32) -> (i32, i32) {
    %c0_i32 = arith.constant 0 : i32
    %c0_i32_0 = arith.constant 0 : i32
    %c0_i32_1 = arith.constant 0 : i32
    return %c0_i32, %c0_i32_0 : i32, i32
  }
  func.func @transform_2(%arg0: i32) -> (i32, i32) {
    %c0_i32 = arith.constant 0 : i32
    %c0_i32_0 = arith.constant 0 : i32
    %c0_i32_1 = arith.constant 0 : i32
    return %c0_i32, %c0_i32_0 : i32, i32
  }
  func.func @transform_3(%arg0: i32) -> (i32, i32) {
    %c0_i32 = arith.constant 0 : i32
    %c0_i32_0 = arith.constant 0 : i32
    return %arg0, %c0_i32 : i32, i32
  }
  func.func @transform_4(%arg0: i32) -> (i32, i32, i32) {
    %c0_i32 = arith.constant 0 : i32
    %c0_i32_0 = arith.constant 0 : i32
    %c0_i32_1 = arith.constant 0 : i32
    return %arg0, %c0_i32, %c0_i32_0 : i32, i32, i32
  }
}

module attributes {stable_mosaic.version = 11 : i64} {
  func.func @_bn_apply_kernel(%arg0: i32, %arg1: memref<256x8xf32, #tpu.memory_space<vmem>>, %arg2: memref<1x8xf32, #tpu.memory_space<vmem>>, %arg3: memref<1x8xf32, #tpu.memory_space<vmem>>, %arg4: memref<256x8xf32, #tpu.memory_space<vmem>>) attributes {dimension_semantics = [#tpu.dimension_semantics<parallel>], iteration_bounds = array<i64: 2>, scalar_prefetch = 0 : i64, scratch_operands = 0 : i64, tpu.core_type = #tpu.core_type<tc>, window_params = [{transform_indices = @transform_0, window_bounds = array<i64: 256, 8>}, {pipeline_mode = #tpu.pipeline_mode<synchronous>, transform_indices = @transform_1, window_bounds = array<i64: 1, 8>}, {pipeline_mode = #tpu.pipeline_mode<synchronous>, transform_indices = @transform_2, window_bounds = array<i64: 1, 8>}, {transform_indices = @transform_3, window_bounds = array<i64: 256, 8>}]} {
    %c0 = arith.constant 0 : index
    %c0_0 = arith.constant 0 : index
    %0 = vector.load %arg1[%c0, %c0_0] : memref<256x8xf32, #tpu.memory_space<vmem>>, vector<256x8xf32>
    %c0_1 = arith.constant 0 : index
    %c0_2 = arith.constant 0 : index
    %1 = vector.load %arg2[%c0_1, %c0_2] : memref<1x8xf32, #tpu.memory_space<vmem>>, vector<1x8xf32>
    %2 = vector.broadcast %1 : vector<1x8xf32> to vector<256x8xf32>
    %3 = arith.mulf %0, %2 : vector<256x8xf32>
    %c0_3 = arith.constant 0 : index
    %c0_4 = arith.constant 0 : index
    %4 = vector.load %arg3[%c0_3, %c0_4] : memref<1x8xf32, #tpu.memory_space<vmem>>, vector<1x8xf32>
    %5 = vector.broadcast %4 : vector<1x8xf32> to vector<256x8xf32>
    %6 = arith.addf %3, %5 : vector<256x8xf32>
    %c0_5 = arith.constant 0 : index
    %c0_6 = arith.constant 0 : index
    %7 = vector.load %arg4[%c0_5, %c0_6] : memref<256x8xf32, #tpu.memory_space<vmem>>, vector<256x8xf32>
    tpu.vector_store %arg4[%c0_5, %c0_6], %6 {strides = array<i32>} : memref<256x8xf32, #tpu.memory_space<vmem>>, vector<256x8xf32>,
    return
  }
  func.func @transform_0(%arg0: i32) -> (i32, i32) {
    %c0_i32 = arith.constant 0 : i32
    %c0_i32_0 = arith.constant 0 : i32
    return %arg0, %c0_i32 : i32, i32
  }
  func.func @transform_1(%arg0: i32) -> (i32, i32) {
    %c0_i32 = arith.constant 0 : i32
    %c0_i32_0 = arith.constant 0 : i32
    %c0_i32_1 = arith.constant 0 : i32
    return %c0_i32, %c0_i32_0 : i32, i32
  }
  func.func @transform_2(%arg0: i32) -> (i32, i32) {
    %c0_i32 = arith.constant 0 : i32
    %c0_i32_0 = arith.constant 0 : i32
    %c0_i32_1 = arith.constant 0 : i32
    return %c0_i32, %c0_i32_0 : i32, i32
  }
  func.func @transform_3(%arg0: i32) -> (i32, i32) {
    %c0_i32 = arith.constant 0 : i32
    %c0_i32_0 = arith.constant 0 : i32
    return %arg0, %c0_i32 : i32, i32
  }
}

module attributes {stable_mosaic.version = 11 : i64} {
  func.func @_conv_relu_stats_kernel(%arg0: i32, %arg1: memref<1x18x18x8xf32, #tpu.memory_space<vmem>>, %arg2: memref<72x8xf32, #tpu.memory_space<vmem>>, %arg3: memref<1x8xf32, #tpu.memory_space<vmem>>, %arg4: memref<256x8xf32, #tpu.memory_space<vmem>>, %arg5: memref<1x2x8xf32, #tpu.memory_space<vmem>>, %arg6: memref<256x72xf32, #tpu.memory_space<vmem>>) attributes {dimension_semantics = [#tpu.dimension_semantics<parallel>], iteration_bounds = array<i64: 2>, scalar_prefetch = 0 : i64, scratch_operands = 1 : i64, tpu.core_type = #tpu.core_type<tc>, window_params = [{transform_indices = @transform_0, window_bounds = array<i64: 1, 18, 18, 8>}, {pipeline_mode = #tpu.pipeline_mode<synchronous>, transform_indices = @transform_1, window_bounds = array<i64: 72, 8>}, {pipeline_mode = #tpu.pipeline_mode<synchronous>, transform_indices = @transform_2, window_bounds = array<i64: 1, 8>}, {transform_indices = @transform_3, window_bounds = array<i64: 256, 8>}, {transform_indices = @transform_4, window_bounds = array<i64: 1, 2, 8>}]} {
    %c0 = arith.constant 0 : index
    %c0_0 = arith.constant 0 : index
    %c0_1 = arith.constant 0 : index
    %c0_2 = arith.constant 0 : index
    %0 = vector.load %arg1[%c0, %c0_0, %c0_1, %c0_2] : memref<1x18x18x8xf32, #tpu.memory_space<vmem>>, vector<1x16x16x8xf32>
    %1 = vector.shape_cast %0 : vector<1x16x16x8xf32> to vector<16x16x8xf32>
    %2 = vector.shape_cast %1 : vector<16x16x8xf32> to vector<256x8xf32>
    %c0_3 = arith.constant 0 : index
    %c0_4 = arith.constant 0 : index
    %3 = vector.load %arg6[%c0_3, %c0_4] : memref<256x72xf32, #tpu.memory_space<vmem>>, vector<256x8xf32>
    tpu.vector_store %arg6[%c0_3, %c0_4], %2 {strides = array<i32>} : memref<256x72xf32, #tpu.memory_space<vmem>>, vector<256x8xf32>,
    %c0_5 = arith.constant 0 : index
    %c0_6 = arith.constant 0 : index
    %c1 = arith.constant 1 : index
    %c0_7 = arith.constant 0 : index
    %4 = vector.load %arg1[%c0_5, %c0_6, %c1, %c0_7] : memref<1x18x18x8xf32, #tpu.memory_space<vmem>>, vector<1x16x16x8xf32>
    %5 = vector.shape_cast %4 : vector<1x16x16x8xf32> to vector<16x16x8xf32>
    %6 = vector.shape_cast %5 : vector<16x16x8xf32> to vector<256x8xf32>
    %c0_8 = arith.constant 0 : index
    %c8 = arith.constant 8 : index
    %7 = vector.load %arg6[%c0_8, %c8] : memref<256x72xf32, #tpu.memory_space<vmem>>, vector<256x8xf32>
    tpu.vector_store %arg6[%c0_8, %c8], %6 {strides = array<i32>} : memref<256x72xf32, #tpu.memory_space<vmem>>, vector<256x8xf32>,
    %c0_9 = arith.constant 0 : index
    %c0_10 = arith.constant 0 : index
    %c2 = arith.constant 2 : index
    %c0_11 = arith.constant 0 : index
    %8 = vector.load %arg1[%c0_9, %c0_10, %c2, %c0_11] : memref<1x18x18x8xf32, #tpu.memory_space<vmem>>, vector<1x16x16x8xf32>
    %9 = vector.shape_cast %8 : vector<1x16x16x8xf32> to vector<16x16x8xf32>
    %10 = vector.shape_cast %9 : vector<16x16x8xf32> to vector<256x8xf32>
    %c0_12 = arith.constant 0 : index
    %c16 = arith.constant 16 : index
    %11 = vector.load %arg6[%c0_12, %c16] : memref<256x72xf32, #tpu.memory_space<vmem>>, vector<256x8xf32>
    tpu.vector_store %arg6[%c0_12, %c16], %10 {strides = array<i32>} : memref<256x72xf32, #tpu.memory_space<vmem>>, vector<256x8xf32>,
    %c0_13 = arith.constant 0 : index
    %c1_14 = arith.constant 1 : index
    %c0_15 = arith.constant 0 : index
    %c0_16 = arith.constant 0 : index
    %12 = vector.load %arg1[%c0_13, %c1_14, %c0_15, %c0_16] : memref<1x18x18x8xf32, #tpu.memory_space<vmem>>, vector<1x16x16x8xf32>
    %13 = vector.shape_cast %12 : vector<1x16x16x8xf32> to vector<16x16x8xf32>
    %14 = vector.shape_cast %13 : vector<16x16x8xf32> to vector<256x8xf32>
    %c0_17 = arith.constant 0 : index
    %c24 = arith.constant 24 : index
    %15 = vector.load %arg6[%c0_17, %c24] : memref<256x72xf32, #tpu.memory_space<vmem>>, vector<256x8xf32>
    tpu.vector_store %arg6[%c0_17, %c24], %14 {strides = array<i32>} : memref<256x72xf32, #tpu.memory_space<vmem>>, vector<256x8xf32>,
    %c0_18 = arith.constant 0 : index
    %c1_19 = arith.constant 1 : index
    %c1_20 = arith.constant 1 : index
    %c0_21 = arith.constant 0 : index
    %16 = vector.load %arg1[%c0_18, %c1_19, %c1_20, %c0_21] : memref<1x18x18x8xf32, #tpu.memory_space<vmem>>, vector<1x16x16x8xf32>
    %17 = vector.shape_cast %16 : vector<1x16x16x8xf32> to vector<16x16x8xf32>
    %18 = vector.shape_cast %17 : vector<16x16x8xf32> to vector<256x8xf32>
    %c0_22 = arith.constant 0 : index
    %c32 = arith.constant 32 : index
    %19 = vector.load %arg6[%c0_22, %c32] : memref<256x72xf32, #tpu.memory_space<vmem>>, vector<256x8xf32>
    tpu.vector_store %arg6[%c0_22, %c32], %18 {strides = array<i32>} : memref<256x72xf32, #tpu.memory_space<vmem>>, vector<256x8xf32>,
    %c0_23 = arith.constant 0 : index
    %c1_24 = arith.constant 1 : index
    %c2_25 = arith.constant 2 : index
    %c0_26 = arith.constant 0 : index
    %20 = vector.load %arg1[%c0_23, %c1_24, %c2_25, %c0_26] : memref<1x18x18x8xf32, #tpu.memory_space<vmem>>, vector<1x16x16x8xf32>
    %21 = vector.shape_cast %20 : vector<1x16x16x8xf32> to vector<16x16x8xf32>
    %22 = vector.shape_cast %21 : vector<16x16x8xf32> to vector<256x8xf32>
    %c0_27 = arith.constant 0 : index
    %c40 = arith.constant 40 : index
    %23 = vector.load %arg6[%c0_27, %c40] : memref<256x72xf32, #tpu.memory_space<vmem>>, vector<256x8xf32>
    tpu.vector_store %arg6[%c0_27, %c40], %22 {strides = array<i32>} : memref<256x72xf32, #tpu.memory_space<vmem>>, vector<256x8xf32>,
    %c0_28 = arith.constant 0 : index
    %c2_29 = arith.constant 2 : index
    %c0_30 = arith.constant 0 : index
    %c0_31 = arith.constant 0 : index
    %24 = vector.load %arg1[%c0_28, %c2_29, %c0_30, %c0_31] : memref<1x18x18x8xf32, #tpu.memory_space<vmem>>, vector<1x16x16x8xf32>
    %25 = vector.shape_cast %24 : vector<1x16x16x8xf32> to vector<16x16x8xf32>
    %26 = vector.shape_cast %25 : vector<16x16x8xf32> to vector<256x8xf32>
    %c0_32 = arith.constant 0 : index
    %c48 = arith.constant 48 : index
    %27 = vector.load %arg6[%c0_32, %c48] : memref<256x72xf32, #tpu.memory_space<vmem>>, vector<256x8xf32>
    tpu.vector_store %arg6[%c0_32, %c48], %26 {strides = array<i32>} : memref<256x72xf32, #tpu.memory_space<vmem>>, vector<256x8xf32>,
    %c0_33 = arith.constant 0 : index
    %c2_34 = arith.constant 2 : index
    %c1_35 = arith.constant 1 : index
    %c0_36 = arith.constant 0 : index
    %28 = vector.load %arg1[%c0_33, %c2_34, %c1_35, %c0_36] : memref<1x18x18x8xf32, #tpu.memory_space<vmem>>, vector<1x16x16x8xf32>
    %29 = vector.shape_cast %28 : vector<1x16x16x8xf32> to vector<16x16x8xf32>
    %30 = vector.shape_cast %29 : vector<16x16x8xf32> to vector<256x8xf32>
    %c0_37 = arith.constant 0 : index
    %c56 = arith.constant 56 : index
    %31 = vector.load %arg6[%c0_37, %c56] : memref<256x72xf32, #tpu.memory_space<vmem>>, vector<256x8xf32>
    tpu.vector_store %arg6[%c0_37, %c56], %30 {strides = array<i32>} : memref<256x72xf32, #tpu.memory_space<vmem>>, vector<256x8xf32>,
    %c0_38 = arith.constant 0 : index
    %c2_39 = arith.constant 2 : index
    %c2_40 = arith.constant 2 : index
    %c0_41 = arith.constant 0 : index
    %32 = vector.load %arg1[%c0_38, %c2_39, %c2_40, %c0_41] : memref<1x18x18x8xf32, #tpu.memory_space<vmem>>, vector<1x16x16x8xf32>
    %33 = vector.shape_cast %32 : vector<1x16x16x8xf32> to vector<16x16x8xf32>
    %34 = vector.shape_cast %33 : vector<16x16x8xf32> to vector<256x8xf32>
    %c0_42 = arith.constant 0 : index
    %c64 = arith.constant 64 : index
    %35 = vector.load %arg6[%c0_42, %c64] : memref<256x72xf32, #tpu.memory_space<vmem>>, vector<256x8xf32>
    tpu.vector_store %arg6[%c0_42, %c64], %34 {strides = array<i32>} : memref<256x72xf32, #tpu.memory_space<vmem>>, vector<256x8xf32>,
    %c0_43 = arith.constant 0 : index
    %c0_44 = arith.constant 0 : index
    %36 = vector.load %arg6[%c0_43, %c0_44] : memref<256x72xf32, #tpu.memory_space<vmem>>, vector<256x72xf32>
    %c0_45 = arith.constant 0 : index
    %c0_46 = arith.constant 0 : index
    %37 = vector.load %arg2[%c0_45, %c0_46] : memref<72x8xf32, #tpu.memory_space<vmem>>, vector<72x8xf32>
    %cst = arith.constant dense<0.000000e+00> : vector<256x8xf32>
    %38 = tpu.matmul %36, %37, %cst {dimension_numbers = #tpu.dot_dimension_numbers<[1], [0], [0], [1], [0, 0, 1, 1], [], []>} : vector<256x72xf32>, vector<72x8xf32>, vector<256x8xf32> -> vector<256x8xf32>
    %c0_47 = arith.constant 0 : index
    %c0_48 = arith.constant 0 : index
    %39 = vector.load %arg3[%c0_47, %c0_48] : memref<1x8xf32, #tpu.memory_space<vmem>>, vector<1x8xf32>
    %40 = vector.broadcast %39 : vector<1x8xf32> to vector<256x8xf32>
    %41 = arith.addf %38, %40 : vector<256x8xf32>
    %cst_49 = arith.constant 0.000000e+00 : f32
    %42 = vector.broadcast %cst_49 : f32 to vector<256x8xf32>
    %43 = arith.maximumf %41, %42 : vector<256x8xf32>
    %c0_50 = arith.constant 0 : index
    %c0_51 = arith.constant 0 : index
    %44 = vector.load %arg4[%c0_50, %c0_51] : memref<256x8xf32, #tpu.memory_space<vmem>>, vector<256x8xf32>
    tpu.vector_store %arg4[%c0_50, %c0_51], %43 {strides = array<i32>} : memref<256x8xf32, #tpu.memory_space<vmem>>, vector<256x8xf32>,
    %cst_52 = arith.constant 1.000000e+00 : f32
    %45 = vector.broadcast %cst_52 : f32 to vector<1x256xf32>
    %cst_53 = arith.constant dense<0.000000e+00> : vector<1x8xf32>
    %46 = tpu.matmul %45, %43, %cst_53 {dimension_numbers = #tpu.dot_dimension_numbers<[1], [0], [0], [1], [0, 0, 1, 1], [], []>} : vector<1x256xf32>, vector<256x8xf32>, vector<1x8xf32> -> vector<1x8xf32>
    %c0_54 = arith.constant 0 : index
    %c0_55 = arith.constant 0 : index
    %c0_56 = arith.constant 0 : index
    %47 = vector.load %arg5[%c0_54, %c0_55, %c0_56] : memref<1x2x8xf32, #tpu.memory_space<vmem>>, vector<1x1x8xf32>
    %48 = vector.shape_cast %47 : vector<1x1x8xf32> to vector<1x8xf32>
    %49 = vector.shape_cast %46 : vector<1x8xf32> to vector<1x1x8xf32>
    tpu.vector_store %arg5[%c0_54, %c0_55, %c0_56], %49 {strides = array<i32>} : memref<1x2x8xf32, #tpu.memory_space<vmem>>, vector<1x1x8xf32>,
    %50 = arith.mulf %43, %43 : vector<256x8xf32>
    %cst_57 = arith.constant dense<0.000000e+00> : vector<1x8xf32>
    %51 = tpu.matmul %45, %50, %cst_57 {dimension_numbers = #tpu.dot_dimension_numbers<[1], [0], [0], [1], [0, 0, 1, 1], [], []>} : vector<1x256xf32>, vector<256x8xf32>, vector<1x8xf32> -> vector<1x8xf32>
    %c0_58 = arith.constant 0 : index
    %c1_59 = arith.constant 1 : index
    %c0_60 = arith.constant 0 : index
    %52 = vector.load %arg5[%c0_58, %c1_59, %c0_60] : memref<1x2x8xf32, #tpu.memory_space<vmem>>, vector<1x1x8xf32>
    %53 = vector.shape_cast %52 : vector<1x1x8xf32> to vector<1x8xf32>
    %54 = vector.shape_cast %51 : vector<1x8xf32> to vector<1x1x8xf32>
    tpu.vector_store %arg5[%c0_58, %c1_59, %c0_60], %54 {strides = array<i32>} : memref<1x2x8xf32, #tpu.memory_space<vmem>>, vector<1x1x8xf32>,
    return
  }
  func.func @transform_0(%arg0: i32) -> (i32, i32, i32, i32) {
    %c0_i32 = arith.constant 0 : i32
    %c0_i32_0 = arith.constant 0 : i32
    %c0_i32_1 = arith.constant 0 : i32
    %c0_i32_2 = arith.constant 0 : i32
    return %arg0, %c0_i32, %c0_i32_0, %c0_i32_1 : i32, i32, i32, i32
  }
  func.func @transform_1(%arg0: i32) -> (i32, i32) {
    %c0_i32 = arith.constant 0 : i32
    %c0_i32_0 = arith.constant 0 : i32
    %c0_i32_1 = arith.constant 0 : i32
    return %c0_i32, %c0_i32_0 : i32, i32
  }
  func.func @transform_2(%arg0: i32) -> (i32, i32) {
    %c0_i32 = arith.constant 0 : i32
    %c0_i32_0 = arith.constant 0 : i32
    %c0_i32_1 = arith.constant 0 : i32
    return %c0_i32, %c0_i32_0 : i32, i32
  }
  func.func @transform_3(%arg0: i32) -> (i32, i32) {
    %c0_i32 = arith.constant 0 : i32
    %c0_i32_0 = arith.constant 0 : i32
    return %arg0, %c0_i32 : i32, i32
  }
  func.func @transform_4(%arg0: i32) -> (i32, i32, i32) {
    %c0_i32 = arith.constant 0 : i32
    %c0_i32_0 = arith.constant 0 : i32
    %c0_i32_1 = arith.constant 0 : i32
    return %arg0, %c0_i32, %c0_i32_0 : i32, i32, i32
  }
}

</mosaic_0001>

<bundles_post_ra>
// kernel: conv_block.5
= control target key start
LH: loop header
LB: loop body
LE: loop exit
PB: predicated region body
PF: predicated region fallthrough
CT: control target
= control target key end

     0   :  { %s422_s12 = smov 0   ;;  %s613_s0 = inlined_call_operand.vmem [shape: f32[512,8], index: 0, kind: input, shape index: {}]   ;;  %s614_s1 = inlined_call_operand.vmem [shape: f32[1,8], index: 1, kind: input, shape index: {}]   ;;  %s615_s2 = inlined_call_operand.vmem [shape: f32[1,8], index: 2, kind: input, shape index: {}]   ;;  %s616_s3 = inlined_call_operand.vmem [shape: f32[512,8], index: 3, kind: output, shape index: {}]  }
   0x1 LB: > { %s373_s13 = sadd.s32 4294967295, %s400_s12   ;;  %p377_p0 = scmp.ge.s32.totalorder %s400_s12, 1  ;;  %s400_s12 = sphi %s422_s12, %s13_s12  }
   0x2   : > { %p138_p1 = scmp.lt.s32.totalorder %s400_s12, 3 }
   0x4   : > { %p139_p2 = pnand %p377_p0, %p138_p1 }
   0x5   : > { %s378_s14 = sshll.u32 (!%p139_p2), %s373_s13, 5  ;;  %v433_v0 = vld [vmem:[%s614_s1] ss:$0 sm:$0xff] (!%p139_p2)  ;;  %vm284_vm0 = vcmask (!%p139_p2), 64512  }
   0x6   : > { %142 = sbr.rel (%p139_p2) target bundleno = 40 (0x28), region = 32  ;;  %p163_p3 = scmp.lt.s32.totalorder (!%p139_p2), %s378_s14, 63  ;;  %v443_v1 = vld [vmem:[%s615_s2] ss:$0 sm:$0xff] (!%p139_p2) }
   0xd   : > { %s618_s14 = smov (!%p163_p3, %s378_s14), 63 }
   0xe   : > { %s379_s15 = sshll.u32 %s618_s14, 3 }
   0xf   : > { %s438_s20 = scalar_lea.vmem %s613_s0, %s379_s15  ;;  %s457_s25 = scalar_lea.vmem %s616_s3, %s379_s15 }
  0x10   : > { %v174_v2 = vld [vmem:[%s438_s20] sm:$0xff]  ;;  %v175_v3 = vld [vmem:[%s438_s20 + $0x8] sm:$0xff]  ;;  %v176_v4 = vld [vmem:[%s438_s20 + $0x10] sm:$0xff] }
  0x11   : > { %v213_v5 = vmul.f32 %v433_v0, %v174_v2  ;;  %v214_v6 = vmul.f32 %v433_v0, %v175_v3  ;;  %v215_v7 = vmul.f32 %v433_v0, %v176_v4  ;;  %v177_v8 = vld [vmem:[%s438_s20 + $0x18] sm:$0xff]  ;;  %v178_v9 = vld [vmem:[%s438_s20 + $0x20] sm:$0xff]  ;;  %v179_v10 = vld [vmem:[%s438_s20 + $0x28] sm:$0xff] }
  0x12   : > { %v216_v11 = vmul.f32 %v433_v0, %v177_v8  ;;  %v217_v12 = vmul.f32 %v433_v0, %v178_v9  ;;  %v218_v13 = vmul.f32 %v433_v0, %v179_v10  ;;  %v180_v14 = vld [vmem:[%s438_s20 + $0x30] sm:$0xff]  ;;  %v181_v15 = vld [vmem:[%s438_s20 + $0x38] sm:$0xff]  ;;  %v182_v16 = vld [vmem:[%s438_s20 + $0x40] sm:$0xff] }
  0x13   : > { %v252_v17 = vadd.f32 %v443_v1, %v213_v5  ;;  %v253_v18 = vadd.f32 %v443_v1, %v214_v6  ;;  %v254_v19 = vadd.f32 %v443_v1, %v215_v7  ;;  %v219_v20 = vmul.f32 %v433_v0, %v180_v14  ;;  %v183_v21 = vld [vmem:[%s438_s20 + $0x48] sm:$0xff]  ;;  %v184_v22 = vld [vmem:[%s438_s20 + $0x50] sm:$0xff]  ;;  %v185_v23 = vld [vmem:[%s438_s20 + $0x58] sm:$0xff] }
  0x14   : > { %v255_v24 = vadd.f32 %v443_v1, %v216_v11  ;;  %v256_v25 = vadd.f32 %v443_v1, %v217_v12  ;;  %v257_v26 = vadd.f32 %v443_v1, %v218_v13  ;;  %v220_v27 = vmul.f32 %v433_v0, %v181_v15  ;;  %v186_v28 = vld [vmem:[%s438_s20 + $0x60] sm:$0xff]  ;;  %v187_v29 = vld [vmem:[%s438_s20 + $0x68] sm:$0xff]  ;;  %v188_v30 = vld [vmem:[%s438_s20 + $0x70] sm:$0xff] }
  0x15   : > { %285 = vst.msk [vmem:[%s457_s25] sm:$0xff] %vm284_vm0, %v252_v17  ;;  %286 = vst.msk [vmem:[%s457_s25 + $0x8] sm:$0xff] %vm284_vm0, %v253_v18  ;;  %v258_v31 = vadd.f32 %v443_v1, %v219_v20  ;;  %v221_v32 = vmul.f32 %v433_v0, %v182_v16  ;;  %v222_v33 = vmul.f32 %v433_v0, %v183_v21  ;;  %v189_v35 = vld [vmem:[%s438_s20 + $0x78] sm:$0xff]  ;;  %v190_v40 = vld [vmem:[%s438_s20 + $0x80] sm:$0xff] }
  0x16   : > { %287 = vst.msk [vmem:[%s457_s25 + $0x10] sm:$0xff] %vm284_vm0, %v254_v19  ;;  %v223_v34 = vmul.f32 %v433_v0, %v184_v22  ;;  %288 = vst.msk [vmem:[%s457_s25 + $0x18] sm:$0xff] %vm284_vm0, %v255_v24  ;;  %v259_v36 = vadd.f32 %v443_v1, %v220_v27  ;;  %v224_v37 = vmul.f32 %v433_v0, %v185_v23  ;;  %v191_v41 = vld [vmem:[%s438_s20 + $0x88] sm:$0xff]  ;;  %v192_v42 = vld [vmem:[%s438_s20 + $0x90] sm:$0xff] }
  0x17   : > { %289 = vst.msk [vmem:[%s457_s25 + $0x20] sm:$0xff] %vm284_vm0, %v256_v25  ;;  %290 = vst.msk [vmem:[%s457_s25 + $0x28] sm:$0xff] %vm284_vm0, %v257_v26  ;;  %v225_v38 = vmul.f32 %v433_v0, %v186_v28  ;;  %v226_v39 = vmul.f32 %v433_v0, %v187_v29  ;;  %v260_v43 = vadd.f32 %v443_v1, %v221_v32  ;;  %v193_v47 = vld [vmem:[%s438_s20 + $0x98] sm:$0xff]  ;;  %v194_v48 = vld [vmem:[%s438_s20 + $0xa0] sm:$0xff] }
  0x18   : > { %291 = vst.msk [vmem:[%s457_s25 + $0x30] sm:$0xff] %vm284_vm0, %v258_v31  ;;  %v261_v44 = vadd.f32 %v443_v1, %v222_v33  ;;  %v262_v45 = vadd.f32 %v443_v1, %v223_v34  ;;  %v227_v46 = vmul.f32 %v433_v0, %v188_v30  ;;  %v195_v49 = vld [vmem:[%s438_s20 + $0xa8] sm:$0xff]  ;;  %292 = vst.msk [vmem:[%s457_s25 + $0x38] sm:$0xff] %vm284_vm0, %v259_v36  ;;  %v196_v54 = vld [vmem:[%s438_s20 + $0xb0] sm:$0xff] }
  0x19   : > { %v263_v50 = vadd.f32 %v443_v1, %v224_v37  ;;  %v264_v51 = vadd.f32 %v443_v1, %v225_v38  ;;  %v265_v52 = vadd.f32 %v443_v1, %v226_v39  ;;  %v228_v53 = vmul.f32 %v433_v0, %v189_v35  ;;  %293 = vst.msk [vmem:[%s457_s25 + $0x40] sm:$0xff] %vm284_vm0, %v260_v43  ;;  %v197_v59 = vld [vmem:[%s438_s20 + $0xb8] sm:$0xff]  ;;  %v198_v2 = vld [vmem:[%s438_s20 + $0xc0] sm:$0xff]  ;;  %v199_v3 = vld [vmem:[%s438_s20 + $0xc8] sm:$0xff] }
  0x1a   : > { %294 = vst.msk [vmem:[%s457_s25 + $0x48] sm:$0xff] %vm284_vm0, %v261_v44  ;;  %295 = vst.msk [vmem:[%s457_s25 + $0x50] sm:$0xff] %vm284_vm0, %v262_v45  ;;  %v266_v55 = vadd.f32 %v443_v1, %v227_v46  ;;  %v229_v56 = vmul.f32 %v433_v0, %v190_v40  ;;  %v230_v57 = vmul.f32 %v433_v0, %v191_v41  ;;  %v200_v4 = vld [vmem:[%s438_s20 + $0xd0] sm:$0xff]  ;;  %v201_v9 = vld [vmem:[%s438_s20 + $0xd8] sm:$0xff] }
  0x1b   : > { %v231_v58 = vmul.f32 %v433_v0, %v192_v42  ;;  %296 = vst.msk [vmem:[%s457_s25 + $0x58] sm:$0xff] %vm284_vm0, %v263_v50  ;;  %297 = vst.msk [vmem:[%s457_s25 + $0x60] sm:$0xff] %vm284_vm0, %v264_v51  ;;  %v267_v60 = vadd.f32 %v443_v1, %v228_v53  ;;  %v232_v61 = vmul.f32 %v433_v0, %v193_v47  ;;  %v202_v10 = vld [vmem:[%s438_s20 + $0xe0] sm:$0xff]  ;;  %v203_v11 = vld [vmem:[%s438_s20 + $0xe8] sm:$0xff] }
  0x1c   : > { %298 = vst.msk [vmem:[%s457_s25 + $0x68] sm:$0xff] %vm284_vm0, %v265_v52  ;;  %v233_v62 = vmul.f32 %v433_v0, %v194_v48  ;;  %v234_v63 = vmul.f32 %v433_v0, %v195_v49  ;;  %299 = vst.msk [vmem:[%s457_s25 + $0x70] sm:$0xff] %vm284_vm0, %v266_v55  ;;  %v268_v5 = vadd.f32 %v443_v1, %v229_v56  ;;  %v204_v16 = vld [vmem:[%s438_s20 + $0xf0] sm:$0xff]  ;;  %v205_v21 = vld [vmem:[%s438_s20 + $0xf8] sm:$0xff] }
  0x1d   : > { %v269_v6 = vadd.f32 %v443_v1, %v230_v57  ;;  %v270_v7 = vadd.f32 %v443_v1, %v231_v58  ;;  %v235_v8 = vmul.f32 %v433_v0, %v196_v54  ;;  %300 = vst.msk [vmem:[%s457_s25 + $0x78] sm:$0xff] %vm284_vm0, %v267_v60  ;;  %v271_v12 = vadd.f32 %v443_v1, %v232_v61 }
  0x1e   : > { %v272_v13 = vadd.f32 %v443_v1, %v233_v62  ;;  %v273_v14 = vadd.f32 %v443_v1, %v234_v63  ;;  %v236_v15 = vmul.f32 %v433_v0, %v197_v59  ;;  %301 = vst.msk [vmem:[%s457_s25 + $0x80] sm:$0xff] %vm284_vm0, %v268_v5  ;;  %v237_v18 = vmul.f32 %v433_v0, %v198_v2 }
  0x1f   : > { %302 = vst.msk [vmem:[%s457_s25 + $0x88] sm:$0xff] %vm284_vm0, %v269_v6  ;;  %303 = vst.msk [vmem:[%s457_s25 + $0x90] sm:$0xff] %vm284_vm0, %v270_v7  ;;  %v274_v17 = vadd.f32 %v443_v1, %v235_v8  ;;  %v238_v19 = vmul.f32 %v433_v0, %v199_v3  ;;  %v239_v20 = vmul.f32 %v433_v0, %v200_v4 }
  0x20   : > { %304 = vst.msk [vmem:[%s457_s25 + $0x98] sm:$0xff] %vm284_vm0, %v271_v12  ;;  %305 = vst.msk [vmem:[%s457_s25 + $0xa0] sm:$0xff] %vm284_vm0, %v272_v13  ;;  %v275_v22 = vadd.f32 %v443_v1, %v236_v15  ;;  %v240_v23 = vmul.f32 %v433_v0, %v201_v9  ;;  %v241_v24 = vmul.f32 %v433_v0, %v202_v10 }
  0x21   : > { %306 = vst.msk [vmem:[%s457_s25 + $0xa8] sm:$0xff] %vm284_vm0, %v273_v14  ;;  %v242_v25 = vmul.f32 %v433_v0, %v203_v11  ;;  %307 = vst.msk [vmem:[%s457_s25 + $0xb0] sm:$0xff] %vm284_vm0, %v274_v17  ;;  %v276_v26 = vadd.f32 %v443_v1, %v237_v18  ;;  %v277_v27 = vadd.f32 %v443_v1, %v238_v19 }
  0x22   : > { %v278_v28 = vadd.f32 %v443_v1, %v239_v20  ;;  %v243_v29 = vmul.f32 %v433_v0, %v204_v16  ;;  %308 = vst.msk [vmem:[%s457_s25 + $0xb8] sm:$0xff] %vm284_vm0, %v275_v22  ;;  %v279_v30 = vadd.f32 %v443_v1, %v240_v23  ;;  %v280_v31 = vadd.f32 %v443_v1, %v241_v24 }
  0x23   : > { %v281_v32 = vadd.f32 %v443_v1, %v242_v25  ;;  %v244_v33 = vmul.f32 %v433_v0, %v205_v21  ;;  %309 = vst.msk [vmem:[%s457_s25 + $0xc0] sm:$0xff] %vm284_vm0, %v276_v26  ;;  %310 = vst.msk [vmem:[%s457_s25 + $0xc8] sm:$0xff] %vm284_vm0, %v277_v27 }
  0x24   : > { %311 = vst.msk [vmem:[%s457_s25 + $0xd0] sm:$0xff] %vm284_vm0, %v278_v28  ;;  %v282_v34 = vadd.f32 %v443_v1, %v243_v29  ;;  %312 = vst.msk [vmem:[%s457_s25 + $0xd8] sm:$0xff] %vm284_vm0, %v279_v30 }
  0x25   : > { %313 = vst.msk [vmem:[%s457_s25 + $0xe0] sm:$0xff] %vm284_vm0, %v280_v31  ;;  %314 = vst.msk [vmem:[%s457_s25 + $0xe8] sm:$0xff] %vm284_vm0, %v281_v32  ;;  %v283_v35 = vadd.f32 %v443_v1, %v244_v33 }
  0x26   : > { %315 = vst.msk [vmem:[%s457_s25 + $0xf0] sm:$0xff] %vm284_vm0, %v282_v34 }
  0x27   : > { %316 = vst.msk [vmem:[%s457_s25 + $0xf8] sm:$0xff] %vm284_vm0, %v283_v35 }
  0x28 PF: > { %s13_s12 = sadd.s32 1, %s400_s12  }
  0x29   : > { %p10_p4 = scmp.ge.s32.totalorder %s13_s12, 4  }
  0x2b   :  { %12 = sbr.rel (!%p10_p4) target bundleno = 1 (0x1), region = 62 }

// kernel: conv_block.4
= control target key start
LH: loop header
LB: loop body
LE: loop exit
PB: predicated region body
PF: predicated region fallthrough
CT: control target
= control target key end

     0   :  { %s3053_s15 = smov 0   ;;  %s4241_s0 = inlined_call_operand.vmem [shape: f32[2,18,18,4], index: 0, kind: input, shape index: {}]   ;;  %s4242_s1 = inlined_call_operand.vmem [shape: f32[36,8], index: 1, kind: input, shape index: {}]   ;;  %s4243_s2 = inlined_call_operand.vmem [shape: f32[1,8], index: 2, kind: input, shape index: {}]   ;;  %s4244_s3 = inlined_call_operand.vmem [shape: f32[512,8], index: 3, kind: output, shape index: {0}]   ;;  %s4245_s4 = inlined_call_operand.vmem [shape: f32[2,2,8], index: 4, kind: output, shape index: {1}]  }
   0x1 LB: > { %s3059_s16 = sadd.s32 4294967295, %s3017_s15   ;;  %p2522_p0 = scmp.ge.s32.totalorder %s3017_s15, 1  ;;  %s3017_s15 = sphi %s3053_s15, %s15_s15  }
   0x2   : > { %p165_p1 = scmp.lt.s32.totalorder %s3017_s15, 3 }
   0x4   : > { %p166_p2 = pnand %p2522_p0, %p165_p1 }
   0x5   : > { %p195_p3 = scmp.lt.s32.totalorder (!%p166_p2), %s3059_s16, 1  ;;  %s3019_s22 = smov (!%p166_p2), 8   ;;  %vm242_vm0 = vcmask (!%p166_p2), 31744   ;;  %v1853_v22 = vld [vmem:[%s4242_s1] sm:$0xff] (!%p166_p2)  ;;  %v1854_v23 = vld [vmem:[%s4242_s1 + $0x8] sm:$0xff] (!%p166_p2)  ;;  %v1855_v26 = vld [vmem:[%s4242_s1 + $0x10] sm:$0xff] (!%p166_p2) }
   0x6   : > { %169 = sbr.rel (%p166_p2) target bundleno = 1123 (0x463), region = 32  ;;  %s3020_s23 = smov (!%p166_p2), 4   ;;  %v2920_v25 = vpack.c.bf16 (!%p166_p2), %v1854_v23, %v1853_v22  ;;  %v1856_v27 = vld [vmem:[%s4242_s1 + $0x18] sm:$0xff] (!%p166_p2)  ;;  %v1857_v31 = vld [vmem:[%s4242_s1 + $0x20] sm:$0xf] (!%p166_p2)  ;;  %vm1962_vm1 = vcmask (!%p166_p2), 1043456  }
   0x7   : > { %s3021_s24 = smov (!%p166_p2), 12   ;;  %s3022_s25 = smov (!%p166_p2), 16   ;;  %v2924_v28 = vpack.c.bf16 (!%p166_p2), %v1856_v27, %v1855_v26  ;;  %vm435_vm2 = vcmask (!%p166_p2), 64544   ;;  %vm628_vm3 = vcmask (!%p166_p2), 97344   ;;  %vm822_vm4 = vcmask (!%p166_p2), 130144  }
   0x8   : > { %s3023_s26 = smov (!%p166_p2), 20   ;;  %s3024_s27 = smov (!%p166_p2), 24   ;;  %2921 = vmatprep.subr.bf16.mxu0 (!%p166_p2), %v2920_v25  ;;  %vm1015_vm5 = vcmask (!%p166_p2), 162944   ;;  %vm1208_vm6 = vcmask (!%p166_p2), 195744   ;;  %vm1402_vm7 = vcmask (!%p166_p2), 228544   ;;  %vm1595_vm8 = vcmask (!%p166_p2), 261344  }
   0x9   : > { %s3025_s6 = smov (!%p166_p2), 28   ;;  %2923 = vmatpush3.bf16.msra.mxu0 (!%p166_p2), %v2920_v25  ;;  %s3026_s11 = smov (!%p166_p2), 32   ;;  %vm1788_vm9 = vcmask (!%p166_p2), 294144   ;;  %vm1865_vm10 = vcmask (!%p166_p2), 293888   ;;  %vm2223_vm11 = vcmask (!%p166_p2), 64512   ;;  %vm2326_vm12 = vcmask (!%p166_p2), 57344  }
   0xa   : > { %2925 = vmatprep.subr.bf16.mxu0 (!%p166_p2), %v2924_v28  ;;  %s2524_s14 = sshll.u32 (!%p166_p2), %s3059_s16, 5 }
   0xb   : > { %p201_p4 = scmp.lt.s32.totalorder (!%p166_p2), %s2524_s14, 63 }
   0xd   : > { %s3065_s17 = scalar_select %p195_p3, %s3059_s16, 1  ;;  %2927 = vmatpush3.bf16.msra.mxu0 %v2924_v28 }
   0xe   : > { %2870 = vmatprep.subr.msk.mxu0 %vm1962_vm1, %v1857_v31  ;;  %s4247_s14 = smov (!%p201_p4, %s2524_s14), 63 }
   0xf   : > { %s2992_s18 = smul.u32 432, %s3065_s17  ;;  %s2525_s19 = sshll.u32 %s4247_s14, 3 }
  0x10   : > { %s3680_s29 = scalar_lea.vmem %s4244_s3, %s2525_s19 }
  0x11   : > { %s3071_s21 = scalar_lea.vmem %s4241_s0, %s2992_s18  ;;  %2871 = vmatpush3.msk.msra.mxu0 %vm1962_vm1, %v1857_v31 }
  0x12   : > { %v468_v0 = vld [vmem:[%s3071_s21 + $0x2] sm:$0xff]  ;;  %v469_v3 = vld [vmem:[%s3071_s21 + $0xa] sm:$0xff]  ;;  %v2527_v5 = vld [vmem:[%s3071_s21 + $0x18] sm:$0xff] }
  0x13   : > { %v275_v1 = vld [vmem:[%s3071_s21 + $0x1] sm:$0xff]  ;;  %532 = vrot.lane.b32.xlu1 %v468_v0, %s3019_s22  ;;  %v276_v4 = vld [vmem:[%s3071_s21 + $0x9] sm:$0xff]  ;;  %245 = vst.msk [vmem:[#allocation2 + $0x10] sm:$0xff] %vm242_vm0, %v2527_v5  ;;  %v2624_v7 = vld [vmem:[%s3071_s21 + $0x38] sm:$0xff] }
  0x14   : > { %339 = vrot.lane.b32.xlu0 %v275_v1, %s3020_s23  ;;  %v2528_v2 = vld [vmem:[%s3071_s21 + $0x20] sm:$0xff]  ;;  %v2623_v6 = vld [vmem:[%s3071_s21 + $0x30] sm:$0xff]  ;;  %248 = vst.msk [vmem:[#allocation2 + $0x28] sm:$0xff] %vm242_vm0, %v2624_v7  ;;  %v3090_v8 = vld [vmem:[%s3071_s21 + $0x48] sm:$0xff] }
  0x15   : > { %246 = vst.msk [vmem:[#allocation2 + $0x18] sm:$0xff] %vm242_vm0, %v2528_v2  ;;  %247 = vst.msk [vmem:[#allocation2 + $0x20] sm:$0xff] %vm242_vm0, %v2623_v6  ;;  %v3093_v9 = vld [vmem:[%s3071_s21 + $0x50] sm:$0xff]  ;;  %v3100_v10 = vld [vmem:[%s3071_s21 + $0x60] sm:$0xff] }
  0x16   : > { %249 = vst.msk [vmem:[#allocation2 + $0x30] sm:$0xff] %vm242_vm0, %v3090_v8  ;;  %250 = vst.msk [vmem:[#allocation2 + $0x38] sm:$0xff] %vm242_vm0, %v3093_v9  ;;  %v3103_v11 = vld [vmem:[%s3071_s21 + $0x68] sm:$0xff]  ;;  %v277_v12 = vld [vmem:[%s3071_s21 + $0x19] sm:$0xff] }
  0x17   : > { %534 = vrot.lane.b32.xlu1 %v469_v3, %s3019_s22  ;;  %251 = vst.msk [vmem:[#allocation2 + $0x40] sm:$0xff] %vm242_vm0, %v3100_v10  ;;  %252 = vst.msk [vmem:[#allocation2 + $0x48] sm:$0xff] %vm242_vm0, %v3103_v11  ;;  %v210_v13 = vld [vmem:[%s3071_s21] sm:$0xff]  ;;  %v211_v14 = vld [vmem:[%s3071_s21 + $0x8] sm:$0xff] }
  0x18   : > { %341 = vrot.lane.b32.xlu0 %v276_v4, %s3020_s23  ;;  %243 = vst.msk [vmem:[#allocation2] sm:$0xff] %vm242_vm0, %v210_v13  ;;  %244 = vst.msk [vmem:[#allocation2 + $0x8] sm:$0xff] %vm242_vm0, %v211_v14  ;;  %v3117_v15 = vld [vmem:[%s3071_s21 + $0x78] sm:$0xff]  ;;  %v3120_v16 = vld [vmem:[%s3071_s21 + $0x80] sm:$0xff] }
  0x19   : > { %253 = vst.msk [vmem:[#allocation2 + $0x50] sm:$0xff] %vm242_vm0, %v3117_v15  ;;  %254 = vst.msk [vmem:[#allocation2 + $0x58] sm:$0xff] %vm242_vm0, %v3120_v16  ;;  %v2591_v17 = vld [vmem:[%s3071_s21 + $0x1a] sm:$0xff]  ;;  %v2592_v19 = vld [vmem:[%s3071_s21 + $0x22] sm:$0xff] }
  0x1a   : > { %v2560_v18 = vld [vmem:[%s3071_s21 + $0x21] sm:$0xff]  ;;  %v3136_v20 = vld [vmem:[%s3071_s21 + $0x90] sm:$0xff]  ;;  %v3152_v24 = vld [vmem:[%s3071_s21 + $0x98] sm:$0xff] }
  0x1b   : > { %728 = vrot.lane.b32.xlu1 %v2528_v2, %s3021_s24  ;;  %255 = vst.msk [vmem:[#allocation2 + $0x60] sm:$0xff] %vm242_vm0, %v3136_v20  ;;  %v2655_v21 = vld [vmem:[%s3071_s21 + $0x31] sm:$0xff]  ;;  %256 = vst.msk [vmem:[#allocation2 + $0x68] sm:$0xff] %vm242_vm0, %v3152_v24  ;;  %v2656_v30 = vld [vmem:[%s3071_s21 + $0x39] sm:$0xff] }
  0x1c   : > { %726 = vrot.lane.b32.xlu0 %v2527_v5, %s3021_s24  ;;  %v2687_v29 = vld [vmem:[%s3071_s21 + $0x32] sm:$0xff]  ;;  %v2688_v32 = vld [vmem:[%s3071_s21 + $0x3a] sm:$0xff]  ;;  %v3181_v33 = vld [vmem:[%s3071_s21 + $0xa8] sm:$0xff] }
  0x1d   : > { %257 = vst.msk [vmem:[#allocation2 + $0x70] sm:$0xff] %vm242_vm0, %v3181_v33  ;;  %v2657_v34 = vld [vmem:[%s3071_s21 + $0x49] sm:$0xff]  ;;  %v2658_v37 = vld [vmem:[%s3071_s21 + $0x51] sm:$0xff]  ;;  %v3215_v39 = vld [vmem:[%s3071_s21 + $0xc0] sm:$0xff] }
  0x1e   : > { %v3193_v35 = vld [vmem:[%s3071_s21 + $0xb0] sm:$0xff]  ;;  %259 = vst.msk [vmem:[#allocation2 + $0x80] sm:$0xff] %vm242_vm0, %v3215_v39  ;;  %v2659_v40 = vld [vmem:[%s3071_s21 + $0x61] sm:$0xff]  ;;  %v3252_v49 = vld [vmem:[%s3071_s21 + $0xd8] sm:$0xff] }
  0x1f   : > { %343 = vrot.lane.b32.xlu1 %v277_v12, %s3020_s23  ;;  %258 = vst.msk [vmem:[#allocation2 + $0x78] sm:$0xff] %vm242_vm0, %v3193_v35  ;;  %v2689_v36 = vld [vmem:[%s3071_s21 + $0x4a] sm:$0xff]  ;;  %v2690_v38 = vld [vmem:[%s3071_s21 + $0x52] sm:$0xff]  ;;  %v2691_v42 = vld [vmem:[%s3071_s21 + $0x62] sm:$0xff] }
  0x20   : > { %919 = vrot.lane.b32.xlu0 %v277_v12, %s3022_s25  ;;  %v3227_v41 = vld [vmem:[%s3071_s21 + $0xc8] sm:$0xff]  ;;  %261 = vst.msk [vmem:[#allocation2 + $0x90] sm:$0xff] %vm242_vm0, %v3252_v49  ;;  %v2661_v52 = vld [vmem:[%s3071_s21 + $0x79] sm:$0xff] }
  0x21   : > { %260 = vst.msk [vmem:[#allocation2 + $0x88] sm:$0xff] %vm242_vm0, %v3227_v41  ;;  %v2660_v43 = vld [vmem:[%s3071_s21 + $0x69] sm:$0xff]  ;;  %v3269_v55 = vld [vmem:[%s3071_s21 + $0xe0] sm:$0xff]  ;;  %v3319_v13 = vld [vmem:[%s3071_s21 + $0xf8] sm:$0xff] }
  0x22   : > { %v2692_v44 = vld [vmem:[%s3071_s21 + $0x6a] sm:$0xff]  ;;  %262 = vst.msk [vmem:[#allocation2 + $0x98] sm:$0xff] %vm242_vm0, %v3269_v55  ;;  %v2693_v58 = vld [vmem:[%s3071_s21 + $0x7a] sm:$0xff]  ;;  %v2694_v0 = vld [vmem:[%s3071_s21 + $0x82] sm:$0xff] }
  0x23   : > { %1112 = vrot.lane.b32.xlu1 %v2591_v17, %s3023_s26  ;;  %v2662_v59 = vld [vmem:[%s3071_s21 + $0x81] sm:$0xff]  ;;  %264 = vst.msk [vmem:[#allocation2 + $0xa8] sm:$0xff] %vm242_vm0, %v3319_v13 }
  0x24   : > { %921 = vrot.lane.b32.xlu0 %v2560_v18, %s3022_s25  ;;  %v3355_v31 = vld [vmem:[%s3071_s21 + $0x108] sm:$0xff] }
  0x25   : > { %265 = vst.msk [vmem:[#allocation2 + $0xb0] sm:$0xff] %vm242_vm0, %v3355_v31 }
  0x27   : > { %536 = vrot.lane.b32.xlu1 %v2591_v17, %s3019_s22  ;;  %v2695_v17 = vld [vmem:[%s3071_s21 + $0x92] sm:$0xff] }
  0x28   : > { %345 = vrot.lane.b32.xlu0 %v2560_v18, %s3020_s23  ;;  %v2664_v18 = vld [vmem:[%s3071_s21 + $0x99] sm:$0xff] }
  0x2b   : > { %1306 = vrot.lane.b32.xlu1 %v2623_v6, %s3024_s27 }
  0x2c   : > { %1114 = vrot.lane.b32.xlu0 %v2592_v19, %s3023_s26 }
  0x2f   : > { %730 = vrot.lane.b32.xlu1 %v2623_v6, %s3021_s24 }
  0x30   : > { %538 = vrot.lane.b32.xlu0 %v2592_v19, %s3019_s22 }
  0x33   : > { %1499 = vrot.lane.b32.xlu1 %v2655_v21, %s3025_s6 }
  0x34   : > { %1308 = vrot.lane.b32.xlu0 %v2624_v7, %s3024_s27 }
  0x37   : > { %923 = vrot.lane.b32.xlu1 %v2655_v21, %s3022_s25 }
  0x38   : > { %732 = vrot.lane.b32.xlu0 %v2624_v7, %s3021_s24  ;;  %v3303_v7 = vld [vmem:[%s3071_s21 + $0xf0] sm:$0xff] }
  0x39   : > { %263 = vst.msk [vmem:[#allocation2 + $0xa0] sm:$0xff] %vm242_vm0, %v3303_v7 }
  0x3b   : > { %1692 = vrot.lane.b32.xlu1 %v2687_v29, %s3026_s11 }
  0x3c   : > { %1501 = vrot.lane.b32.xlu0 %v2656_v30, %s3025_s6 }
  0x3f   : > { %925 = vrot.lane.b32.xlu1 %v2656_v30, %s3022_s25 }
  0x40   : > { %347 = vrot.lane.b32.xlu0 %v2655_v21, %s3020_s23 }
  0x43   : > { %1694 = vrot.lane.b32.xlu1 %v2688_v32, %s3026_s11 }
  0x44   : > { %1116 = vrot.lane.b32.xlu0 %v2687_v29, %s3023_s26 }
  0x47   : > { %540 = vrot.lane.b32.xlu1 %v2687_v29, %s3019_s22 }
  0x48   : > { %349 = vrot.lane.b32.xlu0 %v2656_v30, %s3020_s23 }
  0x4b   : > { %1310 = vrot.lane.b32.xlu1 %v3090_v8, %s3024_s27 }
  0x4c   : > { %1118 = vrot.lane.b32.xlu0 %v2688_v32, %s3023_s26 }
  0x4f   : > { %734 = vrot.lane.b32.xlu1 %v3090_v8, %s3021_s24 }
  0x50   : > { %542 = vrot.lane.b32.xlu0 %v2688_v32, %s3019_s22 }
  0x53   : > { %1503 = vrot.lane.b32.xlu1 %v2657_v34, %s3025_s6 }
  0x54   : > { %1312 = vrot.lane.b32.xlu0 %v3093_v9, %s3024_s27 }
  0x57   : > { %927 = vrot.lane.b32.xlu1 %v2657_v34, %s3022_s25 }
  0x58   : > { %736 = vrot.lane.b32.xlu0 %v3093_v9, %s3021_s24 }
  0x5b   : > { %1696 = vrot.lane.b32.xlu1 %v2689_v36, %s3026_s11 }
  0x5c   : > { %1505 = vrot.lane.b32.xlu0 %v2658_v37, %s3025_s6 }
  0x5f   : > { %929 = vrot.lane.b32.xlu1 %v2658_v37, %s3022_s25 }
  0x60   : > { %351 = vrot.lane.b32.xlu0 %v2657_v34, %s3020_s23 }
  0x63   : > { %1698 = vrot.lane.b32.xlu1 %v2690_v38, %s3026_s11 }
  0x64   : > { %1120 = vrot.lane.b32.xlu0 %v2689_v36, %s3023_s26 }
  0x67   : > { %544 = vrot.lane.b32.xlu1 %v2689_v36, %s3019_s22  ;;  %v2665_v36 = vld [vmem:[%s3071_s21 + $0xa9] sm:$0xff] }
  0x68   : > { %353 = vrot.lane.b32.xlu0 %v2658_v37, %s3020_s23 }
  0x6b   : > { %1314 = vrot.lane.b32.xlu1 %v3100_v10, %s3024_s27 }
  0x6c   : > { %1122 = vrot.lane.b32.xlu0 %v2690_v38, %s3023_s26 }
  0x6f   : > { %738 = vrot.lane.b32.xlu1 %v3100_v10, %s3021_s24  ;;  %v2663_v10 = vld [vmem:[%s3071_s21 + $0x91] sm:$0xff] }
  0x70   : > { %546 = vrot.lane.b32.xlu0 %v2690_v38, %s3019_s22 }
  0x73   : > { %1507 = vrot.lane.b32.xlu1 %v2659_v40, %s3025_s6 }
  0x74   : > { %1316 = vrot.lane.b32.xlu0 %v3103_v11, %s3024_s27 }
  0x77   : > { %931 = vrot.lane.b32.xlu1 %v2659_v40, %s3022_s25 }
  0x78   : > { %740 = vrot.lane.b32.xlu0 %v3103_v11, %s3021_s24 }
  0x7b   : > { %1700 = vrot.lane.b32.xlu1 %v2691_v42, %s3026_s11 }
  0x7c   : > { %1509 = vrot.lane.b32.xlu0 %v2660_v43, %s3025_s6 }
  0x7f   : > { %933 = vrot.lane.b32.xlu1 %v2660_v43, %s3022_s25 }
  0x80   : > { %355 = vrot.lane.b32.xlu0 %v2659_v40, %s3020_s23  ;;  %v3371_v40 = vld [vmem:[%s3071_s21 + $0x110] sm:$0xff] }
  0x81   : > { %266 = vst.msk [vmem:[#allocation2 + $0xb8] sm:$0xff] %vm242_vm0, %v3371_v40 }
  0x83   : > { %1702 = vrot.lane.b32.xlu1 %v2692_v44, %s3026_s11 }
  0x84   : > { %1124 = vrot.lane.b32.xlu0 %v2691_v42, %s3023_s26 }
  0x85   : > { %v533_v45 = vpop.permute.xlu1 %532 }
  0x86   : > { %v340_v46 = vpop.permute.xlu0 %339 }
  0x87   : > { %436 = vst.msk [vmem:[#allocation2] sm:$0xff] %vm435_vm2, %v340_v46  ;;  %548 = vrot.lane.b32.xlu1 %v2691_v42, %s3019_s22 }
  0x88   : > { %357 = vrot.lane.b32.xlu0 %v2660_v43, %s3020_s23  ;;  %629 = vst.msk [vmem:[#allocation2] sm:$0xff] %vm628_vm3, %v533_v45  ;;  %v2666_v45 = vld [vmem:[%s3071_s21 + $0xb1] sm:$0xff] }
  0x89   : > { %v535_v47 = vpop.permute.xlu1 %534 }
  0x8a   : > { %v342_v48 = vpop.permute.xlu0 %341 }
  0x8b   : > { %437 = vst.msk [vmem:[#allocation2 + $0x8] sm:$0xff] %vm435_vm2, %v342_v48  ;;  %1318 = vrot.lane.b32.xlu1 %v3117_v15, %s3024_s27 }
  0x8c   : > { %1126 = vrot.lane.b32.xlu0 %v2692_v44, %s3023_s26  ;;  %630 = vst.msk [vmem:[#allocation2 + $0x8] sm:$0xff] %vm628_vm3, %v535_v47 }
  0x8d   : > { %v729_v50 = vpop.permute.xlu1 %728 }
  0x8e   : > { %v727_v51 = vpop.permute.xlu0 %726  ;;  %824 = vst.msk [vmem:[#allocation2 + $0x8] sm:$0xff] %vm822_vm4, %v729_v50 }
  0x8f   : > { %823 = vst.msk [vmem:[#allocation2] sm:$0xff] %vm822_vm4, %v727_v51  ;;  %742 = vrot.lane.b32.xlu1 %v3117_v15, %s3021_s24 }
  0x90   : > { %550 = vrot.lane.b32.xlu0 %v2692_v44, %s3019_s22  ;;  %v2697_v44 = vld [vmem:[%s3071_s21 + $0xaa] sm:$0xff] }
  0x91   : > { %v344_v53 = vpop.permute.xlu1 %343 }
  0x92   : > { %v920_v54 = vpop.permute.xlu0 %919  ;;  %438 = vst.msk [vmem:[#allocation2 + $0x10] sm:$0xff] %vm435_vm2, %v344_v53 }
  0x93   : > { %1016 = vst.msk [vmem:[#allocation2] sm:$0xff] %vm1015_vm5, %v920_v54  ;;  %1511 = vrot.lane.b32.xlu1 %v2661_v52, %s3025_s6 }
  0x94   : > { %1320 = vrot.lane.b32.xlu0 %v3120_v16, %s3024_s27 }
  0x95   : > { %v1113_v56 = vpop.permute.xlu1 %1112 }
  0x96   : > { %v922_v57 = vpop.permute.xlu0 %921  ;;  %1209 = vst.msk [vmem:[#allocation2] sm:$0xff] %vm1208_vm6, %v1113_v56 }
  0x97   : > { %1017 = vst.msk [vmem:[#allocation2 + $0x8] sm:$0xff] %vm1015_vm5, %v922_v57  ;;  %935 = vrot.lane.b32.xlu1 %v2661_v52, %s3022_s25 }
  0x98   : > { %744 = vrot.lane.b32.xlu0 %v3120_v16, %s3021_s24 }
  0x99   : > { %v537_v60 = vpop.permute.xlu1 %536 }
  0x9a   : > { %v346_v61 = vpop.permute.xlu0 %345  ;;  %631 = vst.msk [vmem:[#allocation2 + $0x10] sm:$0xff] %vm628_vm3, %v537_v60 }
  0x9b   : > { %439 = vst.msk [vmem:[#allocation2 + $0x18] sm:$0xff] %vm435_vm2, %v346_v61  ;;  %1704 = vrot.lane.b32.xlu1 %v2693_v58, %s3026_s11 }
  0x9c   : > { %1513 = vrot.lane.b32.xlu0 %v2662_v59, %s3025_s6 }
  0x9d   : > { %v1307_v62 = vpop.permute.xlu1 %1306 }
  0x9e   : > { %v1115_v63 = vpop.permute.xlu0 %1114  ;;  %1403 = vst.msk [vmem:[#allocation2] sm:$0xff] %vm1402_vm7, %v1307_v62  ;;  %v2667_v62 = vld [vmem:[%s3071_s21 + $0xc1] sm:$0xff] }
  0x9f   : > { %1210 = vst.msk [vmem:[#allocation2 + $0x8] sm:$0xff] %vm1208_vm6, %v1115_v63  ;;  %937 = vrot.lane.b32.xlu1 %v2662_v59, %s3022_s25 }
  0xa0   : > { %359 = vrot.lane.b32.xlu0 %v2661_v52, %s3020_s23 }
  0xa1   : > { %v731_v1 = vpop.permute.xlu1 %730 }
  0xa2   : > { %v539_v2 = vpop.permute.xlu0 %538  ;;  %825 = vst.msk [vmem:[#allocation2 + $0x10] sm:$0xff] %vm822_vm4, %v731_v1  ;;  %v3423_v1 = vld [vmem:[%s3071_s21 + $0x128] sm:$0xff] }
  0xa3   : > { %632 = vst.msk [vmem:[#allocation2 + $0x18] sm:$0xff] %vm628_vm3, %v539_v2  ;;  %1706 = vrot.lane.b32.xlu1 %v2694_v0, %s3026_s11 }
  0xa4   : > { %1128 = vrot.lane.b32.xlu0 %v2693_v58, %s3023_s26  ;;  %268 = vst.msk [vmem:[#allocation2 + $0xc8] sm:$0xff] %vm242_vm0, %v3423_v1 }
  0xa5   : > { %v1500_v3 = vpop.permute.xlu1 %1499 }
  0xa6   : > { %v1309_v4 = vpop.permute.xlu0 %1308  ;;  %1596 = vst.msk [vmem:[#allocation2] sm:$0xff] %vm1595_vm8, %v1500_v3 }
  0xa7   : > { %1404 = vst.msk [vmem:[#allocation2 + $0x8] sm:$0xff] %vm1402_vm7, %v1309_v4  ;;  %552 = vrot.lane.b32.xlu1 %v2693_v58, %s3019_s22  ;;  %v2699_v4 = vld [vmem:[%s3071_s21 + $0xc2] sm:$0xff] }
  0xa8   : > { %361 = vrot.lane.b32.xlu0 %v2662_v59, %s3020_s23  ;;  %v3407_v59 = vld [vmem:[%s3071_s21 + $0x120] sm:$0xff] }
  0xa9   : > { %v924_v5 = vpop.permute.xlu1 %923  ;;  %267 = vst.msk [vmem:[#allocation2 + $0xc0] sm:$0xff] %vm242_vm0, %v3407_v59 }
  0xaa   : > { %v733_v6 = vpop.permute.xlu0 %732  ;;  %1018 = vst.msk [vmem:[#allocation2 + $0x10] sm:$0xff] %vm1015_vm5, %v924_v5  ;;  %v2668_v5 = vld [vmem:[%s3071_s21 + $0xc9] sm:$0xff] }
  0xab   : > { %826 = vst.msk [vmem:[#allocation2 + $0x18] sm:$0xff] %vm822_vm4, %v733_v6  ;;  %1322 = vrot.lane.b32.xlu1 %v3136_v20, %s3024_s27 }
  0xac   : > { %1130 = vrot.lane.b32.xlu0 %v2694_v0, %s3023_s26 }
  0xad   : > { %v1693_v8 = vpop.permute.xlu1 %1692 }
  0xae   : > { %v1502_v9 = vpop.permute.xlu0 %1501  ;;  %1789 = vst.msk [vmem:[#allocation2] sm:$0xff] %vm1788_vm9, %v1693_v8 }
  0xaf   : > { %1597 = vst.msk [vmem:[#allocation2 + $0x8] sm:$0xff] %vm1595_vm8, %v1502_v9  ;;  %746 = vrot.lane.b32.xlu1 %v3136_v20, %s3021_s24 }
  0xb0   : > { %554 = vrot.lane.b32.xlu0 %v2694_v0, %s3019_s22 }
  0xb1   : > { %v926_v11 = vpop.permute.xlu1 %925 }
  0xb2   : > { %v348_v12 = vpop.permute.xlu0 %347  ;;  %1019 = vst.msk [vmem:[#allocation2 + $0x18] sm:$0xff] %vm1015_vm5, %v926_v11 }
  0xb3   : > { %440 = vst.msk [vmem:[#allocation2 + $0x20] sm:$0xff] %vm435_vm2, %v348_v12  ;;  %1515 = vrot.lane.b32.xlu1 %v2663_v10, %s3025_s6 }
  0xb4   : > { %1324 = vrot.lane.b32.xlu0 %v3152_v24, %s3024_s27 }
  0xb5   : > { %v1695_v14 = vpop.permute.xlu1 %1694  ;;  %v1821_v16 = vld [vmem:[#allocation2] sm:$0xff] }
  0xb6   : > { %v1117_v15 = vpop.permute.xlu0 %1116  ;;  %1790 = vst.msk [vmem:[#allocation2 + $0x8] sm:$0xff] %vm1788_vm9, %v1695_v14  ;;  %2872 = vmatprep.mubr.msk.f32.mxu0 %vm1865_vm10, %v1821_v16 }
  0xb7   : > { %1211 = vst.msk [vmem:[#allocation2 + $0x10] sm:$0xff] %vm1208_vm6, %v1117_v15  ;;  %939 = vrot.lane.b32.xlu1 %v2663_v10, %s3022_s25 }
  0xb8   : > { %748 = vrot.lane.b32.xlu0 %v3152_v24, %s3021_s24  ;;  %v2696_v24 = vld [vmem:[%s3071_s21 + $0x9a] sm:$0xff] }
  0xb9   : > { %v541_v19 = vpop.permute.xlu1 %540 }
  0xba   : > { %v350_v20 = vpop.permute.xlu0 %349  ;;  %633 = vst.msk [vmem:[#allocation2 + $0x20] sm:$0xff] %vm628_vm3, %v541_v19  ;;  %v3459_v19 = vld [vmem:[%s3071_s21 + $0x138] sm:$0xff] }
  0xbb   : > { %441 = vst.msk [vmem:[#allocation2 + $0x28] sm:$0xff] %vm435_vm2, %v350_v20  ;;  %1708 = vrot.lane.b32.xlu1 %v2695_v17, %s3026_s11 }
  0xbc   : > { %1517 = vrot.lane.b32.xlu0 %v2664_v18, %s3025_s6  ;;  %269 = vst.msk [vmem:[#allocation2 + $0xd0] sm:$0xff] %vm242_vm0, %v3459_v19 }
  0xbd   : > { %v1311_v21 = vpop.permute.xlu1 %1310  ;;  %v1822_v23 = vld [vmem:[#allocation2 + $0x8] sm:$0xff] }
  0xbe   : > { %v1119_v22 = vpop.permute.xlu0 %1118  ;;  %1405 = vst.msk [vmem:[#allocation2 + $0x10] sm:$0xff] %vm1402_vm7, %v1311_v21  ;;  %2873 = vmatmul.mubr.msk.f32.vlgmr.msra.gmra.mrb[0].mxu0 %vm1865_vm10, %v1822_v23 }
  0xbf   : > { %1212 = vst.msk [vmem:[#allocation2 + $0x18] sm:$0xff] %vm1208_vm6, %v1119_v22  ;;  %941 = vrot.lane.b32.xlu1 %v2664_v18, %s3022_s25  ;;  %v2669_v22 = vld [vmem:[%s3071_s21 + $0xd9] sm:$0xff] }
  0xc0   : > { %363 = vrot.lane.b32.xlu0 %v2663_v10, %s3020_s23 }
  0xc1   : > { %v735_v25 = vpop.permute.xlu1 %734 }
  0xc2   : > { %v543_v26 = vpop.permute.xlu0 %542  ;;  %827 = vst.msk [vmem:[#allocation2 + $0x20] sm:$0xff] %vm822_vm4, %v735_v25  ;;  %v3478_v25 = vld [vmem:[%s3071_s21 + $0x140] sm:$0xff] }
  0xc3   : > { %634 = vst.msk [vmem:[#allocation2 + $0x28] sm:$0xff] %vm628_vm3, %v543_v26  ;;  %1710 = vrot.lane.b32.xlu1 %v2696_v24, %s3026_s11 }
  0xc4   : > { %1132 = vrot.lane.b32.xlu0 %v2695_v17, %s3023_s26  ;;  %270 = vst.msk [vmem:[#allocation2 + $0xd8] sm:$0xff] %vm242_vm0, %v3478_v25 }
  0xc5   : > { %v1504_v27 = vpop.permute.xlu1 %1503 }
  0xc6   : > { %v1313_v28 = vpop.permute.xlu0 %1312  ;;  %1598 = vst.msk [vmem:[#allocation2 + $0x10] sm:$0xff] %vm1595_vm8, %v1504_v27 }
  0xc7   : > { %1406 = vst.msk [vmem:[#allocation2 + $0x18] sm:$0xff] %vm1402_vm7, %v1313_v28  ;;  %556 = vrot.lane.b32.xlu1 %v2695_v17, %s3019_s22  ;;  %v2701_v28 = vld [vmem:[%s3071_s21 + $0xda] sm:$0xff] }
  0xc8   : > { %365 = vrot.lane.b32.xlu0 %v2664_v18, %s3020_s23 }
  0xc9   : > { %v928_v29 = vpop.permute.xlu1 %927 }
  0xca   : > { %v737_v30 = vpop.permute.xlu0 %736  ;;  %1020 = vst.msk [vmem:[#allocation2 + $0x20] sm:$0xff] %vm1015_vm5, %v928_v29  ;;  %v2670_v29 = vld [vmem:[%s3071_s21 + $0xe1] sm:$0xff] }
  0xcb   : > { %828 = vst.msk [vmem:[#allocation2 + $0x28] sm:$0xff] %vm822_vm4, %v737_v30  ;;  %1326 = vrot.lane.b32.xlu1 %v3181_v33, %s3024_s27 }
  0xcc   : > { %1134 = vrot.lane.b32.xlu0 %v2696_v24, %s3023_s26 }
  0xcd   : > { %v1697_v32 = vpop.permute.xlu1 %1696 }
  0xce   : > { %v1506_v34 = vpop.permute.xlu0 %1505  ;;  %1791 = vst.msk [vmem:[#allocation2 + $0x10] sm:$0xff] %vm1788_vm9, %v1697_v32 }
  0xcf   : > { %1599 = vst.msk [vmem:[#allocation2 + $0x18] sm:$0xff] %vm1595_vm8, %v1506_v34  ;;  %750 = vrot.lane.b32.xlu1 %v3181_v33, %s3021_s24 }
  0xd0   : > { %558 = vrot.lane.b32.xlu0 %v2696_v24, %s3019_s22 }
  0xd1   : > { %v930_v37 = vpop.permute.xlu1 %929 }
  0xd2   : > { %v352_v38 = vpop.permute.xlu0 %351  ;;  %1021 = vst.msk [vmem:[#allocation2 + $0x28] sm:$0xff] %vm1015_vm5, %v930_v37 }
  0xd3   : > { %442 = vst.msk [vmem:[#allocation2 + $0x30] sm:$0xff] %vm435_vm2, %v352_v38  ;;  %1519 = vrot.lane.b32.xlu1 %v2665_v36, %s3025_s6 }
  0xd4   : > { %1328 = vrot.lane.b32.xlu0 %v3193_v35, %s3024_s27 }
  0xd5   : > { %v1699_v33 = vpop.permute.xlu1 %1698  ;;  %v1823_v43 = vld [vmem:[#allocation2 + $0x10] sm:$0xff] }
  0xd6   : > { %v1121_v42 = vpop.permute.xlu0 %1120  ;;  %1792 = vst.msk [vmem:[#allocation2 + $0x18] sm:$0xff] %vm1788_vm9, %v1699_v33  ;;  %2875 = vmatprep.mubr.msk.f32.mxu0 %vm1865_vm10, %v1823_v43 }
  0xd7   : > { %1213 = vst.msk [vmem:[#allocation2 + $0x20] sm:$0xff] %vm1208_vm6, %v1121_v42  ;;  %943 = vrot.lane.b32.xlu1 %v2665_v36, %s3022_s25 }
  0xd8   : > { %752 = vrot.lane.b32.xlu0 %v3193_v35, %s3021_s24  ;;  %v2698_v35 = vld [vmem:[%s3071_s21 + $0xb2] sm:$0xff] }
  0xd9   : > { %v545_v46 = vpop.permute.xlu1 %544 }
  0xda   : > { %v354_v47 = vpop.permute.xlu0 %353  ;;  %635 = vst.msk [vmem:[#allocation2 + $0x30] sm:$0xff] %vm628_vm3, %v545_v46  ;;  %v3511_v46 = vld [vmem:[%s3071_s21 + $0x150] sm:$0xff] }
  0xdb   : > { %443 = vst.msk [vmem:[#allocation2 + $0x38] sm:$0xff] %vm435_vm2, %v354_v47  ;;  %1712 = vrot.lane.b32.xlu1 %v2697_v44, %s3026_s11 }
  0xdc   : > { %1521 = vrot.lane.b32.xlu0 %v2666_v45, %s3025_s6  ;;  %271 = vst.msk [vmem:[#allocation2 + $0xe0] sm:$0xff] %vm242_vm0, %v3511_v46 }
  0xdd   : > { %v1315_v48 = vpop.permute.xlu1 %1314  ;;  %v1824_v51 = vld [vmem:[#allocation2 + $0x18] sm:$0xff] }
  0xde   : > { %v1123_v50 = vpop.permute.xlu0 %1122  ;;  %1407 = vst.msk [vmem:[#allocation2 + $0x20] sm:$0xff] %vm1402_vm7, %v1315_v48  ;;  %2876 = vmatmul.mubr.msk.f32.gmra.mrb[2].mxu0 %vm1865_vm10, %v1824_v51 }
  0xdf   : > { %1214 = vst.msk [vmem:[#allocation2 + $0x28] sm:$0xff] %vm1208_vm6, %v1123_v50  ;;  %945 = vrot.lane.b32.xlu1 %v2666_v45, %s3022_s25  ;;  %v2671_v50 = vld [vmem:[%s3071_s21 + $0xf1] sm:$0xff] }
  0xe0   : > { %367 = vrot.lane.b32.xlu0 %v2665_v36, %s3020_s23 }
  0xe1   : > { %v739_v52 = vpop.permute.xlu1 %738 }
  0xe2   : > { %v547_v53 = vpop.permute.xlu0 %546  ;;  %829 = vst.msk [vmem:[#allocation2 + $0x30] sm:$0xff] %vm822_vm4, %v739_v52  ;;  %v3530_v52 = vld [vmem:[%s3071_s21 + $0x158] sm:$0xff] }
  0xe3   : > { %636 = vst.msk [vmem:[#allocation2 + $0x38] sm:$0xff] %vm628_vm3, %v547_v53  ;;  %1714 = vrot.lane.b32.xlu1 %v2698_v35, %s3026_s11 }
  0xe4   : > { %1136 = vrot.lane.b32.xlu0 %v2697_v44, %s3023_s26  ;;  %272 = vst.msk [vmem:[#allocation2 + $0xe8] sm:$0xff] %vm242_vm0, %v3530_v52 }
  0xe5   : > { %v1508_v54 = vpop.permute.xlu1 %1507 }
  0xe6   : > { %v1317_v56 = vpop.permute.xlu0 %1316  ;;  %1600 = vst.msk [vmem:[#allocation2 + $0x20] sm:$0xff] %vm1595_vm8, %v1508_v54 }
  0xe7   : > { %1408 = vst.msk [vmem:[#allocation2 + $0x28] sm:$0xff] %vm1402_vm7, %v1317_v56  ;;  %560 = vrot.lane.b32.xlu1 %v2697_v44, %s3019_s22  ;;  %v2703_v56 = vld [vmem:[%s3071_s21 + $0xf2] sm:$0xff] }
  0xe8   : > { %369 = vrot.lane.b32.xlu0 %v2666_v45, %s3020_s23 }
  0xe9   : > { %v932_v57 = vpop.permute.xlu1 %931 }
  0xea   : > { %v741_v58 = vpop.permute.xlu0 %740  ;;  %1022 = vst.msk [vmem:[#allocation2 + $0x30] sm:$0xff] %vm1015_vm5, %v932_v57  ;;  %v2672_v57 = vld [vmem:[%s3071_s21 + $0xf9] sm:$0xff] }
  0xeb   : > { %830 = vst.msk [vmem:[#allocation2 + $0x38] sm:$0xff] %vm822_vm4, %v741_v58  ;;  %1330 = vrot.lane.b32.xlu1 %v3215_v39, %s3024_s27 }
  0xec   : > { %1138 = vrot.lane.b32.xlu0 %v2698_v35, %s3023_s26 }
  0xed   : > { %v1701_v60 = vpop.permute.xlu1 %1700 }
  0xee   : > { %v1510_v61 = vpop.permute.xlu0 %1509  ;;  %1793 = vst.msk [vmem:[#allocation2 + $0x20] sm:$0xff] %vm1788_vm9, %v1701_v60 }
  0xef   : > { %1601 = vst.msk [vmem:[#allocation2 + $0x28] sm:$0xff] %vm1595_vm8, %v1510_v61  ;;  %754 = vrot.lane.b32.xlu1 %v3215_v39, %s3021_s24 }
  0xf0   : > { %562 = vrot.lane.b32.xlu0 %v2698_v35, %s3019_s22 }
  0xf1   : > { %v934_v63 = vpop.permute.xlu1 %933 }
  0xf2   : > { %v356_v0 = vpop.permute.xlu0 %355  ;;  %1023 = vst.msk [vmem:[#allocation2 + $0x38] sm:$0xff] %vm1015_vm5, %v934_v63 }
  0xf3   : > { %444 = vst.msk [vmem:[#allocation2 + $0x40] sm:$0xff] %vm435_vm2, %v356_v0  ;;  %1523 = vrot.lane.b32.xlu1 %v2667_v62, %s3025_s6 }
  0xf4   : > { %1332 = vrot.lane.b32.xlu0 %v3227_v41, %s3024_s27 }
  0xf5   : > { %v1703_v39 = vpop.permute.xlu1 %1702  ;;  %v1825_v3 = vld [vmem:[#allocation2 + $0x20] sm:$0xff] }
  0xf6   : > { %v1125_v2 = vpop.permute.xlu0 %1124  ;;  %1794 = vst.msk [vmem:[#allocation2 + $0x28] sm:$0xff] %vm1788_vm9, %v1703_v39  ;;  %2878 = vmatprep.mubr.msk.f32.mxu0 %vm1865_vm10, %v1825_v3 }
  0xf7   : > { %1215 = vst.msk [vmem:[#allocation2 + $0x30] sm:$0xff] %vm1208_vm6, %v1125_v2  ;;  %947 = vrot.lane.b32.xlu1 %v2667_v62, %s3022_s25 }
  0xf8   : > { %756 = vrot.lane.b32.xlu0 %v3227_v41, %s3021_s24  ;;  %v2700_v41 = vld [vmem:[%s3071_s21 + $0xca] sm:$0xff] }
  0xf9   : > { %v549_v6 = vpop.permute.xlu1 %548 }
  0xfa   : > { %v358_v8 = vpop.permute.xlu0 %357  ;;  %637 = vst.msk [vmem:[#allocation2 + $0x40] sm:$0xff] %vm628_vm3, %v549_v6  ;;  %v3563_v6 = vld [vmem:[%s3071_s21 + $0x168] sm:$0xff] }
  0xfb   : > { %445 = vst.msk [vmem:[#allocation2 + $0x48] sm:$0xff] %vm435_vm2, %v358_v8  ;;  %1716 = vrot.lane.b32.xlu1 %v2699_v4, %s3026_s11 }
  0xfc   : > { %1525 = vrot.lane.b32.xlu0 %v2668_v5, %s3025_s6  ;;  %273 = vst.msk [vmem:[#allocation2 + $0xf0] sm:$0xff] %vm242_vm0, %v3563_v6 }
  0xfd   : > { %v1319_v9 = vpop.permute.xlu1 %1318  ;;  %v1826_v11 = vld [vmem:[#allocation2 + $0x28] sm:$0xff] }
  0xfe   : > { %v1127_v10 = vpop.permute.xlu0 %1126  ;;  %1409 = vst.msk [vmem:[#allocation2 + $0x30] sm:$0xff] %vm1402_vm7, %v1319_v9  ;;  %2879 = vmatmul.mubr.msk.f32.gmra.mrb[4].mxu0 %vm1865_vm10, %v1826_v11 }
  0xff   : > { %1216 = vst.msk [vmem:[#allocation2 + $0x38] sm:$0xff] %vm1208_vm6, %v1127_v10  ;;  %949 = vrot.lane.b32.xlu1 %v2668_v5, %s3022_s25  ;;  %v2673_v10 = vld [vmem:[%s3071_s21 + $0x109] sm:$0xff] }
 0x100   : > { %371 = vrot.lane.b32.xlu0 %v2667_v62, %s3020_s23 }
 0x101   : > { %v743_v12 = vpop.permute.xlu1 %742 }
 0x102   : > { %v551_v14 = vpop.permute.xlu0 %550  ;;  %831 = vst.msk [vmem:[#allocation2 + $0x40] sm:$0xff] %vm822_vm4, %v743_v12  ;;  %v3582_v12 = vld [vmem:[%s3071_s21 + $0x170] sm:$0xff] }
 0x103   : > { %638 = vst.msk [vmem:[#allocation2 + $0x48] sm:$0xff] %vm628_vm3, %v551_v14  ;;  %1718 = vrot.lane.b32.xlu1 %v2700_v41, %s3026_s11 }
 0x104   : > { %1140 = vrot.lane.b32.xlu0 %v2699_v4, %s3023_s26  ;;  %274 = vst.msk [vmem:[#allocation2 + $0xf8] sm:$0xff] %vm242_vm0, %v3582_v12 }
 0x105   : > { %v1512_v15 = vpop.permute.xlu1 %1511 }
 0x106   : > { %v1321_v16 = vpop.permute.xlu0 %1320  ;;  %1602 = vst.msk [vmem:[#allocation2 + $0x30] sm:$0xff] %vm1595_vm8, %v1512_v15 }
 0x107   : > { %1410 = vst.msk [vmem:[#allocation2 + $0x38] sm:$0xff] %vm1402_vm7, %v1321_v16  ;;  %564 = vrot.lane.b32.xlu1 %v2699_v4, %s3019_s22  ;;  %v2705_v16 = vld [vmem:[%s3071_s21 + $0x10a] sm:$0xff] }
 0x108   : > { %373 = vrot.lane.b32.xlu0 %v2668_v5, %s3020_s23 }
 0x109   : > { %v936_v17 = vpop.permute.xlu1 %935 }
 0x10a   : > { %v745_v18 = vpop.permute.xlu0 %744  ;;  %1024 = vst.msk [vmem:[#allocation2 + $0x40] sm:$0xff] %vm1015_vm5, %v936_v17  ;;  %v2674_v17 = vld [vmem:[%s3071_s21 + $0x111] sm:$0xff] }
 0x10b   : > { %832 = vst.msk [vmem:[#allocation2 + $0x48] sm:$0xff] %vm822_vm4, %v745_v18  ;;  %1334 = vrot.lane.b32.xlu1 %v3252_v49, %s3024_s27 }
 0x10c   : > { %1142 = vrot.lane.b32.xlu0 %v2700_v41, %s3023_s26 }
 0x10d   : > { %v1705_v20 = vpop.permute.xlu1 %1704 }
 0x10e   : > { %v1514_v21 = vpop.permute.xlu0 %1513  ;;  %1795 = vst.msk [vmem:[#allocation2 + $0x30] sm:$0xff] %vm1788_vm9, %v1705_v20 }
 0x10f   : > { %1603 = vst.msk [vmem:[#allocation2 + $0x38] sm:$0xff] %vm1595_vm8, %v1514_v21  ;;  %758 = vrot.lane.b32.xlu1 %v3252_v49, %s3021_s24 }
 0x110   : > { %566 = vrot.lane.b32.xlu0 %v2700_v41, %s3019_s22 }
 0x111   : > { %v938_v23 = vpop.permute.xlu1 %937 }
 0x112   : > { %v360_v24 = vpop.permute.xlu0 %359  ;;  %1025 = vst.msk [vmem:[#allocation2 + $0x48] sm:$0xff] %vm1015_vm5, %v938_v23 }
 0x113   : > { %446 = vst.msk [vmem:[#allocation2 + $0x50] sm:$0xff] %vm435_vm2, %v360_v24  ;;  %1527 = vrot.lane.b32.xlu1 %v2669_v22, %s3025_s6 }
 0x114   : > { %1336 = vrot.lane.b32.xlu0 %v3269_v55, %s3024_s27 }
 0x115   : > { %v1707_v49 = vpop.permute.xlu1 %1706  ;;  %v1827_v27 = vld [vmem:[#allocation2 + $0x30] sm:$0xff] }
 0x116   : > { %v1129_v26 = vpop.permute.xlu0 %1128  ;;  %1796 = vst.msk [vmem:[#allocation2 + $0x38] sm:$0xff] %vm1788_vm9, %v1707_v49  ;;  %2881 = vmatprep.mubr.msk.f32.mxu0 %vm1865_vm10, %v1827_v27 }
 0x117   : > { %1217 = vst.msk [vmem:[#allocation2 + $0x40] sm:$0xff] %vm1208_vm6, %v1129_v26  ;;  %951 = vrot.lane.b32.xlu1 %v2669_v22, %s3022_s25 }
 0x118   : > { %760 = vrot.lane.b32.xlu0 %v3269_v55, %s3021_s24  ;;  %v2702_v55 = vld [vmem:[%s3071_s21 + $0xe2] sm:$0xff] }
 0x119   : > { %v553_v30 = vpop.permute.xlu1 %552 }
 0x11a   : > { %v362_v32 = vpop.permute.xlu0 %361  ;;  %639 = vst.msk [vmem:[#allocation2 + $0x50] sm:$0xff] %vm628_vm3, %v553_v30 }
 0x11b   : > { %447 = vst.msk [vmem:[#allocation2 + $0x58] sm:$0xff] %vm435_vm2, %v362_v32  ;;  %1720 = vrot.lane.b32.xlu1 %v2701_v28, %s3026_s11 }
 0x11c   : > { %1529 = vrot.lane.b32.xlu0 %v2670_v29, %s3025_s6 }
 0x11d   : > { %v1323_v34 = vpop.permute.xlu1 %1322  ;;  %v1828_v37 = vld [vmem:[#allocation2 + $0x38] sm:$0xff] }
 0x11e   : > { %v1131_v36 = vpop.permute.xlu0 %1130  ;;  %1411 = vst.msk [vmem:[#allocation2 + $0x40] sm:$0xff] %vm1402_vm7, %v1323_v34  ;;  %2882 = vmatmul.mubr.msk.f32.gmra.mrb[6].mxu0 %vm1865_vm10, %v1828_v37  ;;  %v2675_v34 = vld [vmem:[%s3071_s21 + $0x121] sm:$0xff] }
 0x11f   : > { %1218 = vst.msk [vmem:[#allocation2 + $0x48] sm:$0xff] %vm1208_vm6, %v1131_v36  ;;  %953 = vrot.lane.b32.xlu1 %v2670_v29, %s3022_s25 }
 0x120   : > { %375 = vrot.lane.b32.xlu0 %v2669_v22, %s3020_s23 }
 0x121   : > { %v747_v38 = vpop.permute.xlu1 %746 }
 0x122   : > { %v555_v33 = vpop.permute.xlu0 %554  ;;  %833 = vst.msk [vmem:[#allocation2 + $0x50] sm:$0xff] %vm822_vm4, %v747_v38 }
 0x123   : > { %640 = vst.msk [vmem:[#allocation2 + $0x58] sm:$0xff] %vm628_vm3, %v555_v33  ;;  %1722 = vrot.lane.b32.xlu1 %v2702_v55, %s3026_s11 }
 0x124   : > { %1144 = vrot.lane.b32.xlu0 %v2701_v28, %s3023_s26 }
 0x125   : > { %v1516_v42 = vpop.permute.xlu1 %1515 }
 0x126   : > { %v1325_v43 = vpop.permute.xlu0 %1324  ;;  %1604 = vst.msk [vmem:[#allocation2 + $0x40] sm:$0xff] %vm1595_vm8, %v1516_v42  ;;  %v2676_v42 = vld [vmem:[%s3071_s21 + $0x129] sm:$0xff] }
 0x127   : > { %1412 = vst.msk [vmem:[#allocation2 + $0x48] sm:$0xff] %vm1402_vm7, %v1325_v43  ;;  %568 = vrot.lane.b32.xlu1 %v2701_v28, %s3019_s22 }
 0x128   : > { %377 = vrot.lane.b32.xlu0 %v2670_v29, %s3020_s23 }
 0x129   : > { %v940_v44 = vpop.permute.xlu1 %939 }
 0x12a   : > { %v749_v45 = vpop.permute.xlu0 %748  ;;  %1026 = vst.msk [vmem:[#allocation2 + $0x50] sm:$0xff] %vm1015_vm5, %v940_v44 }
 0x12b   : > { %834 = vst.msk [vmem:[#allocation2 + $0x58] sm:$0xff] %vm822_vm4, %v749_v45  ;;  %1338 = vrot.lane.b32.xlu1 %v3303_v7, %s3024_s27 }
 0x12c   : > { %1146 = vrot.lane.b32.xlu0 %v2702_v55, %s3023_s26 }
 0x12d   : > { %v1709_v47 = vpop.permute.xlu1 %1708 }
 0x12e   : > { %v1518_v48 = vpop.permute.xlu0 %1517  ;;  %1797 = vst.msk [vmem:[#allocation2 + $0x40] sm:$0xff] %vm1788_vm9, %v1709_v47 }
 0x12f   : > { %1605 = vst.msk [vmem:[#allocation2 + $0x48] sm:$0xff] %vm1595_vm8, %v1518_v48  ;;  %762 = vrot.lane.b32.xlu1 %v3303_v7, %s3021_s24 }
 0x130   : > { %570 = vrot.lane.b32.xlu0 %v2702_v55, %s3019_s22 }
 0x131   : > { %v942_v51 = vpop.permute.xlu1 %941 }
 0x132   : > { %v364_v35 = vpop.permute.xlu0 %363  ;;  %1027 = vst.msk [vmem:[#allocation2 + $0x58] sm:$0xff] %vm1015_vm5, %v942_v51 }
 0x133   : > { %448 = vst.msk [vmem:[#allocation2 + $0x60] sm:$0xff] %vm435_vm2, %v364_v35  ;;  %1531 = vrot.lane.b32.xlu1 %v2671_v50, %s3025_s6 }
 0x134   : > { %1340 = vrot.lane.b32.xlu0 %v3319_v13, %s3024_s27 }
 0x135   : > { %v1711_v7 = vpop.permute.xlu1 %1710  ;;  %v1829_v54 = vld [vmem:[#allocation2 + $0x40] sm:$0xff] }
 0x136   : > { %v1133_v53 = vpop.permute.xlu0 %1132  ;;  %1798 = vst.msk [vmem:[#allocation2 + $0x48] sm:$0xff] %vm1788_vm9, %v1711_v7  ;;  %2884 = vmatprep.mubr.msk.f32.mxu0 %vm1865_vm10, %v1829_v54 }
 0x137   : > { %1219 = vst.msk [vmem:[#allocation2 + $0x50] sm:$0xff] %vm1208_vm6, %v1133_v53  ;;  %955 = vrot.lane.b32.xlu1 %v2671_v50, %s3022_s25 }
 0x138   : > { %764 = vrot.lane.b32.xlu0 %v3319_v13, %s3021_s24  ;;  %v2704_v13 = vld [vmem:[%s3071_s21 + $0xfa] sm:$0xff] }
 0x139   : > { %v557_v58 = vpop.permute.xlu1 %556 }
 0x13a   : > { %v366_v60 = vpop.permute.xlu0 %365  ;;  %641 = vst.msk [vmem:[#allocation2 + $0x60] sm:$0xff] %vm628_vm3, %v557_v58  ;;  %v3668_v58 = vld [vmem:[%s4243_s2] ss:$0 sm:$0xff] }
 0x13b   : > { %449 = vst.msk [vmem:[#allocation2 + $0x68] sm:$0xff] %vm435_vm2, %v366_v60  ;;  %1724 = vrot.lane.b32.xlu1 %v2703_v56, %s3026_s11  ;;  %v2677_v60 = vld [vmem:[%s3071_s21 + $0x139] sm:$0xff] }
 0x13c   : > { %1533 = vrot.lane.b32.xlu0 %v2672_v57, %s3025_s6 }
 0x13d   : > { %v1327_v61 = vpop.permute.xlu1 %1326  ;;  %v1830_v63 = vld [vmem:[#allocation2 + $0x48] sm:$0xff] }
 0x13e   : > { %v1135_v62 = vpop.permute.xlu0 %1134  ;;  %1413 = vst.msk [vmem:[#allocation2 + $0x50] sm:$0xff] %vm1402_vm7, %v1327_v61  ;;  %2885 = vmatmul.mubr.msk.f32.gmra.mrb[8].mxu0 %vm1865_vm10, %v1830_v63 }
 0x13f   : > { %1220 = vst.msk [vmem:[#allocation2 + $0x58] sm:$0xff] %vm1208_vm6, %v1135_v62  ;;  %957 = vrot.lane.b32.xlu1 %v2672_v57, %s3022_s25 }
 0x140   : > { %379 = vrot.lane.b32.xlu0 %v2671_v50, %s3020_s23 }
 0x141   : > { %v751_v0 = vpop.permute.xlu1 %750 }
 0x142   : > { %v559_v39 = vpop.permute.xlu0 %558  ;;  %835 = vst.msk [vmem:[#allocation2 + $0x60] sm:$0xff] %vm822_vm4, %v751_v0 }
 0x143   : > { %642 = vst.msk [vmem:[#allocation2 + $0x68] sm:$0xff] %vm628_vm3, %v559_v39  ;;  %1726 = vrot.lane.b32.xlu1 %v2704_v13, %s3026_s11 }
 0x144   : > { %1148 = vrot.lane.b32.xlu0 %v2703_v56, %s3023_s26 }
 0x145   : > { %v1520_v2 = vpop.permute.xlu1 %1519 }
 0x146   : > { %v1329_v3 = vpop.permute.xlu0 %1328  ;;  %1606 = vst.msk [vmem:[#allocation2 + $0x50] sm:$0xff] %vm1595_vm8, %v1520_v2 }
 0x147   : > { %1414 = vst.msk [vmem:[#allocation2 + $0x58] sm:$0xff] %vm1402_vm7, %v1329_v3  ;;  %572 = vrot.lane.b32.xlu1 %v2703_v56, %s3019_s22 }
 0x148   : > { %381 = vrot.lane.b32.xlu0 %v2672_v57, %s3020_s23 }
 0x149   : > { %v944_v4 = vpop.permute.xlu1 %943 }
 0x14a   : > { %v753_v5 = vpop.permute.xlu0 %752  ;;  %1028 = vst.msk [vmem:[#allocation2 + $0x60] sm:$0xff] %vm1015_vm5, %v944_v4 }
 0x14b   : > { %836 = vst.msk [vmem:[#allocation2 + $0x68] sm:$0xff] %vm822_vm4, %v753_v5  ;;  %1342 = vrot.lane.b32.xlu1 %v3355_v31, %s3024_s27 }
 0x14c   : > { %1150 = vrot.lane.b32.xlu0 %v2704_v13, %s3023_s26 }
 0x14d   : > { %v1713_v8 = vpop.permute.xlu1 %1712 }
 0x14e   : > { %v1522_v9 = vpop.permute.xlu0 %1521  ;;  %1799 = vst.msk [vmem:[#allocation2 + $0x50] sm:$0xff] %vm1788_vm9, %v1713_v8 }
 0x14f   : > { %1607 = vst.msk [vmem:[#allocation2 + $0x58] sm:$0xff] %vm1595_vm8, %v1522_v9  ;;  %766 = vrot.lane.b32.xlu1 %v3355_v31, %s3021_s24 }
 0x150   : > { %574 = vrot.lane.b32.xlu0 %v2704_v13, %s3019_s22 }
 0x151   : > { %v946_v11 = vpop.permute.xlu1 %945 }
 0x152   : > { %v368_v41 = vpop.permute.xlu0 %367  ;;  %1029 = vst.msk [vmem:[#allocation2 + $0x68] sm:$0xff] %vm1015_vm5, %v946_v11  ;;  %v2678_v11 = vld [vmem:[%s3071_s21 + $0x141] sm:$0xff] }
 0x153   : > { %450 = vst.msk [vmem:[#allocation2 + $0x70] sm:$0xff] %vm435_vm2, %v368_v41  ;;  %1535 = vrot.lane.b32.xlu1 %v2673_v10, %s3025_s6 }
 0x154   : > { %1344 = vrot.lane.b32.xlu0 %v3371_v40, %s3024_s27 }
 0x155   : > { %v1715_v31 = vpop.permute.xlu1 %1714  ;;  %v1831_v15 = vld [vmem:[#allocation2 + $0x50] sm:$0xff] }
 0x156   : > { %v1137_v14 = vpop.permute.xlu0 %1136  ;;  %1800 = vst.msk [vmem:[#allocation2 + $0x58] sm:$0xff] %vm1788_vm9, %v1715_v31  ;;  %2887 = vmatprep.mubr.msk.f32.mxu0 %vm1865_vm10, %v1831_v15 }
 0x157   : > { %1221 = vst.msk [vmem:[#allocation2 + $0x60] sm:$0xff] %vm1208_vm6, %v1137_v14  ;;  %959 = vrot.lane.b32.xlu1 %v2673_v10, %s3022_s25 }
 0x158   : > { %768 = vrot.lane.b32.xlu0 %v3371_v40, %s3021_s24  ;;  %v2706_v40 = vld [vmem:[%s3071_s21 + $0x112] sm:$0xff] }
 0x159   : > { %v561_v18 = vpop.permute.xlu1 %560 }
 0x15a   : > { %v370_v20 = vpop.permute.xlu0 %369  ;;  %643 = vst.msk [vmem:[#allocation2 + $0x70] sm:$0xff] %vm628_vm3, %v561_v18  ;;  %v2710_v18 = vld [vmem:[%s3071_s21 + $0x142] sm:$0xff] }
 0x15b   : > { %451 = vst.msk [vmem:[#allocation2 + $0x78] sm:$0xff] %vm435_vm2, %v370_v20  ;;  %1728 = vrot.lane.b32.xlu1 %v2705_v16, %s3026_s11 }
 0x15c   : > { %1537 = vrot.lane.b32.xlu0 %v2674_v17, %s3025_s6 }
 0x15d   : > { %v1331_v21 = vpop.permute.xlu1 %1330  ;;  %v1832_v23 = vld [vmem:[#allocation2 + $0x58] sm:$0xff] }
 0x15e   : > { %v1139_v22 = vpop.permute.xlu0 %1138  ;;  %1415 = vst.msk [vmem:[#allocation2 + $0x60] sm:$0xff] %vm1402_vm7, %v1331_v21  ;;  %2888 = vmatmul.mubr.msk.f32.gmra.mrb[10].mxu0 %vm1865_vm10, %v1832_v23 }
 0x15f   : > { %1222 = vst.msk [vmem:[#allocation2 + $0x68] sm:$0xff] %vm1208_vm6, %v1139_v22  ;;  %961 = vrot.lane.b32.xlu1 %v2674_v17, %s3022_s25 }
 0x160   : > { %383 = vrot.lane.b32.xlu0 %v2673_v10, %s3020_s23  ;;  %v2709_v10 = vld [vmem:[%s3071_s21 + $0x13a] sm:$0xff] }
 0x161   : > { %v755_v24 = vpop.permute.xlu1 %754 }
 0x162   : > { %v563_v49 = vpop.permute.xlu0 %562  ;;  %837 = vst.msk [vmem:[#allocation2 + $0x70] sm:$0xff] %vm822_vm4, %v755_v24 }
 0x163   : > { %644 = vst.msk [vmem:[#allocation2 + $0x78] sm:$0xff] %vm628_vm3, %v563_v49  ;;  %1730 = vrot.lane.b32.xlu1 %v2706_v40, %s3026_s11 }
 0x164   : > { %1152 = vrot.lane.b32.xlu0 %v2705_v16, %s3023_s26 }
 0x165   : > { %v1524_v26 = vpop.permute.xlu1 %1523 }
 0x166   : > { %v1333_v27 = vpop.permute.xlu0 %1332  ;;  %1608 = vst.msk [vmem:[#allocation2 + $0x60] sm:$0xff] %vm1595_vm8, %v1524_v26 }
 0x167   : > { %1416 = vst.msk [vmem:[#allocation2 + $0x68] sm:$0xff] %vm1402_vm7, %v1333_v27  ;;  %576 = vrot.lane.b32.xlu1 %v2705_v16, %s3019_s22  ;;  %v2679_v27 = vld [vmem:[%s3071_s21 + $0x151] sm:$0xff] }
 0x168   : > { %385 = vrot.lane.b32.xlu0 %v2674_v17, %s3020_s23 }
 0x169   : > { %v948_v28 = vpop.permute.xlu1 %947 }
 0x16a   : > { %v757_v29 = vpop.permute.xlu0 %756  ;;  %1030 = vst.msk [vmem:[#allocation2 + $0x70] sm:$0xff] %vm1015_vm5, %v948_v28 }
 0x16b   : > { %838 = vst.msk [vmem:[#allocation2 + $0x78] sm:$0xff] %vm822_vm4, %v757_v29  ;;  %1346 = vrot.lane.b32.xlu1 %v3407_v59, %s3024_s27 }
 0x16c   : > { %1154 = vrot.lane.b32.xlu0 %v2706_v40, %s3023_s26 }
 0x16d   : > { %v1717_v30 = vpop.permute.xlu1 %1716 }
 0x16e   : > { %v1526_v32 = vpop.permute.xlu0 %1525  ;;  %1801 = vst.msk [vmem:[#allocation2 + $0x60] sm:$0xff] %vm1788_vm9, %v1717_v30 }
 0x16f   : > { %1609 = vst.msk [vmem:[#allocation2 + $0x68] sm:$0xff] %vm1595_vm8, %v1526_v32  ;;  %770 = vrot.lane.b32.xlu1 %v3407_v59, %s3021_s24  ;;  %v2707_v59 = vld [vmem:[%s3071_s21 + $0x122] sm:$0xff] }
 0x170   : > { %578 = vrot.lane.b32.xlu0 %v2706_v40, %s3019_s22 }
 0x171   : > { %v950_v36 = vpop.permute.xlu1 %949 }
 0x172   : > { %v372_v37 = vpop.permute.xlu0 %371  ;;  %1031 = vst.msk [vmem:[#allocation2 + $0x78] sm:$0xff] %vm1015_vm5, %v950_v36 }
 0x173   : > { %452 = vst.msk [vmem:[#allocation2 + $0x80] sm:$0xff] %vm435_vm2, %v372_v37  ;;  %1539 = vrot.lane.b32.xlu1 %v2675_v34, %s3025_s6 }
 0x174   : > { %1348 = vrot.lane.b32.xlu0 %v3423_v1, %s3024_s27 }
 0x175   : > { %v1719_v55 = vpop.permute.xlu1 %1718  ;;  %v1833_v33 = vld [vmem:[#allocation2 + $0x60] sm:$0xff] }
 0x176   : > { %v1141_v38 = vpop.permute.xlu0 %1140  ;;  %1802 = vst.msk [vmem:[#allocation2 + $0x68] sm:$0xff] %vm1788_vm9, %v1719_v55  ;;  %2890 = vmatprep.mubr.msk.f32.mxu0 %vm1865_vm10, %v1833_v33 }
 0x177   : > { %1223 = vst.msk [vmem:[#allocation2 + $0x70] sm:$0xff] %vm1208_vm6, %v1141_v38  ;;  %963 = vrot.lane.b32.xlu1 %v2675_v34, %s3022_s25 }
 0x178   : > { %772 = vrot.lane.b32.xlu0 %v3423_v1, %s3021_s24  ;;  %v2708_v1 = vld [vmem:[%s3071_s21 + $0x12a] sm:$0xff] }
 0x179   : > { %v565_v43 = vpop.permute.xlu1 %564 }
 0x17a   : > { %v374_v44 = vpop.permute.xlu0 %373  ;;  %645 = vst.msk [vmem:[#allocation2 + $0x80] sm:$0xff] %vm628_vm3, %v565_v43  ;;  %v2711_v43 = vld [vmem:[%s3071_s21 + $0x152] sm:$0xff] }
 0x17b   : > { %453 = vst.msk [vmem:[#allocation2 + $0x88] sm:$0xff] %vm435_vm2, %v374_v44  ;;  %1732 = vrot.lane.b32.xlu1 %v2707_v59, %s3026_s11  ;;  %v2680_v44 = vld [vmem:[%s3071_s21 + $0x159] sm:$0xff] }
 0x17c   : > { %1541 = vrot.lane.b32.xlu0 %v2676_v42, %s3025_s6 }
 0x17d   : > { %v1335_v45 = vpop.permute.xlu1 %1334  ;;  %v1834_v48 = vld [vmem:[#allocation2 + $0x68] sm:$0xff] }
 0x17e   : > { %v1143_v47 = vpop.permute.xlu0 %1142  ;;  %1417 = vst.msk [vmem:[#allocation2 + $0x70] sm:$0xff] %vm1402_vm7, %v1335_v45  ;;  %2891 = vmatmul.mubr.msk.f32.gmra.mrb[12].mxu0 %vm1865_vm10, %v1834_v48 }
 0x17f   : > { %1224 = vst.msk [vmem:[#allocation2 + $0x78] sm:$0xff] %vm1208_vm6, %v1143_v47  ;;  %965 = vrot.lane.b32.xlu1 %v2676_v42, %s3022_s25 }
 0x180   : > { %387 = vrot.lane.b32.xlu0 %v2675_v34, %s3020_s23 }
 0x181   : > { %v759_v50 = vpop.permute.xlu1 %758 }
 0x182   : > { %v567_v51 = vpop.permute.xlu0 %566  ;;  %839 = vst.msk [vmem:[#allocation2 + $0x80] sm:$0xff] %vm822_vm4, %v759_v50 }
 0x183   : > { %646 = vst.msk [vmem:[#allocation2 + $0x88] sm:$0xff] %vm628_vm3, %v567_v51  ;;  %1734 = vrot.lane.b32.xlu1 %v2708_v1, %s3026_s11 }
 0x184   : > { %1156 = vrot.lane.b32.xlu0 %v2707_v59, %s3023_s26 }
 0x185   : > { %v1528_v35 = vpop.permute.xlu1 %1527 }
 0x186   : > { %v1337_v7 = vpop.permute.xlu0 %1336  ;;  %1610 = vst.msk [vmem:[#allocation2 + $0x70] sm:$0xff] %vm1595_vm8, %v1528_v35  ;;  %v2712_v35 = vld [vmem:[%s3071_s21 + $0x15a] sm:$0xff] }
 0x187   : > { %1418 = vst.msk [vmem:[#allocation2 + $0x78] sm:$0xff] %vm1402_vm7, %v1337_v7  ;;  %580 = vrot.lane.b32.xlu1 %v2707_v59, %s3019_s22 }
 0x188   : > { %389 = vrot.lane.b32.xlu0 %v2676_v42, %s3020_s23 }
 0x189   : > { %v952_v53 = vpop.permute.xlu1 %951 }
 0x18a   : > { %v761_v54 = vpop.permute.xlu0 %760  ;;  %1032 = vst.msk [vmem:[#allocation2 + $0x80] sm:$0xff] %vm1015_vm5, %v952_v53 }
 0x18b   : > { %840 = vst.msk [vmem:[#allocation2 + $0x88] sm:$0xff] %vm822_vm4, %v761_v54  ;;  %1350 = vrot.lane.b32.xlu1 %v3459_v19, %s3024_s27 }
 0x18c   : > { %1158 = vrot.lane.b32.xlu0 %v2708_v1, %s3023_s26 }
 0x18d   : > { %v1721_v56 = vpop.permute.xlu1 %1720 }
 0x18e   : > { %v1530_v57 = vpop.permute.xlu0 %1529  ;;  %1803 = vst.msk [vmem:[#allocation2 + $0x70] sm:$0xff] %vm1788_vm9, %v1721_v56 }
 0x18f   : > { %1611 = vst.msk [vmem:[#allocation2 + $0x78] sm:$0xff] %vm1595_vm8, %v1530_v57  ;;  %774 = vrot.lane.b32.xlu1 %v3459_v19, %s3021_s24 }
 0x190   : > { %582 = vrot.lane.b32.xlu0 %v2708_v1, %s3019_s22 }
 0x191   : > { %v954_v61 = vpop.permute.xlu1 %953  ;;  %v2874_v63 = vpop.f32.mrb[0].mxu0 }
 0x192   : > { %v376_v62 = vpop.permute.xlu0 %375  ;;  %1033 = vst.msk [vmem:[#allocation2 + $0x88] sm:$0xff] %vm1015_vm5, %v954_v61  ;;  %v2038_v13 = vadd.f32 %v2874_v63, %v3668_v58  ;;  %v2032_v0 = vpop.f32.mrb[1].mxu0  ;;  %v2681_v63 = vld [vmem:[%s3071_s21 + $0x169] sm:$0xff] }
 0x193   : > { %454 = vst.msk [vmem:[#allocation2 + $0x90] sm:$0xff] %vm435_vm2, %v376_v62  ;;  %1543 = vrot.lane.b32.xlu1 %v2677_v60, %s3025_s6  ;;  %v2033_v19 = vadd.f32 %v3668_v58, %v2032_v0 }
 0x194   : > { %1352 = vrot.lane.b32.xlu0 %v3478_v25, %s3024_s27  ;;  %v3683_v39 = vmax.f32 %v2038_v13, 0.0 }
 0x195   : > { %v1723_v2 = vpop.permute.xlu1 %1722  ;;  %v1835_v4 = vld [vmem:[#allocation2 + $0x70] sm:$0xff]  ;;  %v3685_v5 = vmax.f32 %v2033_v19, 0.0 }
 0x196   : > { %v1145_v3 = vpop.permute.xlu0 %1144  ;;  %1804 = vst.msk [vmem:[#allocation2 + $0x78] sm:$0xff] %vm1788_vm9, %v1723_v2  ;;  %2893 = vmatprep.mubr.msk.f32.mxu0 %vm1865_vm10, %v1835_v4  ;;  %v3695_v8 = vmul.f32 %v3683_v39, %v3683_v39 }
 0x197   : > { %1225 = vst.msk [vmem:[#allocation2 + $0x80] sm:$0xff] %vm1208_vm6, %v1145_v3  ;;  %967 = vrot.lane.b32.xlu1 %v2677_v60, %s3022_s25  ;;  %v3705_v9 = vmul.f32 %v3685_v5, %v3685_v5  ;;  %v2930_v41 = vpack.c.bf16 %v3683_v39, %v3685_v5 }
 0x198   : > { %2225 = vst.msk [vmem:[%s3680_s29 + $0x8] sm:$0xff] %vm2223_vm11, %v3683_v39  ;;  %776 = vrot.lane.b32.xlu0 %v3478_v25, %s3021_s24  ;;  %2224 = vst.msk [vmem:[%s3680_s29] sm:$0xff] %vm2223_vm11, %v3685_v5 }
 0x199   : > { %v569_v31 = vpop.permute.xlu1 %568  ;;  %v2962_v25 = vpack.c.bf16 %v3695_v8, %v3705_v9 }
 0x19a   : > { %v378_v14 = vpop.permute.xlu0 %377  ;;  %647 = vst.msk [vmem:[#allocation2 + $0x90] sm:$0xff] %vm628_vm3, %v569_v31 }
 0x19b   : > { %455 = vst.msk [vmem:[#allocation2 + $0x98] sm:$0xff] %vm435_vm2, %v378_v14  ;;  %1736 = vrot.lane.b32.xlu1 %v2709_v10, %s3026_s11 }
 0x19c   : > { %1545 = vrot.lane.b32.xlu0 %v2678_v11, %s3025_s6 }
 0x19d   : > { %v1339_v15 = vpop.permute.xlu1 %1338  ;;  %v1836_v17 = vld [vmem:[#allocation2 + $0x78] sm:$0xff] }
 0x19e   : > { %v1147_v16 = vpop.permute.xlu0 %1146  ;;  %1419 = vst.msk [vmem:[#allocation2 + $0x80] sm:$0xff] %vm1402_vm7, %v1339_v15  ;;  %2894 = vmatmul.mubr.msk.f32.gmra.mrb[14].mxu0 %vm1865_vm10, %v1836_v17  ;;  %v2713_v17 = vld [vmem:[%s3071_s21 + $0x16a] sm:$0xff] }
 0x19f   : > { %1226 = vst.msk [vmem:[#allocation2 + $0x88] sm:$0xff] %vm1208_vm6, %v1147_v16  ;;  %969 = vrot.lane.b32.xlu1 %v2678_v11, %s3022_s25 }
 0x1a0   : > { %391 = vrot.lane.b32.xlu0 %v2677_v60, %s3020_s23 }
 0x1a1   : > { %v763_v20 = vpop.permute.xlu1 %762 }
 0x1a2   : > { %v571_v21 = vpop.permute.xlu0 %570  ;;  %841 = vst.msk [vmem:[#allocation2 + $0x90] sm:$0xff] %vm822_vm4, %v763_v20 }
 0x1a3   : > { %648 = vst.msk [vmem:[#allocation2 + $0x98] sm:$0xff] %vm628_vm3, %v571_v21  ;;  %1738 = vrot.lane.b32.xlu1 %v2710_v18, %s3026_s11 }
 0x1a4   : > { %1160 = vrot.lane.b32.xlu0 %v2709_v10, %s3023_s26 }
 0x1a5   : > { %v1532_v22 = vpop.permute.xlu1 %1531 }
 0x1a6   : > { %v1341_v23 = vpop.permute.xlu0 %1340  ;;  %1612 = vst.msk [vmem:[#allocation2 + $0x80] sm:$0xff] %vm1595_vm8, %v1532_v22 }
 0x1a7   : > { %1420 = vst.msk [vmem:[#allocation2 + $0x88] sm:$0xff] %vm1402_vm7, %v1341_v23  ;;  %584 = vrot.lane.b32.xlu1 %v2709_v10, %s3019_s22 }
 0x1a8   : > { %393 = vrot.lane.b32.xlu0 %v2678_v11, %s3020_s23 }
 0x1a9   : > { %v956_v40 = vpop.permute.xlu1 %955 }
 0x1aa   : > { %v765_v24 = vpop.permute.xlu0 %764  ;;  %1034 = vst.msk [vmem:[#allocation2 + $0x90] sm:$0xff] %vm1015_vm5, %v956_v40 }
 0x1ab   : > { %842 = vst.msk [vmem:[#allocation2 + $0x98] sm:$0xff] %vm822_vm4, %v765_v24  ;;  %1354 = vrot.lane.b32.xlu1 %v3511_v46, %s3024_s27 }
 0x1ac   : > { %1162 = vrot.lane.b32.xlu0 %v2710_v18, %s3023_s26 }
 0x1ad   : > { %v1725_v49 = vpop.permute.xlu1 %1724 }
 0x1ae   : > { %v1534_v26 = vpop.permute.xlu0 %1533  ;;  %1805 = vst.msk [vmem:[#allocation2 + $0x80] sm:$0xff] %vm1788_vm9, %v1725_v49  ;;  %v2714_v49 = vld [vmem:[%s3071_s21 + $0x172] sm:$0xff] }
 0x1af   : > { %1613 = vst.msk [vmem:[#allocation2 + $0x88] sm:$0xff] %vm1595_vm8, %v1534_v26  ;;  %778 = vrot.lane.b32.xlu1 %v3511_v46, %s3021_s24 }
 0x1b0   : > { %586 = vrot.lane.b32.xlu0 %v2710_v18, %s3019_s22  ;;  %v2682_v18 = vld [vmem:[%s3071_s21 + $0x171] sm:$0xff] }
 0x1b1   : > { %v958_v28 = vpop.permute.xlu1 %957  ;;  %v2877_v30 = vpop.f32.mrb[2].mxu0 }
 0x1b2   : > { %v380_v29 = vpop.permute.xlu0 %379  ;;  %1035 = vst.msk [vmem:[#allocation2 + $0x98] sm:$0xff] %vm1015_vm5, %v958_v28  ;;  %v2048_v32 = vadd.f32 %v2877_v30, %v3668_v58  ;;  %v2042_v34 = vpop.f32.mrb[3].mxu0  ;;  %v2651_v30 = vld [vmem:[%s3071_s21 + $0x180] sm:$0xff] }
 0x1b3   : > { %456 = vst.msk [vmem:[#allocation2 + $0xa0] sm:$0xff] %vm435_vm2, %v380_v29  ;;  %1547 = vrot.lane.b32.xlu1 %v2679_v27, %s3025_s6  ;;  %v2043_v46 = vadd.f32 %v3668_v58, %v2042_v34 }
 0x1b4   : > { %1356 = vrot.lane.b32.xlu0 %v3530_v52, %s3024_s27  ;;  %v3749_v36 = vmax.f32 %v2048_v32, 0.0 }
 0x1b5   : > { %v1727_v37 = vpop.permute.xlu1 %1726  ;;  %v1837_v38 = vld [vmem:[#allocation2 + $0x80] sm:$0xff]  ;;  %v3751_v33 = vmax.f32 %v2043_v46, 0.0 }
 0x1b6   : > { %v1149_v55 = vpop.permute.xlu0 %1148  ;;  %1806 = vst.msk [vmem:[#allocation2 + $0x88] sm:$0xff] %vm1788_vm9, %v1727_v37  ;;  %2896 = vmatprep.mubr.msk.f32.mxu0 %vm1865_vm10, %v1837_v38  ;;  %v3761_v59 = vmul.f32 %v3749_v36, %v3749_v36  ;;  %v2683_v38 = vld [vmem:[%s3071_s21 + $0x181] sm:$0xff] }
 0x1b7   : > { %1227 = vst.msk [vmem:[#allocation2 + $0x90] sm:$0xff] %vm1208_vm6, %v1149_v55  ;;  %971 = vrot.lane.b32.xlu1 %v2679_v27, %s3022_s25  ;;  %v3771_v42 = vmul.f32 %v3751_v33, %v3751_v33  ;;  %v2934_v45 = vpack.c.bf16 %v3749_v36, %v3751_v33  ;;  %v2652_v55 = vld [vmem:[%s3071_s21 + $0x188] sm:$0xff] }
 0x1b8   : > { %2227 = vst.msk [vmem:[%s3680_s29 + $0x18] sm:$0xff] %vm2223_vm11, %v3749_v36  ;;  %780 = vrot.lane.b32.xlu0 %v3530_v52, %s3021_s24  ;;  %2226 = vst.msk [vmem:[%s3680_s29 + $0x10] sm:$0xff] %vm2223_vm11, %v3751_v33 }
 0x1b9   : > { %v573_v47 = vpop.permute.xlu1 %572  ;;  %v2966_v52 = vpack.c.bf16 %v3761_v59, %v3771_v42 }
 0x1ba   : > { %v382_v48 = vpop.permute.xlu0 %381  ;;  %649 = vst.msk [vmem:[#allocation2 + $0xa0] sm:$0xff] %vm628_vm3, %v573_v47 }
 0x1bb   : > { %457 = vst.msk [vmem:[#allocation2 + $0xa8] sm:$0xff] %vm435_vm2, %v382_v48  ;;  %1740 = vrot.lane.b32.xlu1 %v2711_v43, %s3026_s11 }
 0x1bc   : > { %1549 = vrot.lane.b32.xlu0 %v2680_v44, %s3025_s6 }
 0x1bd   : > { %v1343_v1 = vpop.permute.xlu1 %1342  ;;  %v1838_v51 = vld [vmem:[#allocation2 + $0x88] sm:$0xff] }
 0x1be   : > { %v1151_v50 = vpop.permute.xlu0 %1150  ;;  %1421 = vst.msk [vmem:[#allocation2 + $0x90] sm:$0xff] %vm1402_vm7, %v1343_v1  ;;  %2897 = vmatmul.mubr.msk.f32.gmra.mrb[16].mxu0 %vm1865_vm10, %v1838_v51 }
 0x1bf   : > { %1228 = vst.msk [vmem:[#allocation2 + $0x98] sm:$0xff] %vm1208_vm6, %v1151_v50  ;;  %973 = vrot.lane.b32.xlu1 %v2680_v44, %s3022_s25 }
 0x1c0   : > { %395 = vrot.lane.b32.xlu0 %v2679_v27, %s3020_s23 }
 0x1c1   : > { %v767_v7 = vpop.permute.xlu1 %766 }
 0x1c2   : > { %v575_v53 = vpop.permute.xlu0 %574  ;;  %843 = vst.msk [vmem:[#allocation2 + $0xa0] sm:$0xff] %vm822_vm4, %v767_v7 }
 0x1c3   : > { %650 = vst.msk [vmem:[#allocation2 + $0xa8] sm:$0xff] %vm628_vm3, %v575_v53  ;;  %1742 = vrot.lane.b32.xlu1 %v2712_v35, %s3026_s11 }
 0x1c4   : > { %1164 = vrot.lane.b32.xlu0 %v2711_v43, %s3023_s26 }
 0x1c5   : > { %v1536_v54 = vpop.permute.xlu1 %1535 }
 0x1c6   : > { %v1345_v56 = vpop.permute.xlu0 %1344  ;;  %1614 = vst.msk [vmem:[#allocation2 + $0x90] sm:$0xff] %vm1595_vm8, %v1536_v54 }
 0x1c7   : > { %1422 = vst.msk [vmem:[#allocation2 + $0x98] sm:$0xff] %vm1402_vm7, %v1345_v56  ;;  %588 = vrot.lane.b32.xlu1 %v2711_v43, %s3019_s22 }
 0x1c8   : > { %397 = vrot.lane.b32.xlu0 %v2680_v44, %s3020_s23 }
 0x1c9   : > { %v960_v57 = vpop.permute.xlu1 %959 }
 0x1ca   : > { %v769_v60 = vpop.permute.xlu0 %768  ;;  %1036 = vst.msk [vmem:[#allocation2 + $0xa0] sm:$0xff] %vm1015_vm5, %v960_v57 }
 0x1cb   : > { %844 = vst.msk [vmem:[#allocation2 + $0xa8] sm:$0xff] %vm822_vm4, %v769_v60  ;;  %1358 = vrot.lane.b32.xlu1 %v3563_v6, %s3024_s27  ;;  %v2684_v60 = vld [vmem:[%s3071_s21 + $0x189] sm:$0xff] }
 0x1cc   : > { %1166 = vrot.lane.b32.xlu0 %v2712_v35, %s3023_s26 }
 0x1cd   : > { %v1729_v61 = vpop.permute.xlu1 %1728 }
 0x1ce   : > { %v1538_v62 = vpop.permute.xlu0 %1537  ;;  %1807 = vst.msk [vmem:[#allocation2 + $0x90] sm:$0xff] %vm1788_vm9, %v1729_v61  ;;  %v2715_v61 = vld [vmem:[%s3071_s21 + $0x182] sm:$0xff] }
 0x1cf   : > { %1615 = vst.msk [vmem:[#allocation2 + $0x98] sm:$0xff] %vm1595_vm8, %v1538_v62  ;;  %782 = vrot.lane.b32.xlu1 %v3563_v6, %s3021_s24 }
 0x1d0   : > { %590 = vrot.lane.b32.xlu0 %v2712_v35, %s3019_s22 }
 0x1d1   : > { %v962_v13 = vpop.permute.xlu1 %961  ;;  %v2880_v19 = vpop.f32.mrb[4].mxu0 }
 0x1d2   : > { %v384_v0 = vpop.permute.xlu0 %383  ;;  %1037 = vst.msk [vmem:[#allocation2 + $0xa8] sm:$0xff] %vm1015_vm5, %v962_v13  ;;  %v2058_v2 = vadd.f32 %v2880_v19, %v3668_v58  ;;  %v2052_v3 = vpop.f32.mrb[5].mxu0 }
 0x1d3   : > { %458 = vst.msk [vmem:[#allocation2 + $0xb0] sm:$0xff] %vm435_vm2, %v384_v0  ;;  %1551 = vrot.lane.b32.xlu1 %v2681_v63, %s3025_s6  ;;  %v2053_v6 = vadd.f32 %v3668_v58, %v2052_v3 }
 0x1d4   : > { %1360 = vrot.lane.b32.xlu0 %v3582_v12, %s3024_s27  ;;  %v3815_v4 = vmax.f32 %v2058_v2, 0.0 }
 0x1d5   : > { %v1731_v10 = vpop.permute.xlu1 %1730  ;;  %v1839_v31 = vld [vmem:[#allocation2 + $0x90] sm:$0xff]  ;;  %v3817_v14 = vmax.f32 %v2053_v6, 0.0 }
 0x1d6   : > { %v1153_v11 = vpop.permute.xlu0 %1152  ;;  %1808 = vst.msk [vmem:[#allocation2 + $0x98] sm:$0xff] %vm1788_vm9, %v1731_v10  ;;  %2899 = vmatprep.mubr.msk.f32.mxu0 %vm1865_vm10, %v1839_v31  ;;  %v3827_v15 = vmul.f32 %v3815_v4, %v3815_v4  ;;  %v2716_v6 = vld [vmem:[%s3071_s21 + $0x18a] sm:$0xff]  ;;  %v2653_v31 = vld [vmem:[%s3071_s21 + $0x198] sm:$0xff] }
 0x1d7   : > { %1229 = vst.msk [vmem:[#allocation2 + $0xa0] sm:$0xff] %vm1208_vm6, %v1153_v11  ;;  %975 = vrot.lane.b32.xlu1 %v2681_v63, %s3022_s25  ;;  %v3837_v16 = vmul.f32 %v3817_v14, %v3817_v14  ;;  %v2938_v20 = vpack.c.bf16 %v3815_v4, %v3817_v14 }
 0x1d8   : > { %2229 = vst.msk [vmem:[%s3680_s29 + $0x28] sm:$0xff] %vm2223_vm11, %v3815_v4  ;;  %784 = vrot.lane.b32.xlu0 %v3582_v12, %s3021_s24  ;;  %2228 = vst.msk [vmem:[%s3680_s29 + $0x20] sm:$0xff] %vm2223_vm11, %v3817_v14 }
 0x1d9   : > { %v577_v21 = vpop.permute.xlu1 %576  ;;  %v2970_v12 = vpack.c.bf16 %v3827_v15, %v3837_v16 }
 0x1da   : > { %v386_v22 = vpop.permute.xlu0 %385  ;;  %651 = vst.msk [vmem:[#allocation2 + $0xb0] sm:$0xff] %vm628_vm3, %v577_v21 }
 0x1db   : > { %459 = vst.msk [vmem:[#allocation2 + $0xb8] sm:$0xff] %vm435_vm2, %v386_v22  ;;  %1744 = vrot.lane.b32.xlu1 %v2713_v17, %s3026_s11  ;;  %v2685_v22 = vld [vmem:[%s3071_s21 + $0x199] sm:$0xff] }
 0x1dc   : > { %1553 = vrot.lane.b32.xlu0 %v2682_v18, %s3025_s6 }
 0x1dd   : > { %v1347_v23 = vpop.permute.xlu1 %1346  ;;  %v1840_v24 = vld [vmem:[#allocation2 + $0x98] sm:$0xff] }
 0x1de   : > { %v1155_v40 = vpop.permute.xlu0 %1154  ;;  %1423 = vst.msk [vmem:[#allocation2 + $0xa0] sm:$0xff] %vm1402_vm7, %v1347_v23  ;;  %2900 = vmatmul.mubr.msk.f32.gmra.mrb[18].mxu0 %vm1865_vm10, %v1840_v24  ;;  %v2686_v23 = vld [vmem:[%s3071_s21 + $0x1a1] sm:$0xff] }
 0x1df   : > { %1230 = vst.msk [vmem:[#allocation2 + $0xa8] sm:$0xff] %vm1208_vm6, %v1155_v40  ;;  %977 = vrot.lane.b32.xlu1 %v2682_v18, %s3022_s25 }
 0x1e0   : > { %399 = vrot.lane.b32.xlu0 %v2681_v63, %s3020_s23 }
 0x1e1   : > { %v771_v26 = vpop.permute.xlu1 %770 }
 0x1e2   : > { %v579_v27 = vpop.permute.xlu0 %578  ;;  %845 = vst.msk [vmem:[#allocation2 + $0xb0] sm:$0xff] %vm822_vm4, %v771_v26  ;;  %v2718_v26 = vld [vmem:[%s3071_s21 + $0x1a2] sm:$0xff] }
 0x1e3   : > { %652 = vst.msk [vmem:[#allocation2 + $0xb8] sm:$0xff] %vm628_vm3, %v579_v27  ;;  %1746 = vrot.lane.b32.xlu1 %v2714_v49, %s3026_s11 }
 0x1e4   : > { %1168 = vrot.lane.b32.xlu0 %v2713_v17, %s3023_s26 }
 0x1e5   : > { %v1540_v28 = vpop.permute.xlu1 %1539 }
 0x1e6   : > { %v1349_v29 = vpop.permute.xlu0 %1348  ;;  %1616 = vst.msk [vmem:[#allocation2 + $0xa0] sm:$0xff] %vm1595_vm8, %v1540_v28 }
 0x1e7   : > { %1424 = vst.msk [vmem:[#allocation2 + $0xa8] sm:$0xff] %vm1402_vm7, %v1349_v29  ;;  %592 = vrot.lane.b32.xlu1 %v2713_v17, %s3019_s22  ;;  %v2654_v17 = vld [vmem:[%s3071_s21 + $0x1a0] sm:$0xff] }
 0x1e8   : > { %401 = vrot.lane.b32.xlu0 %v2682_v18, %s3020_s23  ;;  %s2526_s23 = sshll.u32 %s3065_s17, 1 }
 0x1e9   : > { %v964_v32 = vpop.permute.xlu1 %963 }
 0x1ea   : > { %v773_v34 = vpop.permute.xlu0 %772  ;;  %1038 = vst.msk [vmem:[#allocation2 + $0xb0] sm:$0xff] %vm1015_vm5, %v964_v32 }
 0x1eb   : > { %846 = vst.msk [vmem:[#allocation2 + $0xb8] sm:$0xff] %vm822_vm4, %v773_v34  ;;  %1362 = vrot.lane.b32.xlu1 %v2651_v30, %s3024_s27 }
 0x1ec   : > { %1170 = vrot.lane.b32.xlu0 %v2714_v49, %s3023_s26 }
 0x1ed   : > { %v1733_v46 = vpop.permute.xlu1 %1732 }
 0x1ee   : > { %v1542_v37 = vpop.permute.xlu0 %1541  ;;  %1809 = vst.msk [vmem:[#allocation2 + $0xa0] sm:$0xff] %vm1788_vm9, %v1733_v46 }
 0x1ef   : > { %1617 = vst.msk [vmem:[#allocation2 + $0xa8] sm:$0xff] %vm1595_vm8, %v1542_v37  ;;  %786 = vrot.lane.b32.xlu1 %v2651_v30, %s3021_s24 }
 0x1f0   : > { %594 = vrot.lane.b32.xlu0 %v2714_v49, %s3019_s22  ;;  %v2717_v49 = vld [vmem:[%s3071_s21 + $0x19a] sm:$0xff] }
 0x1f1   : > { %v966_v43 = vpop.permute.xlu1 %965  ;;  %v2883_v47 = vpop.f32.mrb[6].mxu0 }
 0x1f2   : > { %v388_v44 = vpop.permute.xlu0 %387  ;;  %1039 = vst.msk [vmem:[#allocation2 + $0xb8] sm:$0xff] %vm1015_vm5, %v966_v43  ;;  %v2068_v48 = vadd.f32 %v2883_v47, %v3668_v58  ;;  %v2062_v1 = vpop.f32.mrb[7].mxu0 }
 0x1f3   : > { %460 = vst.msk [vmem:[#allocation2 + $0xc0] sm:$0xff] %vm435_vm2, %v388_v44  ;;  %1555 = vrot.lane.b32.xlu1 %v2683_v38, %s3025_s6  ;;  %v2063_v50 = vadd.f32 %v3668_v58, %v2062_v1 }
 0x1f4   : > { %1364 = vrot.lane.b32.xlu0 %v2652_v55, %s3024_s27  ;;  %v3880_v51 = vmax.f32 %v2068_v48, 0.0 }
 0x1f5   : > { %v1735_v35 = vpop.permute.xlu1 %1734  ;;  %v1841_v53 = vld [vmem:[#allocation2 + $0xa0] sm:$0xff]  ;;  %v3882_v54 = vmax.f32 %v2063_v50, 0.0 }
 0x1f6   : > { %v1157_v7 = vpop.permute.xlu0 %1156  ;;  %1810 = vst.msk [vmem:[#allocation2 + $0xa8] sm:$0xff] %vm1788_vm9, %v1735_v35  ;;  %2902 = vmatprep.mubr.msk.f32.mxu0 %vm1865_vm10, %v1841_v53  ;;  %v3892_v56 = vmul.f32 %v3880_v51, %v3880_v51 }
 0x1f7   : > { %1231 = vst.msk [vmem:[#allocation2 + $0xb0] sm:$0xff] %vm1208_vm6, %v1157_v7  ;;  %979 = vrot.lane.b32.xlu1 %v2683_v38, %s3022_s25  ;;  %v3901_v57 = vmul.f32 %v3882_v54, %v3882_v54  ;;  %v2942_v62 = vpack.c.bf16 %v3880_v51, %v3882_v54 }
 0x1f8   : > { %2231 = vst.msk [vmem:[%s3680_s29 + $0x38] sm:$0xff] %vm2223_vm11, %v3880_v51  ;;  %788 = vrot.lane.b32.xlu0 %v2652_v55, %s3021_s24  ;;  %2230 = vst.msk [vmem:[%s3680_s29 + $0x30] sm:$0xff] %vm2223_vm11, %v3882_v54 }
 0x1f9   : > { %v581_v63 = vpop.permute.xlu1 %580  ;;  %v2974_v0 = vpack.c.bf16 %v3892_v56, %v3901_v57 }
 0x1fa   : > { %v390_v13 = vpop.permute.xlu0 %389  ;;  %653 = vst.msk [vmem:[#allocation2 + $0xc0] sm:$0xff] %vm628_vm3, %v581_v63 }
 0x1fb   : > { %461 = vst.msk [vmem:[#allocation2 + $0xc8] sm:$0xff] %vm435_vm2, %v390_v13  ;;  %1748 = vrot.lane.b32.xlu1 %v2715_v61, %s3026_s11 }
 0x1fc   : > { %1557 = vrot.lane.b32.xlu0 %v2684_v60, %s3025_s6 }
 0x1fd   : > { %v1351_v19 = vpop.permute.xlu1 %1350  ;;  %v1842_v3 = vld [vmem:[#allocation2 + $0xa8] sm:$0xff] }
 0x1fe   : > { %v1159_v2 = vpop.permute.xlu0 %1158  ;;  %1425 = vst.msk [vmem:[#allocation2 + $0xb0] sm:$0xff] %vm1402_vm7, %v1351_v19  ;;  %2903 = vmatmul.mubr.msk.f32.gmra.mrb[20].mxu0 %vm1865_vm10, %v1842_v3 }
 0x1ff   : > { %1232 = vst.msk [vmem:[#allocation2 + $0xb8] sm:$0xff] %vm1208_vm6, %v1159_v2  ;;  %1172 = vrot.lane.b32.xlu1 %v2715_v61, %s3023_s26 }
 0x200   : > { %981 = vrot.lane.b32.xlu0 %v2684_v60, %s3022_s25 }
 0x201   : > { %v775_v10 = vpop.permute.xlu1 %774 }
 0x202   : > { %v583_v11 = vpop.permute.xlu0 %582  ;;  %847 = vst.msk [vmem:[#allocation2 + $0xc0] sm:$0xff] %vm822_vm4, %v775_v10 }
 0x203   : > { %654 = vst.msk [vmem:[#allocation2 + $0xc8] sm:$0xff] %vm628_vm3, %v583_v11  ;;  %1174 = vrot.lane.b32.xlu1 %v2716_v6, %s3023_s26  ;;  %s209_s26 = scalar_lea.vmem %s4245_s4, %s2526_s23 }
 0x204   : > { %1750 = vrot.lane.b32.xlu0 %v2716_v6, %s3026_s11 }
 0x205   : > { %v1544_v18 = vpop.permute.xlu1 %1543 }
 0x206   : > { %v1353_v21 = vpop.permute.xlu0 %1352  ;;  %1618 = vst.msk [vmem:[#allocation2 + $0xb0] sm:$0xff] %vm1595_vm8, %v1544_v18 }
 0x207   : > { %1426 = vst.msk [vmem:[#allocation2 + $0xb8] sm:$0xff] %vm1402_vm7, %v1353_v21  ;;  %1368 = vrot.lane.b32.xlu1 %v2654_v17, %s3024_s27 }
 0x208   : > { %1366 = vrot.lane.b32.xlu0 %v2653_v31, %s3024_s27 }
 0x209   : > { %v968_v40 = vpop.permute.xlu1 %967 }
 0x20a   : > { %v777_v24 = vpop.permute.xlu0 %776  ;;  %1040 = vst.msk [vmem:[#allocation2 + $0xc0] sm:$0xff] %vm1015_vm5, %v968_v40 }
 0x20b   : > { %848 = vst.msk [vmem:[#allocation2 + $0xc8] sm:$0xff] %vm822_vm4, %v777_v24  ;;  %1561 = vrot.lane.b32.xlu1 %v2686_v23, %s3025_s6 }
 0x20c   : > { %1559 = vrot.lane.b32.xlu0 %v2685_v22, %s3025_s6 }
 0x20d   : > { %v1737_v27 = vpop.permute.xlu1 %1736 }
 0x20e   : > { %v1546_v28 = vpop.permute.xlu0 %1545  ;;  %1811 = vst.msk [vmem:[#allocation2 + $0xb0] sm:$0xff] %vm1788_vm9, %v1737_v27 }
 0x20f   : > { %1619 = vst.msk [vmem:[#allocation2 + $0xb8] sm:$0xff] %vm1595_vm8, %v1546_v28  ;;  %1754 = vrot.lane.b32.xlu1 %v2718_v26, %s3026_s11 }
 0x210   : > { %1752 = vrot.lane.b32.xlu0 %v2717_v49, %s3026_s11 }
 0x211   : > { %v970_v29 = vpop.permute.xlu1 %969  ;;  %v2886_v32 = vpop.f32.mrb[8].mxu0 }
 0x212   : > { %v392_v30 = vpop.permute.xlu0 %391  ;;  %1041 = vst.msk [vmem:[#allocation2 + $0xc8] sm:$0xff] %vm1015_vm5, %v970_v29  ;;  %v2078_v34 = vadd.f32 %v2886_v32, %v3668_v58  ;;  %v2072_v46 = vpop.f32.mrb[9].mxu0 }
 0x213   : > { %462 = vst.msk [vmem:[#allocation2 + $0xd0] sm:$0xff] %vm435_vm2, %v392_v30  ;;  %v2073_v37 = vadd.f32 %v3668_v58, %v2072_v46 }
 0x214   : > { %v3945_v55 = vmax.f32 %v2078_v34, 0.0 }
 0x215   : > { %v1739_v38 = vpop.permute.xlu1 %1738  ;;  %v1843_v44 = vld [vmem:[#allocation2 + $0xb0] sm:$0xff]  ;;  %v3947_v47 = vmax.f32 %v2073_v37, 0.0 }
 0x216   : > { %v1161_v43 = vpop.permute.xlu0 %1160  ;;  %1812 = vst.msk [vmem:[#allocation2 + $0xb8] sm:$0xff] %vm1788_vm9, %v1739_v38  ;;  %2905 = vmatprep.mubr.msk.f32.mxu0 %vm1865_vm10, %v1843_v44  ;;  %v3957_v48 = vmul.f32 %v3945_v55, %v3945_v55 }
 0x217   : > { %1233 = vst.msk [vmem:[#allocation2 + $0xc0] sm:$0xff] %vm1208_vm6, %v1161_v43  ;;  %v3964_v1 = vmul.f32 %v3947_v47, %v3947_v47  ;;  %v2946_v50 = vpack.c.bf16 %v3945_v55, %v3947_v47 }
 0x218   : > { %2233 = vst.msk [vmem:[%s3680_s29 + $0x48] sm:$0xff] %vm2223_vm11, %v3945_v55  ;;  %2232 = vst.msk [vmem:[%s3680_s29 + $0x40] sm:$0xff] %vm2223_vm11, %v3947_v47 }
 0x219   : > { %v585_v35 = vpop.permute.xlu1 %584  ;;  %v2978_v53 = vpack.c.bf16 %v3957_v48, %v3964_v1 }
 0x21a   : > { %v394_v7 = vpop.permute.xlu0 %393  ;;  %655 = vst.msk [vmem:[#allocation2 + $0xd0] sm:$0xff] %vm628_vm3, %v585_v35 }
 0x21b   : > { %463 = vst.msk [vmem:[#allocation2 + $0xd8] sm:$0xff] %vm435_vm2, %v394_v7 }
 0x21d   : > { %v1355_v60 = vpop.permute.xlu1 %1354  ;;  %v1844_v63 = vld [vmem:[#allocation2 + $0xb8] sm:$0xff] }
 0x21e   : > { %v1163_v61 = vpop.permute.xlu0 %1162  ;;  %1427 = vst.msk [vmem:[#allocation2 + $0xc0] sm:$0xff] %vm1402_vm7, %v1355_v60  ;;  %2906 = vmatmul.mubr.msk.f32.gmra.mrb[22].mxu0 %vm1865_vm10, %v1844_v63 }
 0x21f   : > { %1234 = vst.msk [vmem:[#allocation2 + $0xc8] sm:$0xff] %vm1208_vm6, %v1163_v61 }
 0x221   : > { %v779_v13 = vpop.permute.xlu1 %778 }
 0x222   : > { %v587_v19 = vpop.permute.xlu0 %586  ;;  %849 = vst.msk [vmem:[#allocation2 + $0xd0] sm:$0xff] %vm822_vm4, %v779_v13 }
 0x223   : > { %656 = vst.msk [vmem:[#allocation2 + $0xd8] sm:$0xff] %vm628_vm3, %v587_v19 }
 0x225   : > { %v1548_v2 = vpop.permute.xlu1 %1547 }
 0x226   : > { %v1357_v3 = vpop.permute.xlu0 %1356  ;;  %1620 = vst.msk [vmem:[#allocation2 + $0xc0] sm:$0xff] %vm1595_vm8, %v1548_v2 }
 0x227   : > { %1428 = vst.msk [vmem:[#allocation2 + $0xc8] sm:$0xff] %vm1402_vm7, %v1357_v3 }
 0x229   : > { %v972_v6 = vpop.permute.xlu1 %971 }
 0x22a   : > { %v781_v10 = vpop.permute.xlu0 %780  ;;  %1042 = vst.msk [vmem:[#allocation2 + $0xd0] sm:$0xff] %vm1015_vm5, %v972_v6 }
 0x22b   : > { %850 = vst.msk [vmem:[#allocation2 + $0xd8] sm:$0xff] %vm822_vm4, %v781_v10 }
 0x22d   : > { %v1741_v11 = vpop.permute.xlu1 %1740 }
 0x22e   : > { %v1550_v31 = vpop.permute.xlu0 %1549  ;;  %1813 = vst.msk [vmem:[#allocation2 + $0xc0] sm:$0xff] %vm1788_vm9, %v1741_v11 }
 0x22f   : > { %1621 = vst.msk [vmem:[#allocation2 + $0xc8] sm:$0xff] %vm1595_vm8, %v1550_v31 }
 0x231   : > { %v974_v17 = vpop.permute.xlu1 %973  ;;  %v2889_v21 = vpop.f32.mrb[10].mxu0 }
 0x232   : > { %v396_v18 = vpop.permute.xlu0 %395  ;;  %1043 = vst.msk [vmem:[#allocation2 + $0xd8] sm:$0xff] %vm1015_vm5, %v974_v17  ;;  %v2088_v22 = vadd.f32 %v2889_v21, %v3668_v58  ;;  %v2082_v23 = vpop.f32.mrb[11].mxu0 }
 0x233   : > { %464 = vst.msk [vmem:[#allocation2 + $0xe0] sm:$0xff] %vm435_vm2, %v396_v18  ;;  %v2083_v40 = vadd.f32 %v3668_v58, %v2082_v23 }
 0x234   : > { %v3987_v24 = vmax.f32 %v2088_v22, 0.0 }
 0x235   : > { %v1743_v49 = vpop.permute.xlu1 %1742  ;;  %v1845_v27 = vld [vmem:[#allocation2 + $0xc0] sm:$0xff]  ;;  %v3989_v28 = vmax.f32 %v2083_v40, 0.0 }
 0x236   : > { %v1165_v26 = vpop.permute.xlu0 %1164  ;;  %1814 = vst.msk [vmem:[#allocation2 + $0xc8] sm:$0xff] %vm1788_vm9, %v1743_v49  ;;  %2908 = vmatprep.mubr.msk.f32.mxu0 %vm1865_vm10, %v1845_v27  ;;  %v3999_v29 = vmul.f32 %v3987_v24, %v3987_v24 }
 0x237   : > { %1235 = vst.msk [vmem:[#allocation2 + $0xd0] sm:$0xff] %vm1208_vm6, %v1165_v26  ;;  %v4006_v30 = vmul.f32 %v3989_v28, %v3989_v28  ;;  %v2950_v32 = vpack.c.bf16 %v3987_v24, %v3989_v28 }
 0x238   : > { %2235 = vst.msk [vmem:[%s3680_s29 + $0x58] sm:$0xff] %vm2223_vm11, %v3987_v24  ;;  %2234 = vst.msk [vmem:[%s3680_s29 + $0x50] sm:$0xff] %vm2223_vm11, %v3989_v28 }
 0x239   : > { %v589_v34 = vpop.permute.xlu1 %588  ;;  %v2982_v37 = vpack.c.bf16 %v3999_v29, %v4006_v30 }
 0x23a   : > { %v398_v46 = vpop.permute.xlu0 %397  ;;  %657 = vst.msk [vmem:[#allocation2 + $0xe0] sm:$0xff] %vm628_vm3, %v589_v34 }
 0x23b   : > { %465 = vst.msk [vmem:[#allocation2 + $0xe8] sm:$0xff] %vm435_vm2, %v398_v46 }
 0x23d   : > { %v1359_v38 = vpop.permute.xlu1 %1358  ;;  %v1846_v44 = vld [vmem:[#allocation2 + $0xc8] sm:$0xff] }
 0x23e   : > { %v1167_v43 = vpop.permute.xlu0 %1166  ;;  %1429 = vst.msk [vmem:[#allocation2 + $0xd0] sm:$0xff] %vm1402_vm7, %v1359_v38  ;;  %2909 = vmatmul.mubr.msk.f32.gmra.mrb[24].mxu0 %vm1865_vm10, %v1846_v44 }
 0x23f   : > { %1236 = vst.msk [vmem:[#allocation2 + $0xd8] sm:$0xff] %vm1208_vm6, %v1167_v43 }
 0x241   : > { %v783_v35 = vpop.permute.xlu1 %782 }
 0x242   : > { %v591_v7 = vpop.permute.xlu0 %590  ;;  %851 = vst.msk [vmem:[#allocation2 + $0xe0] sm:$0xff] %vm822_vm4, %v783_v35 }
 0x243   : > { %658 = vst.msk [vmem:[#allocation2 + $0xe8] sm:$0xff] %vm628_vm3, %v591_v7 }
 0x245   : > { %v1552_v60 = vpop.permute.xlu1 %1551 }
 0x246   : > { %v1361_v61 = vpop.permute.xlu0 %1360  ;;  %1622 = vst.msk [vmem:[#allocation2 + $0xd0] sm:$0xff] %vm1595_vm8, %v1552_v60 }
 0x247   : > { %1430 = vst.msk [vmem:[#allocation2 + $0xd8] sm:$0xff] %vm1402_vm7, %v1361_v61 }
 0x249   : > { %v976_v63 = vpop.permute.xlu1 %975 }
 0x24a   : > { %v785_v13 = vpop.permute.xlu0 %784  ;;  %1044 = vst.msk [vmem:[#allocation2 + $0xe0] sm:$0xff] %vm1015_vm5, %v976_v63 }
 0x24b   : > { %852 = vst.msk [vmem:[#allocation2 + $0xe8] sm:$0xff] %vm822_vm4, %v785_v13 }
 0x24d   : > { %v1745_v19 = vpop.permute.xlu1 %1744 }
 0x24e   : > { %v1554_v2 = vpop.permute.xlu0 %1553  ;;  %1815 = vst.msk [vmem:[#allocation2 + $0xd0] sm:$0xff] %vm1788_vm9, %v1745_v19 }
 0x24f   : > { %1623 = vst.msk [vmem:[#allocation2 + $0xd8] sm:$0xff] %vm1595_vm8, %v1554_v2 }
 0x251   : > { %v978_v3 = vpop.permute.xlu1 %977  ;;  %v2892_v10 = vpop.f32.mrb[12].mxu0 }
 0x252   : > { %v400_v6 = vpop.permute.xlu0 %399  ;;  %1045 = vst.msk [vmem:[#allocation2 + $0xe8] sm:$0xff] %vm1015_vm5, %v978_v3  ;;  %v2098_v11 = vadd.f32 %v2892_v10, %v3668_v58  ;;  %v2092_v31 = vpop.f32.mrb[13].mxu0 }
 0x253   : > { %466 = vst.msk [vmem:[#allocation2 + $0xf0] sm:$0xff] %vm435_vm2, %v400_v6  ;;  %v2093_v17 = vadd.f32 %v3668_v58, %v2092_v31 }
 0x254   : > { %v4029_v18 = vmax.f32 %v2098_v11, 0.0 }
 0x255   : > { %v1747_v21 = vpop.permute.xlu1 %1746  ;;  %v1847_v23 = vld [vmem:[#allocation2 + $0xd0] sm:$0xff]  ;;  %v4031_v40 = vmax.f32 %v2093_v17, 0.0 }
 0x256   : > { %v1169_v22 = vpop.permute.xlu0 %1168  ;;  %1816 = vst.msk [vmem:[#allocation2 + $0xd8] sm:$0xff] %vm1788_vm9, %v1747_v21  ;;  %2911 = vmatprep.mubr.msk.f32.mxu0 %vm1865_vm10, %v1847_v23  ;;  %v4041_v49 = vmul.f32 %v4029_v18, %v4029_v18 }
 0x257   : > { %1237 = vst.msk [vmem:[#allocation2 + $0xe0] sm:$0xff] %vm1208_vm6, %v1169_v22  ;;  %v4048_v26 = vmul.f32 %v4031_v40, %v4031_v40  ;;  %v2954_v27 = vpack.c.bf16 %v4029_v18, %v4031_v40 }
 0x258   : > { %2237 = vst.msk [vmem:[%s3680_s29 + $0x68] sm:$0xff] %vm2223_vm11, %v4029_v18  ;;  %2236 = vst.msk [vmem:[%s3680_s29 + $0x60] sm:$0xff] %vm2223_vm11, %v4031_v40 }
 0x259   : > { %v593_v46 = vpop.permute.xlu1 %592  ;;  %v2986_v38 = vpack.c.bf16 %v4041_v49, %v4048_v26 }
 0x25a   : > { %v402_v34 = vpop.permute.xlu0 %401  ;;  %659 = vst.msk [vmem:[#allocation2 + $0xf0] sm:$0xff] %vm628_vm3, %v593_v46 }
 0x25b   : > { %467 = vst.msk [vmem:[#allocation2 + $0xf8] sm:$0xff] %vm435_vm2, %v402_v34 }
 0x25d   : > { %v1363_v44 = vpop.permute.xlu1 %1362  ;;  %v1848_v35 = vld [vmem:[#allocation2 + $0xd8] sm:$0xff] }
 0x25e   : > { %v1171_v43 = vpop.permute.xlu0 %1170  ;;  %1431 = vst.msk [vmem:[#allocation2 + $0xe0] sm:$0xff] %vm1402_vm7, %v1363_v44  ;;  %2912 = vmatmul.mubr.msk.f32.gmra.mrb[26].mxu0 %vm1865_vm10, %v1848_v35 }
 0x25f   : > { %1238 = vst.msk [vmem:[#allocation2 + $0xe8] sm:$0xff] %vm1208_vm6, %v1171_v43 }
 0x261   : > { %v787_v60 = vpop.permute.xlu1 %786 }
 0x262   : > { %v595_v7 = vpop.permute.xlu0 %594  ;;  %853 = vst.msk [vmem:[#allocation2 + $0xf0] sm:$0xff] %vm822_vm4, %v787_v60 }
 0x263   : > { %660 = vst.msk [vmem:[#allocation2 + $0xf8] sm:$0xff] %vm628_vm3, %v595_v7 }
 0x265   : > { %v1556_v63 = vpop.permute.xlu1 %1555 }
 0x266   : > { %v1365_v61 = vpop.permute.xlu0 %1364  ;;  %1624 = vst.msk [vmem:[#allocation2 + $0xe0] sm:$0xff] %vm1595_vm8, %v1556_v63 }
 0x267   : > { %1432 = vst.msk [vmem:[#allocation2 + $0xe8] sm:$0xff] %vm1402_vm7, %v1365_v61 }
 0x269   : > { %v980_v19 = vpop.permute.xlu1 %979 }
 0x26a   : > { %v789_v13 = vpop.permute.xlu0 %788  ;;  %1046 = vst.msk [vmem:[#allocation2 + $0xf0] sm:$0xff] %vm1015_vm5, %v980_v19 }
 0x26b   : > { %854 = vst.msk [vmem:[#allocation2 + $0xf8] sm:$0xff] %vm822_vm4, %v789_v13 }
 0x26d   : > { %v1749_v3 = vpop.permute.xlu1 %1748 }
 0x26e   : > { %v1558_v2 = vpop.permute.xlu0 %1557  ;;  %1817 = vst.msk [vmem:[#allocation2 + $0xe0] sm:$0xff] %vm1788_vm9, %v1749_v3 }
 0x26f   : > { %1625 = vst.msk [vmem:[#allocation2 + $0xe8] sm:$0xff] %vm1595_vm8, %v1558_v2 }
 0x271   : > { %v2895_v10 = vpop.f32.mrb[14].mxu0  ;;  %v1173_v31 = vpop.permute.xlu1 %1172 }
 0x272   : > { %v982_v6 = vpop.permute.xlu0 %981  ;;  %v2108_v11 = vadd.f32 %v2895_v10, %v3668_v58  ;;  %v2102_v17 = vpop.f32.mrb[15].mxu0  ;;  %1239 = vst.msk [vmem:[#allocation2 + $0xf0] sm:$0xff] %vm1208_vm6, %v1173_v31 }
 0x273   : > { %1047 = vst.msk [vmem:[#allocation2 + $0xf8] sm:$0xff] %vm1015_vm5, %v982_v6  ;;  %v2103_v21 = vadd.f32 %v3668_v58, %v2102_v17 }
 0x274   : > { %v4071_v22 = vmax.f32 %v2108_v11, 0.0 }
 0x275   : > { %v4073_v23 = vmax.f32 %v2103_v21, 0.0  ;;  %v1849_v46 = vld [vmem:[#allocation2 + $0xe0] sm:$0xff]  ;;  %v1175_v44 = vpop.permute.xlu1 %1174 }
 0x276   : > { %v1751_v34 = vpop.permute.xlu0 %1750  ;;  %2239 = vst.msk [vmem:[%s3680_s29 + $0x78] sm:$0xff] %vm2223_vm11, %v4071_v22  ;;  %v4080_v43 = vmul.f32 %v4071_v22, %v4071_v22  ;;  %2914 = vmatprep.mubr.msk.f32.mxu0 %vm1865_vm10, %v1849_v46 }
 0x277   : > { %1818 = vst.msk [vmem:[#allocation2 + $0xe8] sm:$0xff] %vm1788_vm9, %v1751_v34  ;;  %v4089_v35 = vmul.f32 %v4073_v23, %v4073_v23  ;;  %v2958_v7 = vpack.c.bf16 %v4071_v22, %v4073_v23 }
 0x278   : > { %2238 = vst.msk [vmem:[%s3680_s29 + $0x70] sm:$0xff] %vm2223_vm11, %v4073_v23 }
 0x279   : > { %1240 = vst.msk [vmem:[#allocation2 + $0xf8] sm:$0xff] %vm1208_vm6, %v1175_v44  ;;  %v2990_v61 = vpack.c.bf16 %v4080_v43, %v4089_v35  ;;  %v1369_v63 = vpop.permute.xlu1 %1368 }
 0x27a   : > { %v1367_v60 = vpop.permute.xlu0 %1366  ;;  %1434 = vst.msk [vmem:[#allocation2 + $0xf8] sm:$0xff] %vm1402_vm7, %v1369_v63 }
 0x27b   : > { %1433 = vst.msk [vmem:[#allocation2 + $0xf0] sm:$0xff] %vm1402_vm7, %v1367_v60 }
 0x27d   : > { %v1562_v2 = vpop.permute.xlu1 %1561 }
 0x27e   : > { %v1560_v13 = vpop.permute.xlu0 %1559  ;;  %v1850_v19 = vld [vmem:[#allocation2 + $0xe8] sm:$0xff]  ;;  %1627 = vst.msk [vmem:[#allocation2 + $0xf8] sm:$0xff] %vm1595_vm8, %v1562_v2 }
 0x27f   : > { %1626 = vst.msk [vmem:[#allocation2 + $0xf0] sm:$0xff] %vm1595_vm8, %v1560_v13  ;;  %2915 = vmatmul.mubr.msk.f32.gmra.mrb[28].mxu0 %vm1865_vm10, %v1850_v19 }
 0x281   : > { %v1755_v6 = vpop.permute.xlu1 %1754 }
 0x282   : > { %v1753_v3 = vpop.permute.xlu0 %1752  ;;  %1820 = vst.msk [vmem:[#allocation2 + $0xf8] sm:$0xff] %vm1788_vm9, %v1755_v6 }
 0x283   : > { %1819 = vst.msk [vmem:[#allocation2 + $0xf0] sm:$0xff] %vm1788_vm9, %v1753_v3 }
 0x289   : > { %v1852_v11 = vld [vmem:[#allocation2 + $0xf8] sm:$0xff] }
 0x28a   : > { %v1851_v10 = vld [vmem:[#allocation2 + $0xf0] sm:$0xff] }
 0x28b   : > { %2917 = vmatprep.mubr.msk.f32.mxu0 %vm1865_vm10, %v1851_v10 }
 0x28c   : > { %2918 = vmatmul.mubr.msk.f32.gmra.mrb[30].mxu0 %vm1865_vm10, %v1852_v11 }
 0x291   : > { %v2898_v31 = vpop.f32.mrb[16].mxu0 }
 0x292   : > { %v2118_v17 = vadd.f32 %v2898_v31, %v3668_v58  ;;  %v2112_v21 = vpop.f32.mrb[17].mxu0 }
 0x293   : > { %v2113_v34 = vadd.f32 %v3668_v58, %v2112_v21 }
 0x294   : > { %v2208_v46 = vmax.f32 %v2118_v17, 0.0 }
 0x295   : > { %v2207_v44 = vmax.f32 %v2113_v34, 0.0 }
 0x296   : > { %2241 = vst.msk [vmem:[%s3680_s29 + $0x88] sm:$0xff] %vm2223_vm11, %v2208_v46  ;;  %v4109_v60 = vmul.f32 %v2208_v46, %v2208_v46 }
 0x297   : > { %2240 = vst.msk [vmem:[%s3680_s29 + $0x80] sm:$0xff] %vm2223_vm11, %v2207_v44  ;;  %v4113_v63 = vmul.f32 %v2207_v44, %v2207_v44  ;;  %v2928_v13 = vpack.c.bf16 %v2208_v46, %v2207_v44 }
 0x299   : > { %2929 = vmatprep.subr.bf16.mxu1 %v2928_v13  ;;  %v2960_v19 = vpack.c.bf16 %v4109_v60, %v4113_v63 }
 0x29a   : > { %2931 = vmatpush3.bf16.msra.mxu1 %v2930_v41 }
 0x2b1   : > { %v2901_v2 = vpop.f32.mrb[18].mxu0 }
 0x2b2   : > { %v2128_v3 = vadd.f32 %v2901_v2, %v3668_v58  ;;  %v2122_v6 = vpop.f32.mrb[19].mxu0 }
 0x2b3   : > { %v2123_v10 = vadd.f32 %v3668_v58, %v2122_v6 }
 0x2b4   : > { %v2210_v11 = vmax.f32 %v2128_v3, 0.0 }
 0x2b5   : > { %v2209_v31 = vmax.f32 %v2123_v10, 0.0  ;;  %v3010_v10 = vld [vmem:[%s4243_s2] ss:$0 sm:$0xff] }
 0x2b6   : > { %2243 = vst.msk [vmem:[%s3680_s29 + $0x98] sm:$0xff] %vm2223_vm11, %v2210_v11  ;;  %v4124_v17 = vmul.f32 %v2210_v11, %v2210_v11 }
 0x2b7   : > { %2242 = vst.msk [vmem:[%s3680_s29 + $0x90] sm:$0xff] %vm2223_vm11, %v2209_v31  ;;  %v4128_v21 = vmul.f32 %v2209_v31, %v2209_v31  ;;  %v2932_v39 = vpack.c.bf16 %v2210_v11, %v2209_v31 }
 0x2b9   : > { %2933 = vmatprep.subr.bf16.mxu1 %v2932_v39  ;;  %v2964_v5 = vpack.c.bf16 %v4124_v17, %v4128_v21 }
 0x2ba   : > { %2935 = vmatpush3.bf16.msra.mxu1 %v2934_v45 }
 0x2d1   : > { %v2904_v41 = vpop.f32.mrb[20].mxu0 }
 0x2d2   : > { %v2138_v34 = vadd.f32 %v2904_v41, %v3668_v58  ;;  %v2132_v46 = vpop.f32.mrb[21].mxu0 }
 0x2d3   : > { %v2133_v44 = vadd.f32 %v3668_v58, %v2132_v46  ;;  %v3027_v58 = vmov 1.0  }
 0x2d4   : > { %v2212_v13 = vmax.f32 %v2138_v34, 0.0  ;;  %2320 = vmatprep.mubr.f32.mxu1 %v3027_v58 }
 0x2d5   : > { %v2211_v2 = vmax.f32 %v2133_v44, 0.0 }
 0x2d6   : > { %2245 = vst.msk [vmem:[%s3680_s29 + $0xa8] sm:$0xff] %vm2223_vm11, %v2212_v13  ;;  %v4139_v3 = vmul.f32 %v2212_v13, %v2212_v13 }
 0x2d7   : > { %2244 = vst.msk [vmem:[%s3680_s29 + $0xa0] sm:$0xff] %vm2223_vm11, %v2211_v2  ;;  %v4143_v6 = vmul.f32 %v2211_v2, %v2211_v2  ;;  %v2936_v36 = vpack.c.bf16 %v2212_v13, %v2211_v2 }
 0x2d9   : > { %2937 = vmatprep.subr.bf16.mxu1 %v2936_v36  ;;  %v2968_v33 = vpack.c.bf16 %v4139_v3, %v4143_v6 }
 0x2da   : > { %2939 = vmatpush3.bf16.msra.mxu1 %v2938_v20 }
 0x2f1   : > { %v2907_v45 = vpop.f32.mrb[22].mxu0 }
 0x2f2   : > { %v2148_v11 = vadd.f32 %v3010_v10, %v2907_v45  ;;  %v2142_v31 = vpop.f32.mrb[23].mxu0 }
 0x2f3   : > { %v2143_v39 = vadd.f32 %v3010_v10, %v2142_v31 }
 0x2f4   : > { %v2214_v41 = vmax.f32 %v2148_v11, 0.0 }
 0x2f5   : > { %v2213_v34 = vmax.f32 %v2143_v39, 0.0 }
 0x2f6   : > { %2247 = vst.msk [vmem:[%s3680_s29 + $0xb8] sm:$0xff] %vm2223_vm11, %v2214_v41  ;;  %v4156_v46 = vmul.f32 %v2214_v41, %v2214_v41 }
 0x2f7   : > { %2246 = vst.msk [vmem:[%s3680_s29 + $0xb0] sm:$0xff] %vm2223_vm11, %v2213_v34  ;;  %v4160_v4 = vmul.f32 %v2213_v34, %v2213_v34  ;;  %v2940_v14 = vpack.c.bf16 %v2214_v41, %v2213_v34 }
 0x2f9   : > { %2941 = vmatprep.subr.bf16.mxu1 %v2940_v14  ;;  %v2972_v20 = vpack.c.bf16 %v4156_v46, %v4160_v4 }
 0x2fa   : > { %2943 = vmatpush3.bf16.msra.mxu1 %v2942_v62 }
 0x311   : > { %v2910_v44 = vpop.f32.mrb[24].mxu0 }
 0x312   : > { %v2158_v13 = vadd.f32 %v3010_v10, %v2910_v44  ;;  %v2152_v2 = vpop.f32.mrb[25].mxu0 }
 0x313   : > { %v2153_v36 = vadd.f32 %v3010_v10, %v2152_v2 }
 0x314   : > { %v2216_v45 = vmax.f32 %v2158_v13, 0.0 }
 0x315   : > { %v2215_v11 = vmax.f32 %v2153_v36, 0.0 }
 0x316   : > { %2249 = vst.msk [vmem:[%s3680_s29 + $0xc8] sm:$0xff] %vm2223_vm11, %v2216_v45  ;;  %v2353_v31 = vmul.f32 %v2216_v45, %v2216_v45 }
 0x317   : > { %2248 = vst.msk [vmem:[%s3680_s29 + $0xc0] sm:$0xff] %vm2223_vm11, %v2215_v11  ;;  %v2352_v39 = vmul.f32 %v2215_v11, %v2215_v11  ;;  %v2944_v41 = vpack.c.bf16 %v2216_v45, %v2215_v11 }
 0x319   : > { %2945 = vmatprep.subr.bf16.mxu1 %v2944_v41  ;;  %v2976_v34 = vpack.c.bf16 %v2353_v31, %v2352_v39 }
 0x31a   : > { %2947 = vmatpush3.bf16.msra.mxu1 %v2946_v50 }
 0x331   : > { %v2913_v51 = vpop.f32.mrb[26].mxu0 }
 0x332   : > { %v2168_v54 = vadd.f32 %v3010_v10, %v2913_v51  ;;  %v2162_v62 = vpop.f32.mrb[27].mxu0 }
 0x333   : > { %v2163_v14 = vadd.f32 %v3010_v10, %v2162_v62 }
 0x334   : > { %v2218_v44 = vmax.f32 %v2168_v54, 0.0 }
 0x335   : > { %v2217_v13 = vmax.f32 %v2163_v14, 0.0 }
 0x336   : > { %2251 = vst.msk [vmem:[%s3680_s29 + $0xd8] sm:$0xff] %vm2223_vm11, %v2218_v44  ;;  %v2355_v2 = vmul.f32 %v2218_v44, %v2218_v44 }
 0x337   : > { %2250 = vst.msk [vmem:[%s3680_s29 + $0xd0] sm:$0xff] %vm2223_vm11, %v2217_v13  ;;  %v2354_v36 = vmul.f32 %v2217_v13, %v2217_v13  ;;  %v2948_v45 = vpack.c.bf16 %v2218_v44, %v2217_v13 }
 0x339   : > { %2949 = vmatprep.subr.bf16.mxu1 %v2948_v45  ;;  %v2980_v11 = vpack.c.bf16 %v2355_v2, %v2354_v36 }
 0x33a   : > { %2951 = vmatpush3.bf16.msra.mxu1 %v2950_v32 }
 0x352   : > { %v2916_v55 = vpop.f32.mrb[28].mxu0 }
 0x353   : > { %v2178_v47 = vadd.f32 %v3010_v10, %v2916_v55  ;;  %v2172_v50 = vpop.f32.mrb[29].mxu0 }
 0x354   : > { %v2173_v31 = vadd.f32 %v3010_v10, %v2172_v50 }
 0x355   : > { %v2220_v39 = vmax.f32 %v2178_v47, 0.0 }
 0x356   : > { %v2219_v41 = vmax.f32 %v2173_v31, 0.0 }
 0x357   : > { %2253 = vst.msk [vmem:[%s3680_s29 + $0xe8] sm:$0xff] %vm2223_vm11, %v2220_v39  ;;  %v2357_v51 = vmul.f32 %v2220_v39, %v2220_v39 }
 0x358   : > { %2252 = vst.msk [vmem:[%s3680_s29 + $0xe0] sm:$0xff] %vm2223_vm11, %v2219_v41  ;;  %v2356_v54 = vmul.f32 %v2219_v41, %v2219_v41  ;;  %v2952_v62 = vpack.c.bf16 %v2220_v39, %v2219_v41 }
 0x35a   : > { %2953 = vmatprep.subr.bf16.mxu1 %v2952_v62  ;;  %v2984_v14 = vpack.c.bf16 %v2357_v51, %v2356_v54 }
 0x35b   : > { %2955 = vmatpush3.bf16.msra.mxu1 %v2954_v27 }
 0x35f   : > { %v2919_v24 = vpop.f32.mrb[30].mxu0 }
 0x360   : > { %v2188_v28 = vadd.f32 %v3010_v10, %v2919_v24  ;;  %v2182_v32 = vpop.f32.mrb[31].mxu0 }
 0x361   : > { %v2183_v44 = vadd.f32 %v3010_v10, %v2182_v32 }
 0x362   : > { %v2222_v13 = vmax.f32 %v2188_v28, 0.0 }
 0x363   : > { %v2221_v2 = vmax.f32 %v2183_v44, 0.0 }
 0x364   : > { %2255 = vst.msk [vmem:[%s3680_s29 + $0xf8] sm:$0xff] %vm2223_vm11, %v2222_v13  ;;  %v2359_v36 = vmul.f32 %v2222_v13, %v2222_v13 }
 0x365   : > { %2254 = vst.msk [vmem:[%s3680_s29 + $0xf0] sm:$0xff] %vm2223_vm11, %v2221_v2  ;;  %v2358_v45 = vmul.f32 %v2221_v2, %v2221_v2  ;;  %v2956_v55 = vpack.c.bf16 %v2222_v13, %v2221_v2 }
 0x367   : > { %2957 = vmatprep.subr.bf16.mxu1 %v2956_v55  ;;  %v2988_v47 = vpack.c.bf16 %v2359_v36, %v2358_v45 }
 0x368   : > { %2959 = vmatpush3.bf16.msra.mxu1 %v2958_v7 }
 0x369   : > { %2961 = vmatprep.subr.bf16.mxu1 %v2960_v19 }
 0x36b   : > { %2321 = vmatmul.mubr.f32.vlgmr.msra.gmra.mrb[0].mxu1 %v3027_v58 }
 0x36c   : > { %2963 = vmatpush3.bf16.msra.mxu1 %v2962_v25  ;;  %2424 = vmatprep.mubr.f32.mxu1 %v3027_v58 }
 0x36d   : > { %2965 = vmatprep.subr.bf16.mxu1 %v2964_v5 }
 0x370   : > { %2967 = vmatpush3.bf16.msra.mxu1 %v2966_v52 }
 0x371   : > { %2969 = vmatprep.subr.bf16.mxu1 %v2968_v33 }
 0x374   : > { %2971 = vmatpush3.bf16.msra.mxu1 %v2970_v12 }
 0x375   : > { %2973 = vmatprep.subr.bf16.mxu1 %v2972_v20 }
 0x378   : > { %2975 = vmatpush3.bf16.msra.mxu1 %v2974_v0 }
 0x379   : > { %2977 = vmatprep.subr.bf16.mxu1 %v2976_v34 }
 0x37c   : > { %2979 = vmatpush3.bf16.msra.mxu1 %v2978_v53 }
 0x37d   : > { %2981 = vmatprep.subr.bf16.mxu1 %v2980_v11 }
 0x380   : > { %2983 = vmatpush3.bf16.msra.mxu1 %v2982_v37 }
 0x381   : > { %2985 = vmatprep.subr.bf16.mxu1 %v2984_v14 }
 0x384   : > { %2987 = vmatpush3.bf16.msra.mxu1 %v2986_v38 }
 0x385   : > { %2989 = vmatprep.subr.bf16.mxu1 %v2988_v47 }
 0x388   : > { %2991 = vmatpush3.bf16.msra.mxu1 %v2990_v61 }
 0x38b   : > { %2425 = vmatmul.mubr.f32.vlgmr.msra.gmra.mrb[2].mxu1 %v3027_v58 }
 0x43e   : > { %v2824_v8 = vpop.f32.mrb[0].mxu1 }
 0x43f   : > { %v2825_v9 = vpop.f32.mrb[1].mxu1 }
 0x440   : > { %v2826_v25 = vadd.f32 %v2825_v9, %v2824_v8 }
 0x442   : > { %2327 = vst.msk [vmem:[%s209_s26] sm:$0x1] %vm2326_vm12, %v2826_v25 }
 0x45e   : > { %v2859_v59 = vpop.f32.mrb[2].mxu1 }
 0x45f   : > { %v2860_v42 = vpop.f32.mrb[3].mxu1 }
 0x460   : > { %v2861_v52 = vadd.f32 %v2860_v42, %v2859_v59 }
 0x462   : > { %2430 = vst.msk [vmem:[%s209_s26 + $0x1] sm:$0x1] %vm2326_vm12, %v2861_v52 }
 0x463 PF: > { %s15_s15 = sadd.s32 1, %s3017_s15  }
 0x464   : > { %p12_p5 = scmp.ge.s32.totalorder %s15_s15, 4  }
 0x466   :  { %14 = sbr.rel (!%p12_p5) target bundleno = 1 (0x1), region = 76 }

// kernel: conv_block.6
= control target key start
LH: loop header
LB: loop body
LE: loop exit
PB: predicated region body
PF: predicated region fallthrough
CT: control target
= control target key end

     0   :  { %s3071_s15 = smov 0   ;;  %s4276_s0 = inlined_call_operand.vmem [shape: f32[2,18,18,8], index: 0, kind: input, shape index: {}]   ;;  %s4277_s1 = inlined_call_operand.vmem [shape: f32[72,8], index: 1, kind: input, shape index: {}]   ;;  %s4278_s2 = inlined_call_operand.vmem [shape: f32[1,8], index: 2, kind: input, shape index: {}]   ;;  %s4279_s3 = inlined_call_operand.vmem [shape: f32[512,8], index: 3, kind: output, shape index: {0}]   ;;  %s4280_s4 = inlined_call_operand.vmem [shape: f32[2,2,8], index: 4, kind: output, shape index: {1}]  }
   0x1 LB: > { %s3077_s16 = sadd.s32 4294967295, %s3035_s15   ;;  %p2521_p0 = scmp.ge.s32.totalorder %s3035_s15, 1  ;;  %s3035_s15 = sphi %s3071_s15, %s15_s15  }
   0x2   : > { %p165_p1 = scmp.lt.s32.totalorder %s3035_s15, 3 }
   0x4   : > { %p166_p2 = pnand %p2521_p0, %p165_p1 }
   0x5   : > { %p195_p3 = scmp.lt.s32.totalorder (!%p166_p2), %s3077_s16, 1  ;;  %s3037_s22 = smov (!%p166_p2), 16   ;;  %vm242_vm0 = vcmask (!%p166_p2), 64512   ;;  %v1853_v20 = vld [vmem:[%s4277_s1] sm:$0xff] (!%p166_p2)  ;;  %v1854_v21 = vld [vmem:[%s4277_s1 + $0x8] sm:$0xff] (!%p166_p2)  ;;  %v1855_v24 = vld [vmem:[%s4277_s1 + $0x10] sm:$0xff] (!%p166_p2) }
   0x6   : > { %169 = sbr.rel (%p166_p2) target bundleno = 1123 (0x463), region = 32  ;;  %s3038_s23 = smov (!%p166_p2), 8   ;;  %v2930_v23 = vpack.c.bf16 (!%p166_p2), %v1854_v21, %v1853_v20  ;;  %v1856_v25 = vld [vmem:[%s4277_s1 + $0x18] sm:$0xff] (!%p166_p2)  ;;  %v1857_v28 = vld [vmem:[%s4277_s1 + $0x20] sm:$0xff] (!%p166_p2)  ;;  %v1858_v29 = vld [vmem:[%s4277_s1 + $0x28] sm:$0xff] (!%p166_p2)  ;;  %vm435_vm1 = vcmask (!%p166_p2), 130112  }
   0x7   : > { %s3039_s24 = smov (!%p166_p2), 24   ;;  %s3040_s25 = smov (!%p166_p2), 32   ;;  %v2934_v26 = vpack.c.bf16 (!%p166_p2), %v1856_v25, %v1855_v24  ;;  %v2938_v31 = vpack.c.bf16 (!%p166_p2), %v1858_v29, %v1857_v28  ;;  %v1859_v32 = vld [vmem:[%s4277_s1 + $0x30] sm:$0xff] (!%p166_p2)  ;;  %v1860_v33 = vld [vmem:[%s4277_s1 + $0x38] sm:$0xff] (!%p166_p2)  ;;  %v1861_v37 = vld [vmem:[%s4277_s1 + $0x40] sm:$0xff] (!%p166_p2)  ;;  %vm628_vm2 = vcmask (!%p166_p2), 195712  }
   0x8   : > { %s3041_s26 = smov (!%p166_p2), 40   ;;  %s3042_s5 = smov (!%p166_p2), 48   ;;  %2931 = vmatprep.subr.bf16.mxu0 (!%p166_p2), %v2930_v23  ;;  %v2942_v34 = vpack.c.bf16 (!%p166_p2), %v1860_v33, %v1859_v32  ;;  %vm822_vm3 = vcmask (!%p166_p2), 261312   ;;  %vm1015_vm4 = vcmask (!%p166_p2), 326912   ;;  %vm1208_vm5 = vcmask (!%p166_p2), 392512  }
   0x9   : > { %2933 = vmatpush3.bf16.msra.mxu0 (!%p166_p2), %v2930_v23  ;;  %s3043_s14 = smov (!%p166_p2), 56   ;;  %s3044_s28 = smov (!%p166_p2), 64   ;;  %vm1402_vm6 = vcmask (!%p166_p2), 458112   ;;  %vm1595_vm7 = vcmask (!%p166_p2), 523712   ;;  %vm1788_vm8 = vcmask (!%p166_p2), 589312   ;;  %vm1869_vm9 = vcmask (!%p166_p2), 588800  }
   0xa   : > { %2935 = vmatprep.subr.bf16.mxu0 (!%p166_p2), %v2934_v26  ;;  %s2523_s6 = sshll.u32 (!%p166_p2), %s3077_s16, 5  ;;  %vm2325_vm10 = vcmask (!%p166_p2), 57344  }
   0xb   : > { %p201_p4 = scmp.lt.s32.totalorder (!%p166_p2), %s2523_s6, 63 }
   0xd   : > { %s3083_s17 = scalar_select %p195_p3, %s3077_s16, 1  ;;  %2937 = vmatpush3.bf16.msra.mxu0 %v2934_v26 }
   0xe   : > { %2939 = vmatprep.subr.bf16.mxu0 %v2938_v31  ;;  %s4282_s6 = smov (!%p201_p4, %s2523_s6), 63 }
   0xf   : > { %s3010_s18 = smul.u32 432, %s3083_s17  ;;  %s2524_s8 = sshll.u32 %s4282_s6, 3 }
  0x10   : > { %s3715_s11 = scalar_lea.vmem %s4279_s3, %s2524_s8 }
  0x11   : > { %s3089_s21 = scalar_lea.vmem %s4276_s0, %s3010_s18  ;;  %2941 = vmatpush3.bf16.msra.mxu0 %v2938_v31 }
  0x12   : > { %v468_v0 = vld [vmem:[%s3089_s21 + $0x2] sm:$0xff]  ;;  %v469_v3 = vld [vmem:[%s3089_s21 + $0xa] sm:$0xff]  ;;  %v2526_v5 = vld [vmem:[%s3089_s21 + $0x18] sm:$0xff]  ;;  %2943 = vmatprep.subr.bf16.mxu0 %v2942_v34 }
  0x13   : > { %v275_v1 = vld [vmem:[%s3089_s21 + $0x1] sm:$0xff]  ;;  %532 = vrot.lane.b32.xlu1 %v468_v0, %s3037_s22  ;;  %v276_v4 = vld [vmem:[%s3089_s21 + $0x9] sm:$0xff]  ;;  %245 = vst.msk [vmem:[#allocation2 + $0x10] sm:$0xff] %vm242_vm0, %v2526_v5  ;;  %v3103_v7 = vld [vmem:[%s3089_s21 + $0x38] sm:$0xff] }
  0x14   : > { %339 = vrot.lane.b32.xlu0 %v275_v1, %s3038_s23  ;;  %v2527_v2 = vld [vmem:[%s3089_s21 + $0x20] sm:$0xff]  ;;  %v2622_v6 = vld [vmem:[%s3089_s21 + $0x30] sm:$0xff]  ;;  %248 = vst.msk [vmem:[#allocation2 + $0x28] sm:$0xff] %vm242_vm0, %v3103_v7  ;;  %v3111_v8 = vld [vmem:[%s3089_s21 + $0x48] sm:$0xff] }
  0x15   : > { %246 = vst.msk [vmem:[#allocation2 + $0x18] sm:$0xff] %vm242_vm0, %v2527_v2  ;;  %247 = vst.msk [vmem:[#allocation2 + $0x20] sm:$0xff] %vm242_vm0, %v2622_v6  ;;  %v3114_v9 = vld [vmem:[%s3089_s21 + $0x50] sm:$0xff]  ;;  %v3121_v10 = vld [vmem:[%s3089_s21 + $0x60] sm:$0xff]  ;;  %2945 = vmatpush3.bf16.msra.mxu0 %v2942_v34 }
  0x16   : > { %249 = vst.msk [vmem:[#allocation2 + $0x30] sm:$0xff] %vm242_vm0, %v3111_v8  ;;  %250 = vst.msk [vmem:[#allocation2 + $0x38] sm:$0xff] %vm242_vm0, %v3114_v9  ;;  %v3124_v11 = vld [vmem:[%s3089_s21 + $0x68] sm:$0xff]  ;;  %v277_v12 = vld [vmem:[%s3089_s21 + $0x19] sm:$0xff]  ;;  %2880 = vmatprep.subr.mxu0 %v1861_v37 }
  0x17   : > { %534 = vrot.lane.b32.xlu1 %v469_v3, %s3037_s22  ;;  %251 = vst.msk [vmem:[#allocation2 + $0x40] sm:$0xff] %vm242_vm0, %v3121_v10  ;;  %252 = vst.msk [vmem:[#allocation2 + $0x48] sm:$0xff] %vm242_vm0, %v3124_v11  ;;  %v210_v13 = vld [vmem:[%s3089_s21] sm:$0xff]  ;;  %v211_v14 = vld [vmem:[%s3089_s21 + $0x8] sm:$0xff] }
  0x18   : > { %341 = vrot.lane.b32.xlu0 %v276_v4, %s3038_s23  ;;  %243 = vst.msk [vmem:[#allocation2] sm:$0xff] %vm242_vm0, %v210_v13  ;;  %244 = vst.msk [vmem:[#allocation2 + $0x8] sm:$0xff] %vm242_vm0, %v211_v14  ;;  %v3138_v15 = vld [vmem:[%s3089_s21 + $0x78] sm:$0xff]  ;;  %v3141_v16 = vld [vmem:[%s3089_s21 + $0x80] sm:$0xff] }
  0x19   : > { %253 = vst.msk [vmem:[#allocation2 + $0x50] sm:$0xff] %vm242_vm0, %v3138_v15  ;;  %254 = vst.msk [vmem:[#allocation2 + $0x58] sm:$0xff] %vm242_vm0, %v3141_v16  ;;  %v2590_v17 = vld [vmem:[%s3089_s21 + $0x1a] sm:$0xff]  ;;  %v2591_v19 = vld [vmem:[%s3089_s21 + $0x22] sm:$0xff]  ;;  %2881 = vmatpush3.msra.mxu0 %v1861_v37 }
  0x1a   : > { %v2559_v18 = vld [vmem:[%s3089_s21 + $0x21] sm:$0xff]  ;;  %v3163_v22 = vld [vmem:[%s3089_s21 + $0x90] sm:$0xff]  ;;  %v3185_v30 = vld [vmem:[%s3089_s21 + $0x98] sm:$0xff] }
  0x1b   : > { %728 = vrot.lane.b32.xlu1 %v2527_v2, %s3039_s24  ;;  %255 = vst.msk [vmem:[#allocation2 + $0x60] sm:$0xff] %vm242_vm0, %v3163_v22  ;;  %v2654_v27 = vld [vmem:[%s3089_s21 + $0x31] sm:$0xff]  ;;  %256 = vst.msk [vmem:[#allocation2 + $0x68] sm:$0xff] %vm242_vm0, %v3185_v30  ;;  %v2655_v36 = vld [vmem:[%s3089_s21 + $0x39] sm:$0xff] }
  0x1c   : > { %726 = vrot.lane.b32.xlu0 %v2526_v5, %s3039_s24  ;;  %v2686_v35 = vld [vmem:[%s3089_s21 + $0x32] sm:$0xff]  ;;  %v2687_v38 = vld [vmem:[%s3089_s21 + $0x3a] sm:$0xff]  ;;  %v3216_v39 = vld [vmem:[%s3089_s21 + $0xa8] sm:$0xff] }
  0x1d   : > { %257 = vst.msk [vmem:[#allocation2 + $0x70] sm:$0xff] %vm242_vm0, %v3216_v39  ;;  %v2656_v40 = vld [vmem:[%s3089_s21 + $0x49] sm:$0xff]  ;;  %v2657_v43 = vld [vmem:[%s3089_s21 + $0x51] sm:$0xff]  ;;  %v3250_v45 = vld [vmem:[%s3089_s21 + $0xc0] sm:$0xff] }
  0x1e   : > { %v3228_v41 = vld [vmem:[%s3089_s21 + $0xb0] sm:$0xff]  ;;  %259 = vst.msk [vmem:[#allocation2 + $0x80] sm:$0xff] %vm242_vm0, %v3250_v45  ;;  %v2658_v46 = vld [vmem:[%s3089_s21 + $0x61] sm:$0xff]  ;;  %v3287_v55 = vld [vmem:[%s3089_s21 + $0xd8] sm:$0xff] }
  0x1f   : > { %343 = vrot.lane.b32.xlu1 %v277_v12, %s3038_s23  ;;  %258 = vst.msk [vmem:[#allocation2 + $0x78] sm:$0xff] %vm242_vm0, %v3228_v41  ;;  %v2688_v42 = vld [vmem:[%s3089_s21 + $0x4a] sm:$0xff]  ;;  %v2689_v44 = vld [vmem:[%s3089_s21 + $0x52] sm:$0xff]  ;;  %v2690_v48 = vld [vmem:[%s3089_s21 + $0x62] sm:$0xff] }
  0x20   : > { %919 = vrot.lane.b32.xlu0 %v277_v12, %s3040_s25  ;;  %v3262_v47 = vld [vmem:[%s3089_s21 + $0xc8] sm:$0xff]  ;;  %261 = vst.msk [vmem:[#allocation2 + $0x90] sm:$0xff] %vm242_vm0, %v3287_v55  ;;  %v2660_v58 = vld [vmem:[%s3089_s21 + $0x79] sm:$0xff]  ;;  %v3338_v13 = vld [vmem:[%s3089_s21 + $0xf0] sm:$0xff] }
  0x21   : > { %260 = vst.msk [vmem:[#allocation2 + $0x88] sm:$0xff] %vm242_vm0, %v3262_v47  ;;  %v2659_v49 = vld [vmem:[%s3089_s21 + $0x69] sm:$0xff]  ;;  %v3304_v61 = vld [vmem:[%s3089_s21 + $0xe0] sm:$0xff]  ;;  %263 = vst.msk [vmem:[#allocation2 + $0xa0] sm:$0xff] %vm242_vm0, %v3338_v13 }
  0x22   : > { %v2691_v50 = vld [vmem:[%s3089_s21 + $0x6a] sm:$0xff]  ;;  %262 = vst.msk [vmem:[#allocation2 + $0x98] sm:$0xff] %vm242_vm0, %v3304_v61  ;;  %v2692_v0 = vld [vmem:[%s3089_s21 + $0x7a] sm:$0xff]  ;;  %v2694_v23 = vld [vmem:[%s3089_s21 + $0x92] sm:$0xff] }
  0x23   : > { %1112 = vrot.lane.b32.xlu1 %v2590_v17, %s3041_s26  ;;  %v2661_v1 = vld [vmem:[%s3089_s21 + $0x81] sm:$0xff]  ;;  %v2663_v24 = vld [vmem:[%s3089_s21 + $0x99] sm:$0xff] }
  0x24   : > { %921 = vrot.lane.b32.xlu0 %v2559_v18, %s3040_s25  ;;  %v3390_v37 = vld [vmem:[%s3089_s21 + $0x108] sm:$0xff] }
  0x25   : > { %265 = vst.msk [vmem:[#allocation2 + $0xb0] sm:$0xff] %vm242_vm0, %v3390_v37 }
  0x27   : > { %536 = vrot.lane.b32.xlu1 %v2590_v17, %s3037_s22 }
  0x28   : > { %345 = vrot.lane.b32.xlu0 %v2559_v18, %s3038_s23 }
  0x2b   : > { %1306 = vrot.lane.b32.xlu1 %v2622_v6, %s3042_s5 }
  0x2c   : > { %1114 = vrot.lane.b32.xlu0 %v2591_v19, %s3041_s26 }
  0x2f   : > { %730 = vrot.lane.b32.xlu1 %v2622_v6, %s3039_s24  ;;  %v2693_v6 = vld [vmem:[%s3089_s21 + $0x82] sm:$0xff] }
  0x30   : > { %538 = vrot.lane.b32.xlu0 %v2591_v19, %s3037_s22  ;;  %v3354_v19 = vld [vmem:[%s3089_s21 + $0xf8] sm:$0xff] }
  0x31   : > { %264 = vst.msk [vmem:[#allocation2 + $0xa8] sm:$0xff] %vm242_vm0, %v3354_v19 }
  0x33   : > { %1499 = vrot.lane.b32.xlu1 %v2654_v27, %s3043_s14 }
  0x34   : > { %1308 = vrot.lane.b32.xlu0 %v3103_v7, %s3042_s5 }
  0x37   : > { %923 = vrot.lane.b32.xlu1 %v2654_v27, %s3040_s25 }
  0x38   : > { %732 = vrot.lane.b32.xlu0 %v3103_v7, %s3039_s24 }
  0x3b   : > { %1692 = vrot.lane.b32.xlu1 %v2686_v35, %s3044_s28 }
  0x3c   : > { %1501 = vrot.lane.b32.xlu0 %v2655_v36, %s3043_s14 }
  0x3f   : > { %925 = vrot.lane.b32.xlu1 %v2655_v36, %s3040_s25 }
  0x40   : > { %347 = vrot.lane.b32.xlu0 %v2654_v27, %s3038_s23 }
  0x43   : > { %1694 = vrot.lane.b32.xlu1 %v2687_v38, %s3044_s28 }
  0x44   : > { %1116 = vrot.lane.b32.xlu0 %v2686_v35, %s3041_s26 }
  0x47   : > { %540 = vrot.lane.b32.xlu1 %v2686_v35, %s3037_s22 }
  0x48   : > { %349 = vrot.lane.b32.xlu0 %v2655_v36, %s3038_s23 }
  0x4b   : > { %1310 = vrot.lane.b32.xlu1 %v3111_v8, %s3042_s5 }
  0x4c   : > { %1118 = vrot.lane.b32.xlu0 %v2687_v38, %s3041_s26 }
  0x4f   : > { %734 = vrot.lane.b32.xlu1 %v3111_v8, %s3039_s24 }
  0x50   : > { %542 = vrot.lane.b32.xlu0 %v2687_v38, %s3037_s22 }
  0x53   : > { %1503 = vrot.lane.b32.xlu1 %v2656_v40, %s3043_s14 }
  0x54   : > { %1312 = vrot.lane.b32.xlu0 %v3114_v9, %s3042_s5 }
  0x57   : > { %927 = vrot.lane.b32.xlu1 %v2656_v40, %s3040_s25 }
  0x58   : > { %736 = vrot.lane.b32.xlu0 %v3114_v9, %s3039_s24 }
  0x5b   : > { %1696 = vrot.lane.b32.xlu1 %v2688_v42, %s3044_s28 }
  0x5c   : > { %1505 = vrot.lane.b32.xlu0 %v2657_v43, %s3043_s14 }
  0x5f   : > { %929 = vrot.lane.b32.xlu1 %v2657_v43, %s3040_s25 }
  0x60   : > { %351 = vrot.lane.b32.xlu0 %v2656_v40, %s3038_s23 }
  0x63   : > { %1698 = vrot.lane.b32.xlu1 %v2689_v44, %s3044_s28 }
  0x64   : > { %1120 = vrot.lane.b32.xlu0 %v2688_v42, %s3041_s26 }
  0x67   : > { %544 = vrot.lane.b32.xlu1 %v2688_v42, %s3037_s22  ;;  %v2664_v42 = vld [vmem:[%s3089_s21 + $0xa9] sm:$0xff] }
  0x68   : > { %353 = vrot.lane.b32.xlu0 %v2657_v43, %s3038_s23 }
  0x6b   : > { %1314 = vrot.lane.b32.xlu1 %v3121_v10, %s3042_s5 }
  0x6c   : > { %1122 = vrot.lane.b32.xlu0 %v2689_v44, %s3041_s26 }
  0x6f   : > { %738 = vrot.lane.b32.xlu1 %v3121_v10, %s3039_s24 }
  0x70   : > { %546 = vrot.lane.b32.xlu0 %v2689_v44, %s3037_s22 }
  0x73   : > { %1507 = vrot.lane.b32.xlu1 %v2658_v46, %s3043_s14 }
  0x74   : > { %1316 = vrot.lane.b32.xlu0 %v3124_v11, %s3042_s5 }
  0x77   : > { %931 = vrot.lane.b32.xlu1 %v2658_v46, %s3040_s25 }
  0x78   : > { %740 = vrot.lane.b32.xlu0 %v3124_v11, %s3039_s24 }
  0x7b   : > { %1700 = vrot.lane.b32.xlu1 %v2690_v48, %s3044_s28 }
  0x7c   : > { %1509 = vrot.lane.b32.xlu0 %v2659_v49, %s3043_s14 }
  0x7f   : > { %933 = vrot.lane.b32.xlu1 %v2659_v49, %s3040_s25 }
  0x80   : > { %355 = vrot.lane.b32.xlu0 %v2658_v46, %s3038_s23  ;;  %v3406_v46 = vld [vmem:[%s3089_s21 + $0x110] sm:$0xff] }
  0x81   : > { %266 = vst.msk [vmem:[#allocation2 + $0xb8] sm:$0xff] %vm242_vm0, %v3406_v46 }
  0x83   : > { %1702 = vrot.lane.b32.xlu1 %v2691_v50, %s3044_s28 }
  0x84   : > { %1124 = vrot.lane.b32.xlu0 %v2690_v48, %s3041_s26 }
  0x85   : > { %v533_v51 = vpop.permute.xlu1 %532 }
  0x86   : > { %v340_v52 = vpop.permute.xlu0 %339 }
  0x87   : > { %436 = vst.msk [vmem:[#allocation2] sm:$0xff] %vm435_vm1, %v340_v52  ;;  %548 = vrot.lane.b32.xlu1 %v2690_v48, %s3037_s22 }
  0x88   : > { %357 = vrot.lane.b32.xlu0 %v2659_v49, %s3038_s23  ;;  %629 = vst.msk [vmem:[#allocation2] sm:$0xff] %vm628_vm2, %v533_v51  ;;  %v2665_v51 = vld [vmem:[%s3089_s21 + $0xb1] sm:$0xff] }
  0x89   : > { %v535_v53 = vpop.permute.xlu1 %534 }
  0x8a   : > { %v342_v54 = vpop.permute.xlu0 %341 }
  0x8b   : > { %437 = vst.msk [vmem:[#allocation2 + $0x8] sm:$0xff] %vm435_vm1, %v342_v54  ;;  %1318 = vrot.lane.b32.xlu1 %v3138_v15, %s3042_s5 }
  0x8c   : > { %1126 = vrot.lane.b32.xlu0 %v2691_v50, %s3041_s26  ;;  %630 = vst.msk [vmem:[#allocation2 + $0x8] sm:$0xff] %vm628_vm2, %v535_v53 }
  0x8d   : > { %v729_v56 = vpop.permute.xlu1 %728 }
  0x8e   : > { %v727_v57 = vpop.permute.xlu0 %726  ;;  %824 = vst.msk [vmem:[#allocation2 + $0x8] sm:$0xff] %vm822_vm3, %v729_v56 }
  0x8f   : > { %823 = vst.msk [vmem:[#allocation2] sm:$0xff] %vm822_vm3, %v727_v57  ;;  %742 = vrot.lane.b32.xlu1 %v3138_v15, %s3039_s24 }
  0x90   : > { %550 = vrot.lane.b32.xlu0 %v2691_v50, %s3037_s22  ;;  %v2696_v50 = vld [vmem:[%s3089_s21 + $0xaa] sm:$0xff] }
  0x91   : > { %v344_v59 = vpop.permute.xlu1 %343 }
  0x92   : > { %v920_v60 = vpop.permute.xlu0 %919  ;;  %438 = vst.msk [vmem:[#allocation2 + $0x10] sm:$0xff] %vm435_vm1, %v344_v59 }
  0x93   : > { %1016 = vst.msk [vmem:[#allocation2] sm:$0xff] %vm1015_vm4, %v920_v60  ;;  %1511 = vrot.lane.b32.xlu1 %v2660_v58, %s3043_s14 }
  0x94   : > { %1320 = vrot.lane.b32.xlu0 %v3141_v16, %s3042_s5 }
  0x95   : > { %v1113_v62 = vpop.permute.xlu1 %1112 }
  0x96   : > { %v922_v63 = vpop.permute.xlu0 %921  ;;  %1209 = vst.msk [vmem:[#allocation2] sm:$0xff] %vm1208_vm5, %v1113_v62 }
  0x97   : > { %1017 = vst.msk [vmem:[#allocation2 + $0x8] sm:$0xff] %vm1015_vm4, %v922_v63  ;;  %935 = vrot.lane.b32.xlu1 %v2660_v58, %s3040_s25 }
  0x98   : > { %744 = vrot.lane.b32.xlu0 %v3141_v16, %s3039_s24  ;;  %v2662_v16 = vld [vmem:[%s3089_s21 + $0x91] sm:$0xff] }
  0x99   : > { %v537_v2 = vpop.permute.xlu1 %536 }
  0x9a   : > { %v346_v3 = vpop.permute.xlu0 %345  ;;  %631 = vst.msk [vmem:[#allocation2 + $0x10] sm:$0xff] %vm628_vm2, %v537_v2 }
  0x9b   : > { %439 = vst.msk [vmem:[#allocation2 + $0x18] sm:$0xff] %vm435_vm1, %v346_v3  ;;  %1704 = vrot.lane.b32.xlu1 %v2692_v0, %s3044_s28 }
  0x9c   : > { %1513 = vrot.lane.b32.xlu0 %v2661_v1, %s3043_s14 }
  0x9d   : > { %v1307_v4 = vpop.permute.xlu1 %1306 }
  0x9e   : > { %v1115_v5 = vpop.permute.xlu0 %1114  ;;  %1403 = vst.msk [vmem:[#allocation2] sm:$0xff] %vm1402_vm6, %v1307_v4  ;;  %v2666_v4 = vld [vmem:[%s3089_s21 + $0xc1] sm:$0xff] }
  0x9f   : > { %1210 = vst.msk [vmem:[#allocation2 + $0x8] sm:$0xff] %vm1208_vm5, %v1115_v5  ;;  %937 = vrot.lane.b32.xlu1 %v2661_v1, %s3040_s25 }
  0xa0   : > { %359 = vrot.lane.b32.xlu0 %v2660_v58, %s3038_s23 }
  0xa1   : > { %v731_v7 = vpop.permute.xlu1 %730 }
  0xa2   : > { %v539_v8 = vpop.permute.xlu0 %538  ;;  %825 = vst.msk [vmem:[#allocation2 + $0x10] sm:$0xff] %vm822_vm3, %v731_v7  ;;  %v3458_v7 = vld [vmem:[%s3089_s21 + $0x128] sm:$0xff] }
  0xa3   : > { %632 = vst.msk [vmem:[#allocation2 + $0x18] sm:$0xff] %vm628_vm2, %v539_v8  ;;  %1706 = vrot.lane.b32.xlu1 %v2693_v6, %s3044_s28 }
  0xa4   : > { %1128 = vrot.lane.b32.xlu0 %v2692_v0, %s3041_s26  ;;  %268 = vst.msk [vmem:[#allocation2 + $0xc8] sm:$0xff] %vm242_vm0, %v3458_v7 }
  0xa5   : > { %v1500_v9 = vpop.permute.xlu1 %1499 }
  0xa6   : > { %v1309_v10 = vpop.permute.xlu0 %1308  ;;  %1596 = vst.msk [vmem:[#allocation2] sm:$0xff] %vm1595_vm7, %v1500_v9 }
  0xa7   : > { %1404 = vst.msk [vmem:[#allocation2 + $0x8] sm:$0xff] %vm1402_vm6, %v1309_v10  ;;  %552 = vrot.lane.b32.xlu1 %v2692_v0, %s3037_s22  ;;  %v2698_v10 = vld [vmem:[%s3089_s21 + $0xc2] sm:$0xff] }
  0xa8   : > { %361 = vrot.lane.b32.xlu0 %v2661_v1, %s3038_s23  ;;  %v3442_v1 = vld [vmem:[%s3089_s21 + $0x120] sm:$0xff] }
  0xa9   : > { %v924_v11 = vpop.permute.xlu1 %923  ;;  %267 = vst.msk [vmem:[#allocation2 + $0xc0] sm:$0xff] %vm242_vm0, %v3442_v1 }
  0xaa   : > { %v733_v12 = vpop.permute.xlu0 %732  ;;  %1018 = vst.msk [vmem:[#allocation2 + $0x10] sm:$0xff] %vm1015_vm4, %v924_v11  ;;  %v2667_v11 = vld [vmem:[%s3089_s21 + $0xc9] sm:$0xff] }
  0xab   : > { %826 = vst.msk [vmem:[#allocation2 + $0x18] sm:$0xff] %vm822_vm3, %v733_v12  ;;  %1322 = vrot.lane.b32.xlu1 %v3163_v22, %s3042_s5 }
  0xac   : > { %1130 = vrot.lane.b32.xlu0 %v2693_v6, %s3041_s26 }
  0xad   : > { %v1693_v14 = vpop.permute.xlu1 %1692 }
  0xae   : > { %v1502_v15 = vpop.permute.xlu0 %1501  ;;  %1789 = vst.msk [vmem:[#allocation2] sm:$0xff] %vm1788_vm8, %v1693_v14 }
  0xaf   : > { %1597 = vst.msk [vmem:[#allocation2 + $0x8] sm:$0xff] %vm1595_vm7, %v1502_v15  ;;  %746 = vrot.lane.b32.xlu1 %v3163_v22, %s3039_s24 }
  0xb0   : > { %554 = vrot.lane.b32.xlu0 %v2693_v6, %s3037_s22 }
  0xb1   : > { %v926_v17 = vpop.permute.xlu1 %925 }
  0xb2   : > { %v348_v18 = vpop.permute.xlu0 %347  ;;  %1019 = vst.msk [vmem:[#allocation2 + $0x18] sm:$0xff] %vm1015_vm4, %v926_v17 }
  0xb3   : > { %440 = vst.msk [vmem:[#allocation2 + $0x20] sm:$0xff] %vm435_vm1, %v348_v18  ;;  %1515 = vrot.lane.b32.xlu1 %v2662_v16, %s3043_s14 }
  0xb4   : > { %1324 = vrot.lane.b32.xlu0 %v3185_v30, %s3042_s5 }
  0xb5   : > { %v1695_v20 = vpop.permute.xlu1 %1694  ;;  %v1821_v22 = vld [vmem:[#allocation2] sm:$0xff] }
  0xb6   : > { %v1117_v21 = vpop.permute.xlu0 %1116  ;;  %1790 = vst.msk [vmem:[#allocation2 + $0x8] sm:$0xff] %vm1788_vm8, %v1695_v20  ;;  %2882 = vmatprep.mubr.msk.f32.mxu0 %vm1869_vm9, %v1821_v22 }
  0xb7   : > { %1211 = vst.msk [vmem:[#allocation2 + $0x10] sm:$0xff] %vm1208_vm5, %v1117_v21  ;;  %939 = vrot.lane.b32.xlu1 %v2662_v16, %s3040_s25 }
  0xb8   : > { %748 = vrot.lane.b32.xlu0 %v3185_v30, %s3039_s24  ;;  %v2695_v30 = vld [vmem:[%s3089_s21 + $0x9a] sm:$0xff] }
  0xb9   : > { %v541_v25 = vpop.permute.xlu1 %540 }
  0xba   : > { %v350_v26 = vpop.permute.xlu0 %349  ;;  %633 = vst.msk [vmem:[#allocation2 + $0x20] sm:$0xff] %vm628_vm2, %v541_v25  ;;  %v3494_v25 = vld [vmem:[%s3089_s21 + $0x138] sm:$0xff] }
  0xbb   : > { %441 = vst.msk [vmem:[#allocation2 + $0x28] sm:$0xff] %vm435_vm1, %v350_v26  ;;  %1708 = vrot.lane.b32.xlu1 %v2694_v23, %s3044_s28 }
  0xbc   : > { %1517 = vrot.lane.b32.xlu0 %v2663_v24, %s3043_s14  ;;  %269 = vst.msk [vmem:[#allocation2 + $0xd0] sm:$0xff] %vm242_vm0, %v3494_v25 }
  0xbd   : > { %v1311_v27 = vpop.permute.xlu1 %1310  ;;  %v1822_v29 = vld [vmem:[#allocation2 + $0x8] sm:$0xff] }
  0xbe   : > { %v1119_v28 = vpop.permute.xlu0 %1118  ;;  %1405 = vst.msk [vmem:[#allocation2 + $0x10] sm:$0xff] %vm1402_vm6, %v1311_v27  ;;  %2883 = vmatmul.mubr.msk.f32.vlgmr.msra.gmra.mrb[0].mxu0 %vm1869_vm9, %v1822_v29 }
  0xbf   : > { %1212 = vst.msk [vmem:[#allocation2 + $0x18] sm:$0xff] %vm1208_vm5, %v1119_v28  ;;  %941 = vrot.lane.b32.xlu1 %v2663_v24, %s3040_s25  ;;  %v2668_v28 = vld [vmem:[%s3089_s21 + $0xd9] sm:$0xff] }
  0xc0   : > { %363 = vrot.lane.b32.xlu0 %v2662_v16, %s3038_s23 }
  0xc1   : > { %v735_v31 = vpop.permute.xlu1 %734 }
  0xc2   : > { %v543_v32 = vpop.permute.xlu0 %542  ;;  %827 = vst.msk [vmem:[#allocation2 + $0x20] sm:$0xff] %vm822_vm3, %v735_v31  ;;  %v3513_v31 = vld [vmem:[%s3089_s21 + $0x140] sm:$0xff] }
  0xc3   : > { %634 = vst.msk [vmem:[#allocation2 + $0x28] sm:$0xff] %vm628_vm2, %v543_v32  ;;  %1710 = vrot.lane.b32.xlu1 %v2695_v30, %s3044_s28 }
  0xc4   : > { %1132 = vrot.lane.b32.xlu0 %v2694_v23, %s3041_s26  ;;  %270 = vst.msk [vmem:[#allocation2 + $0xd8] sm:$0xff] %vm242_vm0, %v3513_v31 }
  0xc5   : > { %v1504_v33 = vpop.permute.xlu1 %1503 }
  0xc6   : > { %v1313_v34 = vpop.permute.xlu0 %1312  ;;  %1598 = vst.msk [vmem:[#allocation2 + $0x10] sm:$0xff] %vm1595_vm7, %v1504_v33 }
  0xc7   : > { %1406 = vst.msk [vmem:[#allocation2 + $0x18] sm:$0xff] %vm1402_vm6, %v1313_v34  ;;  %556 = vrot.lane.b32.xlu1 %v2694_v23, %s3037_s22  ;;  %v2700_v34 = vld [vmem:[%s3089_s21 + $0xda] sm:$0xff] }
  0xc8   : > { %365 = vrot.lane.b32.xlu0 %v2663_v24, %s3038_s23 }
  0xc9   : > { %v928_v35 = vpop.permute.xlu1 %927 }
  0xca   : > { %v737_v36 = vpop.permute.xlu0 %736  ;;  %1020 = vst.msk [vmem:[#allocation2 + $0x20] sm:$0xff] %vm1015_vm4, %v928_v35  ;;  %v2669_v35 = vld [vmem:[%s3089_s21 + $0xe1] sm:$0xff] }
  0xcb   : > { %828 = vst.msk [vmem:[#allocation2 + $0x28] sm:$0xff] %vm822_vm3, %v737_v36  ;;  %1326 = vrot.lane.b32.xlu1 %v3216_v39, %s3042_s5 }
  0xcc   : > { %1134 = vrot.lane.b32.xlu0 %v2695_v30, %s3041_s26 }
  0xcd   : > { %v1697_v38 = vpop.permute.xlu1 %1696 }
  0xce   : > { %v1506_v40 = vpop.permute.xlu0 %1505  ;;  %1791 = vst.msk [vmem:[#allocation2 + $0x10] sm:$0xff] %vm1788_vm8, %v1697_v38 }
  0xcf   : > { %1599 = vst.msk [vmem:[#allocation2 + $0x18] sm:$0xff] %vm1595_vm7, %v1506_v40  ;;  %750 = vrot.lane.b32.xlu1 %v3216_v39, %s3039_s24 }
  0xd0   : > { %558 = vrot.lane.b32.xlu0 %v2695_v30, %s3037_s22 }
  0xd1   : > { %v930_v43 = vpop.permute.xlu1 %929 }
  0xd2   : > { %v352_v44 = vpop.permute.xlu0 %351  ;;  %1021 = vst.msk [vmem:[#allocation2 + $0x28] sm:$0xff] %vm1015_vm4, %v930_v43 }
  0xd3   : > { %442 = vst.msk [vmem:[#allocation2 + $0x30] sm:$0xff] %vm435_vm1, %v352_v44  ;;  %1519 = vrot.lane.b32.xlu1 %v2664_v42, %s3043_s14 }
  0xd4   : > { %1328 = vrot.lane.b32.xlu0 %v3228_v41, %s3042_s5 }
  0xd5   : > { %v1699_v39 = vpop.permute.xlu1 %1698  ;;  %v1823_v49 = vld [vmem:[#allocation2 + $0x10] sm:$0xff] }
  0xd6   : > { %v1121_v48 = vpop.permute.xlu0 %1120  ;;  %1792 = vst.msk [vmem:[#allocation2 + $0x18] sm:$0xff] %vm1788_vm8, %v1699_v39  ;;  %2885 = vmatprep.mubr.msk.f32.mxu0 %vm1869_vm9, %v1823_v49 }
  0xd7   : > { %1213 = vst.msk [vmem:[#allocation2 + $0x20] sm:$0xff] %vm1208_vm5, %v1121_v48  ;;  %943 = vrot.lane.b32.xlu1 %v2664_v42, %s3040_s25 }
  0xd8   : > { %752 = vrot.lane.b32.xlu0 %v3228_v41, %s3039_s24  ;;  %v2697_v41 = vld [vmem:[%s3089_s21 + $0xb2] sm:$0xff] }
  0xd9   : > { %v545_v52 = vpop.permute.xlu1 %544 }
  0xda   : > { %v354_v53 = vpop.permute.xlu0 %353  ;;  %635 = vst.msk [vmem:[#allocation2 + $0x30] sm:$0xff] %vm628_vm2, %v545_v52  ;;  %v3546_v52 = vld [vmem:[%s3089_s21 + $0x150] sm:$0xff] }
  0xdb   : > { %443 = vst.msk [vmem:[#allocation2 + $0x38] sm:$0xff] %vm435_vm1, %v354_v53  ;;  %1712 = vrot.lane.b32.xlu1 %v2696_v50, %s3044_s28 }
  0xdc   : > { %1521 = vrot.lane.b32.xlu0 %v2665_v51, %s3043_s14  ;;  %271 = vst.msk [vmem:[#allocation2 + $0xe0] sm:$0xff] %vm242_vm0, %v3546_v52 }
  0xdd   : > { %v1315_v54 = vpop.permute.xlu1 %1314  ;;  %v1824_v57 = vld [vmem:[#allocation2 + $0x18] sm:$0xff] }
  0xde   : > { %v1123_v56 = vpop.permute.xlu0 %1122  ;;  %1407 = vst.msk [vmem:[#allocation2 + $0x20] sm:$0xff] %vm1402_vm6, %v1315_v54  ;;  %2886 = vmatmul.mubr.msk.f32.gmra.mrb[2].mxu0 %vm1869_vm9, %v1824_v57 }
  0xdf   : > { %1214 = vst.msk [vmem:[#allocation2 + $0x28] sm:$0xff] %vm1208_vm5, %v1123_v56  ;;  %945 = vrot.lane.b32.xlu1 %v2665_v51, %s3040_s25  ;;  %v2670_v56 = vld [vmem:[%s3089_s21 + $0xf1] sm:$0xff] }
  0xe0   : > { %367 = vrot.lane.b32.xlu0 %v2664_v42, %s3038_s23 }
  0xe1   : > { %v739_v58 = vpop.permute.xlu1 %738 }
  0xe2   : > { %v547_v59 = vpop.permute.xlu0 %546  ;;  %829 = vst.msk [vmem:[#allocation2 + $0x30] sm:$0xff] %vm822_vm3, %v739_v58  ;;  %v3565_v58 = vld [vmem:[%s3089_s21 + $0x158] sm:$0xff] }
  0xe3   : > { %636 = vst.msk [vmem:[#allocation2 + $0x38] sm:$0xff] %vm628_vm2, %v547_v59  ;;  %1714 = vrot.lane.b32.xlu1 %v2697_v41, %s3044_s28 }
  0xe4   : > { %1136 = vrot.lane.b32.xlu0 %v2696_v50, %s3041_s26  ;;  %272 = vst.msk [vmem:[#allocation2 + $0xe8] sm:$0xff] %vm242_vm0, %v3565_v58 }
  0xe5   : > { %v1508_v60 = vpop.permute.xlu1 %1507 }
  0xe6   : > { %v1317_v62 = vpop.permute.xlu0 %1316  ;;  %1600 = vst.msk [vmem:[#allocation2 + $0x20] sm:$0xff] %vm1595_vm7, %v1508_v60 }
  0xe7   : > { %1408 = vst.msk [vmem:[#allocation2 + $0x28] sm:$0xff] %vm1402_vm6, %v1317_v62  ;;  %560 = vrot.lane.b32.xlu1 %v2696_v50, %s3037_s22  ;;  %v2702_v62 = vld [vmem:[%s3089_s21 + $0xf2] sm:$0xff] }
  0xe8   : > { %369 = vrot.lane.b32.xlu0 %v2665_v51, %s3038_s23 }
  0xe9   : > { %v932_v63 = vpop.permute.xlu1 %931 }
  0xea   : > { %v741_v0 = vpop.permute.xlu0 %740  ;;  %1022 = vst.msk [vmem:[#allocation2 + $0x30] sm:$0xff] %vm1015_vm4, %v932_v63  ;;  %v2671_v63 = vld [vmem:[%s3089_s21 + $0xf9] sm:$0xff] }
  0xeb   : > { %830 = vst.msk [vmem:[#allocation2 + $0x38] sm:$0xff] %vm822_vm3, %v741_v0  ;;  %1330 = vrot.lane.b32.xlu1 %v3250_v45, %s3042_s5 }
  0xec   : > { %1138 = vrot.lane.b32.xlu0 %v2697_v41, %s3041_s26 }
  0xed   : > { %v1701_v2 = vpop.permute.xlu1 %1700 }
  0xee   : > { %v1510_v3 = vpop.permute.xlu0 %1509  ;;  %1793 = vst.msk [vmem:[#allocation2 + $0x20] sm:$0xff] %vm1788_vm8, %v1701_v2 }
  0xef   : > { %1601 = vst.msk [vmem:[#allocation2 + $0x28] sm:$0xff] %vm1595_vm7, %v1510_v3  ;;  %754 = vrot.lane.b32.xlu1 %v3250_v45, %s3039_s24 }
  0xf0   : > { %562 = vrot.lane.b32.xlu0 %v2697_v41, %s3037_s22 }
  0xf1   : > { %v934_v5 = vpop.permute.xlu1 %933 }
  0xf2   : > { %v356_v6 = vpop.permute.xlu0 %355  ;;  %1023 = vst.msk [vmem:[#allocation2 + $0x38] sm:$0xff] %vm1015_vm4, %v934_v5 }
  0xf3   : > { %444 = vst.msk [vmem:[#allocation2 + $0x40] sm:$0xff] %vm435_vm1, %v356_v6  ;;  %1523 = vrot.lane.b32.xlu1 %v2666_v4, %s3043_s14 }
  0xf4   : > { %1332 = vrot.lane.b32.xlu0 %v3262_v47, %s3042_s5 }
  0xf5   : > { %v1703_v45 = vpop.permute.xlu1 %1702  ;;  %v1825_v9 = vld [vmem:[#allocation2 + $0x20] sm:$0xff] }
  0xf6   : > { %v1125_v8 = vpop.permute.xlu0 %1124  ;;  %1794 = vst.msk [vmem:[#allocation2 + $0x28] sm:$0xff] %vm1788_vm8, %v1703_v45  ;;  %2888 = vmatprep.mubr.msk.f32.mxu0 %vm1869_vm9, %v1825_v9 }
  0xf7   : > { %1215 = vst.msk [vmem:[#allocation2 + $0x30] sm:$0xff] %vm1208_vm5, %v1125_v8  ;;  %947 = vrot.lane.b32.xlu1 %v2666_v4, %s3040_s25 }
  0xf8   : > { %756 = vrot.lane.b32.xlu0 %v3262_v47, %s3039_s24  ;;  %v2699_v47 = vld [vmem:[%s3089_s21 + $0xca] sm:$0xff] }
  0xf9   : > { %v549_v12 = vpop.permute.xlu1 %548 }
  0xfa   : > { %v358_v14 = vpop.permute.xlu0 %357  ;;  %637 = vst.msk [vmem:[#allocation2 + $0x40] sm:$0xff] %vm628_vm2, %v549_v12  ;;  %v3598_v12 = vld [vmem:[%s3089_s21 + $0x168] sm:$0xff] }
  0xfb   : > { %445 = vst.msk [vmem:[#allocation2 + $0x48] sm:$0xff] %vm435_vm1, %v358_v14  ;;  %1716 = vrot.lane.b32.xlu1 %v2698_v10, %s3044_s28 }
  0xfc   : > { %1525 = vrot.lane.b32.xlu0 %v2667_v11, %s3043_s14  ;;  %273 = vst.msk [vmem:[#allocation2 + $0xf0] sm:$0xff] %vm242_vm0, %v3598_v12 }
  0xfd   : > { %v1319_v15 = vpop.permute.xlu1 %1318  ;;  %v1826_v17 = vld [vmem:[#allocation2 + $0x28] sm:$0xff] }
  0xfe   : > { %v1127_v16 = vpop.permute.xlu0 %1126  ;;  %1409 = vst.msk [vmem:[#allocation2 + $0x30] sm:$0xff] %vm1402_vm6, %v1319_v15  ;;  %2889 = vmatmul.mubr.msk.f32.gmra.mrb[4].mxu0 %vm1869_vm9, %v1826_v17 }
  0xff   : > { %1216 = vst.msk [vmem:[#allocation2 + $0x38] sm:$0xff] %vm1208_vm5, %v1127_v16  ;;  %949 = vrot.lane.b32.xlu1 %v2667_v11, %s3040_s25  ;;  %v2672_v16 = vld [vmem:[%s3089_s21 + $0x109] sm:$0xff] }
 0x100   : > { %371 = vrot.lane.b32.xlu0 %v2666_v4, %s3038_s23 }
 0x101   : > { %v743_v18 = vpop.permute.xlu1 %742 }
 0x102   : > { %v551_v20 = vpop.permute.xlu0 %550  ;;  %831 = vst.msk [vmem:[#allocation2 + $0x40] sm:$0xff] %vm822_vm3, %v743_v18  ;;  %v3617_v18 = vld [vmem:[%s3089_s21 + $0x170] sm:$0xff] }
 0x103   : > { %638 = vst.msk [vmem:[#allocation2 + $0x48] sm:$0xff] %vm628_vm2, %v551_v20  ;;  %1718 = vrot.lane.b32.xlu1 %v2699_v47, %s3044_s28 }
 0x104   : > { %1140 = vrot.lane.b32.xlu0 %v2698_v10, %s3041_s26  ;;  %274 = vst.msk [vmem:[#allocation2 + $0xf8] sm:$0xff] %vm242_vm0, %v3617_v18 }
 0x105   : > { %v1512_v21 = vpop.permute.xlu1 %1511 }
 0x106   : > { %v1321_v22 = vpop.permute.xlu0 %1320  ;;  %1602 = vst.msk [vmem:[#allocation2 + $0x30] sm:$0xff] %vm1595_vm7, %v1512_v21 }
 0x107   : > { %1410 = vst.msk [vmem:[#allocation2 + $0x38] sm:$0xff] %vm1402_vm6, %v1321_v22  ;;  %564 = vrot.lane.b32.xlu1 %v2698_v10, %s3037_s22  ;;  %v2704_v22 = vld [vmem:[%s3089_s21 + $0x10a] sm:$0xff] }
 0x108   : > { %373 = vrot.lane.b32.xlu0 %v2667_v11, %s3038_s23 }
 0x109   : > { %v936_v23 = vpop.permute.xlu1 %935 }
 0x10a   : > { %v745_v24 = vpop.permute.xlu0 %744  ;;  %1024 = vst.msk [vmem:[#allocation2 + $0x40] sm:$0xff] %vm1015_vm4, %v936_v23  ;;  %v2673_v23 = vld [vmem:[%s3089_s21 + $0x111] sm:$0xff] }
 0x10b   : > { %832 = vst.msk [vmem:[#allocation2 + $0x48] sm:$0xff] %vm822_vm3, %v745_v24  ;;  %1334 = vrot.lane.b32.xlu1 %v3287_v55, %s3042_s5 }
 0x10c   : > { %1142 = vrot.lane.b32.xlu0 %v2699_v47, %s3041_s26 }
 0x10d   : > { %v1705_v26 = vpop.permute.xlu1 %1704 }
 0x10e   : > { %v1514_v27 = vpop.permute.xlu0 %1513  ;;  %1795 = vst.msk [vmem:[#allocation2 + $0x30] sm:$0xff] %vm1788_vm8, %v1705_v26 }
 0x10f   : > { %1603 = vst.msk [vmem:[#allocation2 + $0x38] sm:$0xff] %vm1595_vm7, %v1514_v27  ;;  %758 = vrot.lane.b32.xlu1 %v3287_v55, %s3039_s24 }
 0x110   : > { %566 = vrot.lane.b32.xlu0 %v2699_v47, %s3037_s22 }
 0x111   : > { %v938_v29 = vpop.permute.xlu1 %937 }
 0x112   : > { %v360_v30 = vpop.permute.xlu0 %359  ;;  %1025 = vst.msk [vmem:[#allocation2 + $0x48] sm:$0xff] %vm1015_vm4, %v938_v29 }
 0x113   : > { %446 = vst.msk [vmem:[#allocation2 + $0x50] sm:$0xff] %vm435_vm1, %v360_v30  ;;  %1527 = vrot.lane.b32.xlu1 %v2668_v28, %s3043_s14 }
 0x114   : > { %1336 = vrot.lane.b32.xlu0 %v3304_v61, %s3042_s5 }
 0x115   : > { %v1707_v55 = vpop.permute.xlu1 %1706  ;;  %v1827_v33 = vld [vmem:[#allocation2 + $0x30] sm:$0xff] }
 0x116   : > { %v1129_v32 = vpop.permute.xlu0 %1128  ;;  %1796 = vst.msk [vmem:[#allocation2 + $0x38] sm:$0xff] %vm1788_vm8, %v1707_v55  ;;  %2891 = vmatprep.mubr.msk.f32.mxu0 %vm1869_vm9, %v1827_v33 }
 0x117   : > { %1217 = vst.msk [vmem:[#allocation2 + $0x40] sm:$0xff] %vm1208_vm5, %v1129_v32  ;;  %951 = vrot.lane.b32.xlu1 %v2668_v28, %s3040_s25 }
 0x118   : > { %760 = vrot.lane.b32.xlu0 %v3304_v61, %s3039_s24  ;;  %v2701_v61 = vld [vmem:[%s3089_s21 + $0xe2] sm:$0xff] }
 0x119   : > { %v553_v36 = vpop.permute.xlu1 %552 }
 0x11a   : > { %v362_v38 = vpop.permute.xlu0 %361  ;;  %639 = vst.msk [vmem:[#allocation2 + $0x50] sm:$0xff] %vm628_vm2, %v553_v36 }
 0x11b   : > { %447 = vst.msk [vmem:[#allocation2 + $0x58] sm:$0xff] %vm435_vm1, %v362_v38  ;;  %1720 = vrot.lane.b32.xlu1 %v2700_v34, %s3044_s28 }
 0x11c   : > { %1529 = vrot.lane.b32.xlu0 %v2669_v35, %s3043_s14 }
 0x11d   : > { %v1323_v40 = vpop.permute.xlu1 %1322  ;;  %v1828_v43 = vld [vmem:[#allocation2 + $0x38] sm:$0xff] }
 0x11e   : > { %v1131_v42 = vpop.permute.xlu0 %1130  ;;  %1411 = vst.msk [vmem:[#allocation2 + $0x40] sm:$0xff] %vm1402_vm6, %v1323_v40  ;;  %2892 = vmatmul.mubr.msk.f32.gmra.mrb[6].mxu0 %vm1869_vm9, %v1828_v43  ;;  %v2674_v40 = vld [vmem:[%s3089_s21 + $0x121] sm:$0xff] }
 0x11f   : > { %1218 = vst.msk [vmem:[#allocation2 + $0x48] sm:$0xff] %vm1208_vm5, %v1131_v42  ;;  %953 = vrot.lane.b32.xlu1 %v2669_v35, %s3040_s25 }
 0x120   : > { %375 = vrot.lane.b32.xlu0 %v2668_v28, %s3038_s23 }
 0x121   : > { %v747_v44 = vpop.permute.xlu1 %746 }
 0x122   : > { %v555_v39 = vpop.permute.xlu0 %554  ;;  %833 = vst.msk [vmem:[#allocation2 + $0x50] sm:$0xff] %vm822_vm3, %v747_v44 }
 0x123   : > { %640 = vst.msk [vmem:[#allocation2 + $0x58] sm:$0xff] %vm628_vm2, %v555_v39  ;;  %1722 = vrot.lane.b32.xlu1 %v2701_v61, %s3044_s28 }
 0x124   : > { %1144 = vrot.lane.b32.xlu0 %v2700_v34, %s3041_s26 }
 0x125   : > { %v1516_v48 = vpop.permute.xlu1 %1515 }
 0x126   : > { %v1325_v49 = vpop.permute.xlu0 %1324  ;;  %1604 = vst.msk [vmem:[#allocation2 + $0x40] sm:$0xff] %vm1595_vm7, %v1516_v48  ;;  %v2675_v48 = vld [vmem:[%s3089_s21 + $0x129] sm:$0xff] }
 0x127   : > { %1412 = vst.msk [vmem:[#allocation2 + $0x48] sm:$0xff] %vm1402_vm6, %v1325_v49  ;;  %568 = vrot.lane.b32.xlu1 %v2700_v34, %s3037_s22 }
 0x128   : > { %377 = vrot.lane.b32.xlu0 %v2669_v35, %s3038_s23 }
 0x129   : > { %v940_v50 = vpop.permute.xlu1 %939 }
 0x12a   : > { %v749_v51 = vpop.permute.xlu0 %748  ;;  %1026 = vst.msk [vmem:[#allocation2 + $0x50] sm:$0xff] %vm1015_vm4, %v940_v50 }
 0x12b   : > { %834 = vst.msk [vmem:[#allocation2 + $0x58] sm:$0xff] %vm822_vm3, %v749_v51  ;;  %1338 = vrot.lane.b32.xlu1 %v3338_v13, %s3042_s5 }
 0x12c   : > { %1146 = vrot.lane.b32.xlu0 %v2701_v61, %s3041_s26 }
 0x12d   : > { %v1709_v53 = vpop.permute.xlu1 %1708 }
 0x12e   : > { %v1518_v54 = vpop.permute.xlu0 %1517  ;;  %1797 = vst.msk [vmem:[#allocation2 + $0x40] sm:$0xff] %vm1788_vm8, %v1709_v53 }
 0x12f   : > { %1605 = vst.msk [vmem:[#allocation2 + $0x48] sm:$0xff] %vm1595_vm7, %v1518_v54  ;;  %762 = vrot.lane.b32.xlu1 %v3338_v13, %s3039_s24 }
 0x130   : > { %570 = vrot.lane.b32.xlu0 %v2701_v61, %s3037_s22 }
 0x131   : > { %v942_v57 = vpop.permute.xlu1 %941 }
 0x132   : > { %v364_v41 = vpop.permute.xlu0 %363  ;;  %1027 = vst.msk [vmem:[#allocation2 + $0x58] sm:$0xff] %vm1015_vm4, %v942_v57 }
 0x133   : > { %448 = vst.msk [vmem:[#allocation2 + $0x60] sm:$0xff] %vm435_vm1, %v364_v41  ;;  %1531 = vrot.lane.b32.xlu1 %v2670_v56, %s3043_s14 }
 0x134   : > { %1340 = vrot.lane.b32.xlu0 %v3354_v19, %s3042_s5 }
 0x135   : > { %v1711_v13 = vpop.permute.xlu1 %1710  ;;  %v1829_v60 = vld [vmem:[#allocation2 + $0x40] sm:$0xff] }
 0x136   : > { %v1133_v59 = vpop.permute.xlu0 %1132  ;;  %1798 = vst.msk [vmem:[#allocation2 + $0x48] sm:$0xff] %vm1788_vm8, %v1711_v13  ;;  %2894 = vmatprep.mubr.msk.f32.mxu0 %vm1869_vm9, %v1829_v60 }
 0x137   : > { %1219 = vst.msk [vmem:[#allocation2 + $0x50] sm:$0xff] %vm1208_vm5, %v1133_v59  ;;  %955 = vrot.lane.b32.xlu1 %v2670_v56, %s3040_s25 }
 0x138   : > { %764 = vrot.lane.b32.xlu0 %v3354_v19, %s3039_s24  ;;  %v2703_v19 = vld [vmem:[%s3089_s21 + $0xfa] sm:$0xff] }
 0x139   : > { %v557_v0 = vpop.permute.xlu1 %556 }
 0x13a   : > { %v366_v2 = vpop.permute.xlu0 %365  ;;  %641 = vst.msk [vmem:[#allocation2 + $0x60] sm:$0xff] %vm628_vm2, %v557_v0  ;;  %v3703_v0 = vld [vmem:[%s4278_s2] ss:$0 sm:$0xff] }
 0x13b   : > { %449 = vst.msk [vmem:[#allocation2 + $0x68] sm:$0xff] %vm435_vm1, %v366_v2  ;;  %1724 = vrot.lane.b32.xlu1 %v2702_v62, %s3044_s28  ;;  %v2676_v2 = vld [vmem:[%s3089_s21 + $0x139] sm:$0xff] }
 0x13c   : > { %1533 = vrot.lane.b32.xlu0 %v2671_v63, %s3043_s14 }
 0x13d   : > { %v1327_v3 = vpop.permute.xlu1 %1326  ;;  %v1830_v5 = vld [vmem:[#allocation2 + $0x48] sm:$0xff] }
 0x13e   : > { %v1135_v4 = vpop.permute.xlu0 %1134  ;;  %1413 = vst.msk [vmem:[#allocation2 + $0x50] sm:$0xff] %vm1402_vm6, %v1327_v3  ;;  %2895 = vmatmul.mubr.msk.f32.gmra.mrb[8].mxu0 %vm1869_vm9, %v1830_v5 }
 0x13f   : > { %1220 = vst.msk [vmem:[#allocation2 + $0x58] sm:$0xff] %vm1208_vm5, %v1135_v4  ;;  %957 = vrot.lane.b32.xlu1 %v2671_v63, %s3040_s25 }
 0x140   : > { %379 = vrot.lane.b32.xlu0 %v2670_v56, %s3038_s23 }
 0x141   : > { %v751_v6 = vpop.permute.xlu1 %750 }
 0x142   : > { %v559_v45 = vpop.permute.xlu0 %558  ;;  %835 = vst.msk [vmem:[#allocation2 + $0x60] sm:$0xff] %vm822_vm3, %v751_v6 }
 0x143   : > { %642 = vst.msk [vmem:[#allocation2 + $0x68] sm:$0xff] %vm628_vm2, %v559_v45  ;;  %1726 = vrot.lane.b32.xlu1 %v2703_v19, %s3044_s28 }
 0x144   : > { %1148 = vrot.lane.b32.xlu0 %v2702_v62, %s3041_s26 }
 0x145   : > { %v1520_v8 = vpop.permute.xlu1 %1519 }
 0x146   : > { %v1329_v9 = vpop.permute.xlu0 %1328  ;;  %1606 = vst.msk [vmem:[#allocation2 + $0x50] sm:$0xff] %vm1595_vm7, %v1520_v8 }
 0x147   : > { %1414 = vst.msk [vmem:[#allocation2 + $0x58] sm:$0xff] %vm1402_vm6, %v1329_v9  ;;  %572 = vrot.lane.b32.xlu1 %v2702_v62, %s3037_s22 }
 0x148   : > { %381 = vrot.lane.b32.xlu0 %v2671_v63, %s3038_s23 }
 0x149   : > { %v944_v10 = vpop.permute.xlu1 %943 }
 0x14a   : > { %v753_v11 = vpop.permute.xlu0 %752  ;;  %1028 = vst.msk [vmem:[#allocation2 + $0x60] sm:$0xff] %vm1015_vm4, %v944_v10 }
 0x14b   : > { %836 = vst.msk [vmem:[#allocation2 + $0x68] sm:$0xff] %vm822_vm3, %v753_v11  ;;  %1342 = vrot.lane.b32.xlu1 %v3390_v37, %s3042_s5 }
 0x14c   : > { %1150 = vrot.lane.b32.xlu0 %v2703_v19, %s3041_s26 }
 0x14d   : > { %v1713_v14 = vpop.permute.xlu1 %1712 }
 0x14e   : > { %v1522_v15 = vpop.permute.xlu0 %1521  ;;  %1799 = vst.msk [vmem:[#allocation2 + $0x50] sm:$0xff] %vm1788_vm8, %v1713_v14 }
 0x14f   : > { %1607 = vst.msk [vmem:[#allocation2 + $0x58] sm:$0xff] %vm1595_vm7, %v1522_v15  ;;  %766 = vrot.lane.b32.xlu1 %v3390_v37, %s3039_s24 }
 0x150   : > { %574 = vrot.lane.b32.xlu0 %v2703_v19, %s3037_s22 }
 0x151   : > { %v946_v17 = vpop.permute.xlu1 %945 }
 0x152   : > { %v368_v47 = vpop.permute.xlu0 %367  ;;  %1029 = vst.msk [vmem:[#allocation2 + $0x68] sm:$0xff] %vm1015_vm4, %v946_v17  ;;  %v2677_v17 = vld [vmem:[%s3089_s21 + $0x141] sm:$0xff] }
 0x153   : > { %450 = vst.msk [vmem:[#allocation2 + $0x70] sm:$0xff] %vm435_vm1, %v368_v47  ;;  %1535 = vrot.lane.b32.xlu1 %v2672_v16, %s3043_s14 }
 0x154   : > { %1344 = vrot.lane.b32.xlu0 %v3406_v46, %s3042_s5 }
 0x155   : > { %v1715_v37 = vpop.permute.xlu1 %1714  ;;  %v1831_v21 = vld [vmem:[#allocation2 + $0x50] sm:$0xff] }
 0x156   : > { %v1137_v20 = vpop.permute.xlu0 %1136  ;;  %1800 = vst.msk [vmem:[#allocation2 + $0x58] sm:$0xff] %vm1788_vm8, %v1715_v37  ;;  %2897 = vmatprep.mubr.msk.f32.mxu0 %vm1869_vm9, %v1831_v21 }
 0x157   : > { %1221 = vst.msk [vmem:[#allocation2 + $0x60] sm:$0xff] %vm1208_vm5, %v1137_v20  ;;  %959 = vrot.lane.b32.xlu1 %v2672_v16, %s3040_s25 }
 0x158   : > { %768 = vrot.lane.b32.xlu0 %v3406_v46, %s3039_s24  ;;  %v2705_v46 = vld [vmem:[%s3089_s21 + $0x112] sm:$0xff] }
 0x159   : > { %v561_v24 = vpop.permute.xlu1 %560 }
 0x15a   : > { %v370_v26 = vpop.permute.xlu0 %369  ;;  %643 = vst.msk [vmem:[#allocation2 + $0x70] sm:$0xff] %vm628_vm2, %v561_v24  ;;  %v2709_v24 = vld [vmem:[%s3089_s21 + $0x142] sm:$0xff] }
 0x15b   : > { %451 = vst.msk [vmem:[#allocation2 + $0x78] sm:$0xff] %vm435_vm1, %v370_v26  ;;  %1728 = vrot.lane.b32.xlu1 %v2704_v22, %s3044_s28 }
 0x15c   : > { %1537 = vrot.lane.b32.xlu0 %v2673_v23, %s3043_s14 }
 0x15d   : > { %v1331_v27 = vpop.permute.xlu1 %1330  ;;  %v1832_v29 = vld [vmem:[#allocation2 + $0x58] sm:$0xff] }
 0x15e   : > { %v1139_v28 = vpop.permute.xlu0 %1138  ;;  %1415 = vst.msk [vmem:[#allocation2 + $0x60] sm:$0xff] %vm1402_vm6, %v1331_v27  ;;  %2898 = vmatmul.mubr.msk.f32.gmra.mrb[10].mxu0 %vm1869_vm9, %v1832_v29 }
 0x15f   : > { %1222 = vst.msk [vmem:[#allocation2 + $0x68] sm:$0xff] %vm1208_vm5, %v1139_v28  ;;  %961 = vrot.lane.b32.xlu1 %v2673_v23, %s3040_s25 }
 0x160   : > { %383 = vrot.lane.b32.xlu0 %v2672_v16, %s3038_s23  ;;  %v2708_v16 = vld [vmem:[%s3089_s21 + $0x13a] sm:$0xff] }
 0x161   : > { %v755_v30 = vpop.permute.xlu1 %754 }
 0x162   : > { %v563_v55 = vpop.permute.xlu0 %562  ;;  %837 = vst.msk [vmem:[#allocation2 + $0x70] sm:$0xff] %vm822_vm3, %v755_v30 }
 0x163   : > { %644 = vst.msk [vmem:[#allocation2 + $0x78] sm:$0xff] %vm628_vm2, %v563_v55  ;;  %1730 = vrot.lane.b32.xlu1 %v2705_v46, %s3044_s28 }
 0x164   : > { %1152 = vrot.lane.b32.xlu0 %v2704_v22, %s3041_s26 }
 0x165   : > { %v1524_v32 = vpop.permute.xlu1 %1523 }
 0x166   : > { %v1333_v33 = vpop.permute.xlu0 %1332  ;;  %1608 = vst.msk [vmem:[#allocation2 + $0x60] sm:$0xff] %vm1595_vm7, %v1524_v32 }
 0x167   : > { %1416 = vst.msk [vmem:[#allocation2 + $0x68] sm:$0xff] %vm1402_vm6, %v1333_v33  ;;  %576 = vrot.lane.b32.xlu1 %v2704_v22, %s3037_s22  ;;  %v2678_v33 = vld [vmem:[%s3089_s21 + $0x151] sm:$0xff] }
 0x168   : > { %385 = vrot.lane.b32.xlu0 %v2673_v23, %s3038_s23 }
 0x169   : > { %v948_v34 = vpop.permute.xlu1 %947 }
 0x16a   : > { %v757_v35 = vpop.permute.xlu0 %756  ;;  %1030 = vst.msk [vmem:[#allocation2 + $0x70] sm:$0xff] %vm1015_vm4, %v948_v34 }
 0x16b   : > { %838 = vst.msk [vmem:[#allocation2 + $0x78] sm:$0xff] %vm822_vm3, %v757_v35  ;;  %1346 = vrot.lane.b32.xlu1 %v3442_v1, %s3042_s5 }
 0x16c   : > { %1154 = vrot.lane.b32.xlu0 %v2705_v46, %s3041_s26 }
 0x16d   : > { %v1717_v36 = vpop.permute.xlu1 %1716 }
 0x16e   : > { %v1526_v38 = vpop.permute.xlu0 %1525  ;;  %1801 = vst.msk [vmem:[#allocation2 + $0x60] sm:$0xff] %vm1788_vm8, %v1717_v36 }
 0x16f   : > { %1609 = vst.msk [vmem:[#allocation2 + $0x68] sm:$0xff] %vm1595_vm7, %v1526_v38  ;;  %770 = vrot.lane.b32.xlu1 %v3442_v1, %s3039_s24  ;;  %v2706_v1 = vld [vmem:[%s3089_s21 + $0x122] sm:$0xff] }
 0x170   : > { %578 = vrot.lane.b32.xlu0 %v2705_v46, %s3037_s22 }
 0x171   : > { %v950_v42 = vpop.permute.xlu1 %949 }
 0x172   : > { %v372_v43 = vpop.permute.xlu0 %371  ;;  %1031 = vst.msk [vmem:[#allocation2 + $0x78] sm:$0xff] %vm1015_vm4, %v950_v42 }
 0x173   : > { %452 = vst.msk [vmem:[#allocation2 + $0x80] sm:$0xff] %vm435_vm1, %v372_v43  ;;  %1539 = vrot.lane.b32.xlu1 %v2674_v40, %s3043_s14 }
 0x174   : > { %1348 = vrot.lane.b32.xlu0 %v3458_v7, %s3042_s5 }
 0x175   : > { %v1719_v61 = vpop.permute.xlu1 %1718  ;;  %v1833_v39 = vld [vmem:[#allocation2 + $0x60] sm:$0xff] }
 0x176   : > { %v1141_v44 = vpop.permute.xlu0 %1140  ;;  %1802 = vst.msk [vmem:[#allocation2 + $0x68] sm:$0xff] %vm1788_vm8, %v1719_v61  ;;  %2900 = vmatprep.mubr.msk.f32.mxu0 %vm1869_vm9, %v1833_v39 }
 0x177   : > { %1223 = vst.msk [vmem:[#allocation2 + $0x70] sm:$0xff] %vm1208_vm5, %v1141_v44  ;;  %963 = vrot.lane.b32.xlu1 %v2674_v40, %s3040_s25 }
 0x178   : > { %772 = vrot.lane.b32.xlu0 %v3458_v7, %s3039_s24  ;;  %v2707_v7 = vld [vmem:[%s3089_s21 + $0x12a] sm:$0xff] }
 0x179   : > { %v565_v49 = vpop.permute.xlu1 %564 }
 0x17a   : > { %v374_v50 = vpop.permute.xlu0 %373  ;;  %645 = vst.msk [vmem:[#allocation2 + $0x80] sm:$0xff] %vm628_vm2, %v565_v49  ;;  %v2710_v49 = vld [vmem:[%s3089_s21 + $0x152] sm:$0xff] }
 0x17b   : > { %453 = vst.msk [vmem:[#allocation2 + $0x88] sm:$0xff] %vm435_vm1, %v374_v50  ;;  %1732 = vrot.lane.b32.xlu1 %v2706_v1, %s3044_s28  ;;  %v2679_v50 = vld [vmem:[%s3089_s21 + $0x159] sm:$0xff] }
 0x17c   : > { %1541 = vrot.lane.b32.xlu0 %v2675_v48, %s3043_s14 }
 0x17d   : > { %v1335_v51 = vpop.permute.xlu1 %1334  ;;  %v1834_v54 = vld [vmem:[#allocation2 + $0x68] sm:$0xff] }
 0x17e   : > { %v1143_v53 = vpop.permute.xlu0 %1142  ;;  %1417 = vst.msk [vmem:[#allocation2 + $0x70] sm:$0xff] %vm1402_vm6, %v1335_v51  ;;  %2901 = vmatmul.mubr.msk.f32.gmra.mrb[12].mxu0 %vm1869_vm9, %v1834_v54 }
 0x17f   : > { %1224 = vst.msk [vmem:[#allocation2 + $0x78] sm:$0xff] %vm1208_vm5, %v1143_v53  ;;  %965 = vrot.lane.b32.xlu1 %v2675_v48, %s3040_s25 }
 0x180   : > { %387 = vrot.lane.b32.xlu0 %v2674_v40, %s3038_s23 }
 0x181   : > { %v759_v56 = vpop.permute.xlu1 %758 }
 0x182   : > { %v567_v57 = vpop.permute.xlu0 %566  ;;  %839 = vst.msk [vmem:[#allocation2 + $0x80] sm:$0xff] %vm822_vm3, %v759_v56 }
 0x183   : > { %646 = vst.msk [vmem:[#allocation2 + $0x88] sm:$0xff] %vm628_vm2, %v567_v57  ;;  %1734 = vrot.lane.b32.xlu1 %v2707_v7, %s3044_s28 }
 0x184   : > { %1156 = vrot.lane.b32.xlu0 %v2706_v1, %s3041_s26 }
 0x185   : > { %v1528_v41 = vpop.permute.xlu1 %1527 }
 0x186   : > { %v1337_v13 = vpop.permute.xlu0 %1336  ;;  %1610 = vst.msk [vmem:[#allocation2 + $0x70] sm:$0xff] %vm1595_vm7, %v1528_v41  ;;  %v2711_v41 = vld [vmem:[%s3089_s21 + $0x15a] sm:$0xff] }
 0x187   : > { %1418 = vst.msk [vmem:[#allocation2 + $0x78] sm:$0xff] %vm1402_vm6, %v1337_v13  ;;  %580 = vrot.lane.b32.xlu1 %v2706_v1, %s3037_s22 }
 0x188   : > { %389 = vrot.lane.b32.xlu0 %v2675_v48, %s3038_s23 }
 0x189   : > { %v952_v59 = vpop.permute.xlu1 %951 }
 0x18a   : > { %v761_v60 = vpop.permute.xlu0 %760  ;;  %1032 = vst.msk [vmem:[#allocation2 + $0x80] sm:$0xff] %vm1015_vm4, %v952_v59 }
 0x18b   : > { %840 = vst.msk [vmem:[#allocation2 + $0x88] sm:$0xff] %vm822_vm3, %v761_v60  ;;  %1350 = vrot.lane.b32.xlu1 %v3494_v25, %s3042_s5 }
 0x18c   : > { %1158 = vrot.lane.b32.xlu0 %v2707_v7, %s3041_s26 }
 0x18d   : > { %v1721_v62 = vpop.permute.xlu1 %1720 }
 0x18e   : > { %v1530_v63 = vpop.permute.xlu0 %1529  ;;  %1803 = vst.msk [vmem:[#allocation2 + $0x70] sm:$0xff] %vm1788_vm8, %v1721_v62 }
 0x18f   : > { %1611 = vst.msk [vmem:[#allocation2 + $0x78] sm:$0xff] %vm1595_vm7, %v1530_v63  ;;  %774 = vrot.lane.b32.xlu1 %v3494_v25, %s3039_s24 }
 0x190   : > { %582 = vrot.lane.b32.xlu0 %v2707_v7, %s3037_s22 }
 0x191   : > { %v954_v3 = vpop.permute.xlu1 %953  ;;  %v2884_v5 = vpop.f32.mrb[0].mxu0 }
 0x192   : > { %v376_v4 = vpop.permute.xlu0 %375  ;;  %1033 = vst.msk [vmem:[#allocation2 + $0x88] sm:$0xff] %vm1015_vm4, %v954_v3  ;;  %v2038_v19 = vadd.f32 %v2884_v5, %v3703_v0  ;;  %v2032_v6 = vpop.f32.mrb[1].mxu0  ;;  %v2680_v5 = vld [vmem:[%s3089_s21 + $0x169] sm:$0xff] }
 0x193   : > { %454 = vst.msk [vmem:[#allocation2 + $0x90] sm:$0xff] %vm435_vm1, %v376_v4  ;;  %1543 = vrot.lane.b32.xlu1 %v2676_v2, %s3043_s14  ;;  %v2033_v25 = vadd.f32 %v3703_v0, %v2032_v6 }
 0x194   : > { %1352 = vrot.lane.b32.xlu0 %v3513_v31, %s3042_s5  ;;  %v3718_v45 = vmax.f32 %v2038_v19, 0.0 }
 0x195   : > { %v1723_v8 = vpop.permute.xlu1 %1722  ;;  %v1835_v10 = vld [vmem:[#allocation2 + $0x70] sm:$0xff]  ;;  %v3720_v11 = vmax.f32 %v2033_v25, 0.0 }
 0x196   : > { %v1145_v9 = vpop.permute.xlu0 %1144  ;;  %1804 = vst.msk [vmem:[#allocation2 + $0x78] sm:$0xff] %vm1788_vm8, %v1723_v8  ;;  %2903 = vmatprep.mubr.msk.f32.mxu0 %vm1869_vm9, %v1835_v10  ;;  %v3730_v14 = vmul.f32 %v3718_v45, %v3718_v45 }
 0x197   : > { %1225 = vst.msk [vmem:[#allocation2 + $0x80] sm:$0xff] %vm1208_vm5, %v1145_v9  ;;  %967 = vrot.lane.b32.xlu1 %v2676_v2, %s3040_s25  ;;  %v3740_v15 = vmul.f32 %v3720_v11, %v3720_v11  ;;  %v2948_v47 = vpack.c.bf16 %v3718_v45, %v3720_v11 }
 0x198   : > { %2224 = vst.msk [vmem:[%s3715_s11 + $0x8] sm:$0xff] %vm242_vm0, %v3718_v45  ;;  %776 = vrot.lane.b32.xlu0 %v3513_v31, %s3039_s24  ;;  %2223 = vst.msk [vmem:[%s3715_s11] sm:$0xff] %vm242_vm0, %v3720_v11 }
 0x199   : > { %v569_v37 = vpop.permute.xlu1 %568  ;;  %v2980_v31 = vpack.c.bf16 %v3730_v14, %v3740_v15 }
 0x19a   : > { %v378_v20 = vpop.permute.xlu0 %377  ;;  %647 = vst.msk [vmem:[#allocation2 + $0x90] sm:$0xff] %vm628_vm2, %v569_v37 }
 0x19b   : > { %455 = vst.msk [vmem:[#allocation2 + $0x98] sm:$0xff] %vm435_vm1, %v378_v20  ;;  %1736 = vrot.lane.b32.xlu1 %v2708_v16, %s3044_s28 }
 0x19c   : > { %1545 = vrot.lane.b32.xlu0 %v2677_v17, %s3043_s14 }
 0x19d   : > { %v1339_v21 = vpop.permute.xlu1 %1338  ;;  %v1836_v23 = vld [vmem:[#allocation2 + $0x78] sm:$0xff] }
 0x19e   : > { %v1147_v22 = vpop.permute.xlu0 %1146  ;;  %1419 = vst.msk [vmem:[#allocation2 + $0x80] sm:$0xff] %vm1402_vm6, %v1339_v21  ;;  %2904 = vmatmul.mubr.msk.f32.gmra.mrb[14].mxu0 %vm1869_vm9, %v1836_v23  ;;  %v2712_v23 = vld [vmem:[%s3089_s21 + $0x16a] sm:$0xff] }
 0x19f   : > { %1226 = vst.msk [vmem:[#allocation2 + $0x88] sm:$0xff] %vm1208_vm5, %v1147_v22  ;;  %969 = vrot.lane.b32.xlu1 %v2677_v17, %s3040_s25 }
 0x1a0   : > { %391 = vrot.lane.b32.xlu0 %v2676_v2, %s3038_s23 }
 0x1a1   : > { %v763_v26 = vpop.permute.xlu1 %762 }
 0x1a2   : > { %v571_v27 = vpop.permute.xlu0 %570  ;;  %841 = vst.msk [vmem:[#allocation2 + $0x90] sm:$0xff] %vm822_vm3, %v763_v26 }
 0x1a3   : > { %648 = vst.msk [vmem:[#allocation2 + $0x98] sm:$0xff] %vm628_vm2, %v571_v27  ;;  %1738 = vrot.lane.b32.xlu1 %v2709_v24, %s3044_s28 }
 0x1a4   : > { %1160 = vrot.lane.b32.xlu0 %v2708_v16, %s3041_s26 }
 0x1a5   : > { %v1532_v28 = vpop.permute.xlu1 %1531 }
 0x1a6   : > { %v1341_v29 = vpop.permute.xlu0 %1340  ;;  %1612 = vst.msk [vmem:[#allocation2 + $0x80] sm:$0xff] %vm1595_vm7, %v1532_v28 }
 0x1a7   : > { %1420 = vst.msk [vmem:[#allocation2 + $0x88] sm:$0xff] %vm1402_vm6, %v1341_v29  ;;  %584 = vrot.lane.b32.xlu1 %v2708_v16, %s3037_s22 }
 0x1a8   : > { %393 = vrot.lane.b32.xlu0 %v2677_v17, %s3038_s23 }
 0x1a9   : > { %v956_v46 = vpop.permute.xlu1 %955 }
 0x1aa   : > { %v765_v30 = vpop.permute.xlu0 %764  ;;  %1034 = vst.msk [vmem:[#allocation2 + $0x90] sm:$0xff] %vm1015_vm4, %v956_v46 }
 0x1ab   : > { %842 = vst.msk [vmem:[#allocation2 + $0x98] sm:$0xff] %vm822_vm3, %v765_v30  ;;  %1354 = vrot.lane.b32.xlu1 %v3546_v52, %s3042_s5 }
 0x1ac   : > { %1162 = vrot.lane.b32.xlu0 %v2709_v24, %s3041_s26 }
 0x1ad   : > { %v1725_v55 = vpop.permute.xlu1 %1724 }
 0x1ae   : > { %v1534_v32 = vpop.permute.xlu0 %1533  ;;  %1805 = vst.msk [vmem:[#allocation2 + $0x80] sm:$0xff] %vm1788_vm8, %v1725_v55  ;;  %v2713_v55 = vld [vmem:[%s3089_s21 + $0x172] sm:$0xff] }
 0x1af   : > { %1613 = vst.msk [vmem:[#allocation2 + $0x88] sm:$0xff] %vm1595_vm7, %v1534_v32  ;;  %778 = vrot.lane.b32.xlu1 %v3546_v52, %s3039_s24 }
 0x1b0   : > { %586 = vrot.lane.b32.xlu0 %v2709_v24, %s3037_s22  ;;  %v2681_v24 = vld [vmem:[%s3089_s21 + $0x171] sm:$0xff] }
 0x1b1   : > { %v958_v34 = vpop.permute.xlu1 %957  ;;  %v2887_v36 = vpop.f32.mrb[2].mxu0 }
 0x1b2   : > { %v380_v35 = vpop.permute.xlu0 %379  ;;  %1035 = vst.msk [vmem:[#allocation2 + $0x98] sm:$0xff] %vm1015_vm4, %v958_v34  ;;  %v2048_v38 = vadd.f32 %v2887_v36, %v3703_v0  ;;  %v2042_v40 = vpop.f32.mrb[3].mxu0  ;;  %v2650_v36 = vld [vmem:[%s3089_s21 + $0x180] sm:$0xff] }
 0x1b3   : > { %456 = vst.msk [vmem:[#allocation2 + $0xa0] sm:$0xff] %vm435_vm1, %v380_v35  ;;  %1547 = vrot.lane.b32.xlu1 %v2678_v33, %s3043_s14  ;;  %v2043_v52 = vadd.f32 %v3703_v0, %v2042_v40 }
 0x1b4   : > { %1356 = vrot.lane.b32.xlu0 %v3565_v58, %s3042_s5  ;;  %v3784_v42 = vmax.f32 %v2048_v38, 0.0 }
 0x1b5   : > { %v1727_v43 = vpop.permute.xlu1 %1726  ;;  %v1837_v44 = vld [vmem:[#allocation2 + $0x80] sm:$0xff]  ;;  %v3786_v39 = vmax.f32 %v2043_v52, 0.0 }
 0x1b6   : > { %v1149_v61 = vpop.permute.xlu0 %1148  ;;  %1806 = vst.msk [vmem:[#allocation2 + $0x88] sm:$0xff] %vm1788_vm8, %v1727_v43  ;;  %2906 = vmatprep.mubr.msk.f32.mxu0 %vm1869_vm9, %v1837_v44  ;;  %v3796_v1 = vmul.f32 %v3784_v42, %v3784_v42  ;;  %v2682_v44 = vld [vmem:[%s3089_s21 + $0x181] sm:$0xff] }
 0x1b7   : > { %1227 = vst.msk [vmem:[#allocation2 + $0x90] sm:$0xff] %vm1208_vm5, %v1149_v61  ;;  %971 = vrot.lane.b32.xlu1 %v2678_v33, %s3040_s25  ;;  %v3806_v48 = vmul.f32 %v3786_v39, %v3786_v39  ;;  %v2952_v51 = vpack.c.bf16 %v3784_v42, %v3786_v39  ;;  %v2651_v61 = vld [vmem:[%s3089_s21 + $0x188] sm:$0xff] }
 0x1b8   : > { %2226 = vst.msk [vmem:[%s3715_s11 + $0x18] sm:$0xff] %vm242_vm0, %v3784_v42  ;;  %780 = vrot.lane.b32.xlu0 %v3565_v58, %s3039_s24  ;;  %2225 = vst.msk [vmem:[%s3715_s11 + $0x10] sm:$0xff] %vm242_vm0, %v3786_v39 }
 0x1b9   : > { %v573_v53 = vpop.permute.xlu1 %572  ;;  %v2984_v58 = vpack.c.bf16 %v3796_v1, %v3806_v48 }
 0x1ba   : > { %v382_v54 = vpop.permute.xlu0 %381  ;;  %649 = vst.msk [vmem:[#allocation2 + $0xa0] sm:$0xff] %vm628_vm2, %v573_v53 }
 0x1bb   : > { %457 = vst.msk [vmem:[#allocation2 + $0xa8] sm:$0xff] %vm435_vm1, %v382_v54  ;;  %1740 = vrot.lane.b32.xlu1 %v2710_v49, %s3044_s28 }
 0x1bc   : > { %1549 = vrot.lane.b32.xlu0 %v2679_v50, %s3043_s14 }
 0x1bd   : > { %v1343_v7 = vpop.permute.xlu1 %1342  ;;  %v1838_v57 = vld [vmem:[#allocation2 + $0x88] sm:$0xff] }
 0x1be   : > { %v1151_v56 = vpop.permute.xlu0 %1150  ;;  %1421 = vst.msk [vmem:[#allocation2 + $0x90] sm:$0xff] %vm1402_vm6, %v1343_v7  ;;  %2907 = vmatmul.mubr.msk.f32.gmra.mrb[16].mxu0 %vm1869_vm9, %v1838_v57 }
 0x1bf   : > { %1228 = vst.msk [vmem:[#allocation2 + $0x98] sm:$0xff] %vm1208_vm5, %v1151_v56  ;;  %973 = vrot.lane.b32.xlu1 %v2679_v50, %s3040_s25 }
 0x1c0   : > { %395 = vrot.lane.b32.xlu0 %v2678_v33, %s3038_s23 }
 0x1c1   : > { %v767_v13 = vpop.permute.xlu1 %766 }
 0x1c2   : > { %v575_v59 = vpop.permute.xlu0 %574  ;;  %843 = vst.msk [vmem:[#allocation2 + $0xa0] sm:$0xff] %vm822_vm3, %v767_v13 }
 0x1c3   : > { %650 = vst.msk [vmem:[#allocation2 + $0xa8] sm:$0xff] %vm628_vm2, %v575_v59  ;;  %1742 = vrot.lane.b32.xlu1 %v2711_v41, %s3044_s28 }
 0x1c4   : > { %1164 = vrot.lane.b32.xlu0 %v2710_v49, %s3041_s26 }
 0x1c5   : > { %v1536_v60 = vpop.permute.xlu1 %1535 }
 0x1c6   : > { %v1345_v62 = vpop.permute.xlu0 %1344  ;;  %1614 = vst.msk [vmem:[#allocation2 + $0x90] sm:$0xff] %vm1595_vm7, %v1536_v60 }
 0x1c7   : > { %1422 = vst.msk [vmem:[#allocation2 + $0x98] sm:$0xff] %vm1402_vm6, %v1345_v62  ;;  %588 = vrot.lane.b32.xlu1 %v2710_v49, %s3037_s22 }
 0x1c8   : > { %397 = vrot.lane.b32.xlu0 %v2679_v50, %s3038_s23 }
 0x1c9   : > { %v960_v63 = vpop.permute.xlu1 %959 }
 0x1ca   : > { %v769_v2 = vpop.permute.xlu0 %768  ;;  %1036 = vst.msk [vmem:[#allocation2 + $0xa0] sm:$0xff] %vm1015_vm4, %v960_v63 }
 0x1cb   : > { %844 = vst.msk [vmem:[#allocation2 + $0xa8] sm:$0xff] %vm822_vm3, %v769_v2  ;;  %1358 = vrot.lane.b32.xlu1 %v3598_v12, %s3042_s5  ;;  %v2683_v2 = vld [vmem:[%s3089_s21 + $0x189] sm:$0xff] }
 0x1cc   : > { %1166 = vrot.lane.b32.xlu0 %v2711_v41, %s3041_s26 }
 0x1cd   : > { %v1729_v3 = vpop.permute.xlu1 %1728 }
 0x1ce   : > { %v1538_v4 = vpop.permute.xlu0 %1537  ;;  %1807 = vst.msk [vmem:[#allocation2 + $0x90] sm:$0xff] %vm1788_vm8, %v1729_v3  ;;  %v2714_v3 = vld [vmem:[%s3089_s21 + $0x182] sm:$0xff] }
 0x1cf   : > { %1615 = vst.msk [vmem:[#allocation2 + $0x98] sm:$0xff] %vm1595_vm7, %v1538_v4  ;;  %782 = vrot.lane.b32.xlu1 %v3598_v12, %s3039_s24 }
 0x1d0   : > { %590 = vrot.lane.b32.xlu0 %v2711_v41, %s3037_s22 }
 0x1d1   : > { %v962_v19 = vpop.permute.xlu1 %961  ;;  %v2890_v25 = vpop.f32.mrb[4].mxu0 }
 0x1d2   : > { %v384_v6 = vpop.permute.xlu0 %383  ;;  %1037 = vst.msk [vmem:[#allocation2 + $0xa8] sm:$0xff] %vm1015_vm4, %v962_v19  ;;  %v2058_v8 = vadd.f32 %v2890_v25, %v3703_v0  ;;  %v2052_v9 = vpop.f32.mrb[5].mxu0 }
 0x1d3   : > { %458 = vst.msk [vmem:[#allocation2 + $0xb0] sm:$0xff] %vm435_vm1, %v384_v6  ;;  %1551 = vrot.lane.b32.xlu1 %v2680_v5, %s3043_s14  ;;  %v2053_v12 = vadd.f32 %v3703_v0, %v2052_v9 }
 0x1d4   : > { %1360 = vrot.lane.b32.xlu0 %v3617_v18, %s3042_s5  ;;  %v3850_v10 = vmax.f32 %v2058_v8, 0.0 }
 0x1d5   : > { %v1731_v16 = vpop.permute.xlu1 %1730  ;;  %v1839_v37 = vld [vmem:[#allocation2 + $0x90] sm:$0xff]  ;;  %v3852_v20 = vmax.f32 %v2053_v12, 0.0 }
 0x1d6   : > { %v1153_v17 = vpop.permute.xlu0 %1152  ;;  %1808 = vst.msk [vmem:[#allocation2 + $0x98] sm:$0xff] %vm1788_vm8, %v1731_v16  ;;  %2909 = vmatprep.mubr.msk.f32.mxu0 %vm1869_vm9, %v1839_v37  ;;  %v3862_v21 = vmul.f32 %v3850_v10, %v3850_v10  ;;  %v2715_v12 = vld [vmem:[%s3089_s21 + $0x18a] sm:$0xff]  ;;  %v2652_v37 = vld [vmem:[%s3089_s21 + $0x198] sm:$0xff] }
 0x1d7   : > { %1229 = vst.msk [vmem:[#allocation2 + $0xa0] sm:$0xff] %vm1208_vm5, %v1153_v17  ;;  %975 = vrot.lane.b32.xlu1 %v2680_v5, %s3040_s25  ;;  %v3872_v22 = vmul.f32 %v3852_v20, %v3852_v20  ;;  %v2956_v26 = vpack.c.bf16 %v3850_v10, %v3852_v20 }
 0x1d8   : > { %2228 = vst.msk [vmem:[%s3715_s11 + $0x28] sm:$0xff] %vm242_vm0, %v3850_v10  ;;  %784 = vrot.lane.b32.xlu0 %v3617_v18, %s3039_s24  ;;  %2227 = vst.msk [vmem:[%s3715_s11 + $0x20] sm:$0xff] %vm242_vm0, %v3852_v20 }
 0x1d9   : > { %v577_v27 = vpop.permute.xlu1 %576  ;;  %v2988_v18 = vpack.c.bf16 %v3862_v21, %v3872_v22 }
 0x1da   : > { %v386_v28 = vpop.permute.xlu0 %385  ;;  %651 = vst.msk [vmem:[#allocation2 + $0xb0] sm:$0xff] %vm628_vm2, %v577_v27 }
 0x1db   : > { %459 = vst.msk [vmem:[#allocation2 + $0xb8] sm:$0xff] %vm435_vm1, %v386_v28  ;;  %1744 = vrot.lane.b32.xlu1 %v2712_v23, %s3044_s28  ;;  %v2684_v28 = vld [vmem:[%s3089_s21 + $0x199] sm:$0xff] }
 0x1dc   : > { %1553 = vrot.lane.b32.xlu0 %v2681_v24, %s3043_s14 }
 0x1dd   : > { %v1347_v29 = vpop.permute.xlu1 %1346  ;;  %v1840_v30 = vld [vmem:[#allocation2 + $0x98] sm:$0xff] }
 0x1de   : > { %v1155_v46 = vpop.permute.xlu0 %1154  ;;  %1423 = vst.msk [vmem:[#allocation2 + $0xa0] sm:$0xff] %vm1402_vm6, %v1347_v29  ;;  %2910 = vmatmul.mubr.msk.f32.gmra.mrb[18].mxu0 %vm1869_vm9, %v1840_v30  ;;  %v2685_v29 = vld [vmem:[%s3089_s21 + $0x1a1] sm:$0xff] }
 0x1df   : > { %1230 = vst.msk [vmem:[#allocation2 + $0xa8] sm:$0xff] %vm1208_vm5, %v1155_v46  ;;  %977 = vrot.lane.b32.xlu1 %v2681_v24, %s3040_s25 }
 0x1e0   : > { %399 = vrot.lane.b32.xlu0 %v2680_v5, %s3038_s23 }
 0x1e1   : > { %v771_v32 = vpop.permute.xlu1 %770 }
 0x1e2   : > { %v579_v33 = vpop.permute.xlu0 %578  ;;  %845 = vst.msk [vmem:[#allocation2 + $0xb0] sm:$0xff] %vm822_vm3, %v771_v32  ;;  %v2717_v32 = vld [vmem:[%s3089_s21 + $0x1a2] sm:$0xff] }
 0x1e3   : > { %652 = vst.msk [vmem:[#allocation2 + $0xb8] sm:$0xff] %vm628_vm2, %v579_v33  ;;  %1746 = vrot.lane.b32.xlu1 %v2713_v55, %s3044_s28 }
 0x1e4   : > { %1168 = vrot.lane.b32.xlu0 %v2712_v23, %s3041_s26 }
 0x1e5   : > { %v1540_v34 = vpop.permute.xlu1 %1539 }
 0x1e6   : > { %v1349_v35 = vpop.permute.xlu0 %1348  ;;  %1616 = vst.msk [vmem:[#allocation2 + $0xa0] sm:$0xff] %vm1595_vm7, %v1540_v34 }
 0x1e7   : > { %1424 = vst.msk [vmem:[#allocation2 + $0xa8] sm:$0xff] %vm1402_vm6, %v1349_v35  ;;  %592 = vrot.lane.b32.xlu1 %v2712_v23, %s3037_s22  ;;  %v2653_v23 = vld [vmem:[%s3089_s21 + $0x1a0] sm:$0xff] }
 0x1e8   : > { %401 = vrot.lane.b32.xlu0 %v2681_v24, %s3038_s23  ;;  %s2525_s23 = sshll.u32 %s3083_s17, 1 }
 0x1e9   : > { %v964_v38 = vpop.permute.xlu1 %963 }
 0x1ea   : > { %v773_v40 = vpop.permute.xlu0 %772  ;;  %1038 = vst.msk [vmem:[#allocation2 + $0xb0] sm:$0xff] %vm1015_vm4, %v964_v38 }
 0x1eb   : > { %846 = vst.msk [vmem:[#allocation2 + $0xb8] sm:$0xff] %vm822_vm3, %v773_v40  ;;  %1362 = vrot.lane.b32.xlu1 %v2650_v36, %s3042_s5 }
 0x1ec   : > { %1170 = vrot.lane.b32.xlu0 %v2713_v55, %s3041_s26 }
 0x1ed   : > { %v1733_v52 = vpop.permute.xlu1 %1732 }
 0x1ee   : > { %v1542_v43 = vpop.permute.xlu0 %1541  ;;  %1809 = vst.msk [vmem:[#allocation2 + $0xa0] sm:$0xff] %vm1788_vm8, %v1733_v52 }
 0x1ef   : > { %1617 = vst.msk [vmem:[#allocation2 + $0xa8] sm:$0xff] %vm1595_vm7, %v1542_v43  ;;  %786 = vrot.lane.b32.xlu1 %v2650_v36, %s3039_s24 }
 0x1f0   : > { %594 = vrot.lane.b32.xlu0 %v2713_v55, %s3037_s22  ;;  %v2716_v55 = vld [vmem:[%s3089_s21 + $0x19a] sm:$0xff] }
 0x1f1   : > { %v966_v49 = vpop.permute.xlu1 %965  ;;  %v2893_v53 = vpop.f32.mrb[6].mxu0 }
 0x1f2   : > { %v388_v50 = vpop.permute.xlu0 %387  ;;  %1039 = vst.msk [vmem:[#allocation2 + $0xb8] sm:$0xff] %vm1015_vm4, %v966_v49  ;;  %v2068_v54 = vadd.f32 %v2893_v53, %v3703_v0  ;;  %v2062_v7 = vpop.f32.mrb[7].mxu0 }
 0x1f3   : > { %460 = vst.msk [vmem:[#allocation2 + $0xc0] sm:$0xff] %vm435_vm1, %v388_v50  ;;  %1555 = vrot.lane.b32.xlu1 %v2682_v44, %s3043_s14  ;;  %v2063_v56 = vadd.f32 %v3703_v0, %v2062_v7 }
 0x1f4   : > { %1364 = vrot.lane.b32.xlu0 %v2651_v61, %s3042_s5  ;;  %v3915_v57 = vmax.f32 %v2068_v54, 0.0 }
 0x1f5   : > { %v1735_v41 = vpop.permute.xlu1 %1734  ;;  %v1841_v59 = vld [vmem:[#allocation2 + $0xa0] sm:$0xff]  ;;  %v3917_v60 = vmax.f32 %v2063_v56, 0.0 }
 0x1f6   : > { %v1157_v13 = vpop.permute.xlu0 %1156  ;;  %1810 = vst.msk [vmem:[#allocation2 + $0xa8] sm:$0xff] %vm1788_vm8, %v1735_v41  ;;  %2912 = vmatprep.mubr.msk.f32.mxu0 %vm1869_vm9, %v1841_v59  ;;  %v3927_v62 = vmul.f32 %v3915_v57, %v3915_v57 }
 0x1f7   : > { %1231 = vst.msk [vmem:[#allocation2 + $0xb0] sm:$0xff] %vm1208_vm5, %v1157_v13  ;;  %979 = vrot.lane.b32.xlu1 %v2682_v44, %s3040_s25  ;;  %v3936_v63 = vmul.f32 %v3917_v60, %v3917_v60  ;;  %v2960_v4 = vpack.c.bf16 %v3915_v57, %v3917_v60 }
 0x1f8   : > { %2230 = vst.msk [vmem:[%s3715_s11 + $0x38] sm:$0xff] %vm242_vm0, %v3915_v57  ;;  %788 = vrot.lane.b32.xlu0 %v2651_v61, %s3039_s24  ;;  %2229 = vst.msk [vmem:[%s3715_s11 + $0x30] sm:$0xff] %vm242_vm0, %v3917_v60 }
 0x1f9   : > { %v581_v5 = vpop.permute.xlu1 %580  ;;  %v2992_v6 = vpack.c.bf16 %v3927_v62, %v3936_v63 }
 0x1fa   : > { %v390_v19 = vpop.permute.xlu0 %389  ;;  %653 = vst.msk [vmem:[#allocation2 + $0xc0] sm:$0xff] %vm628_vm2, %v581_v5 }
 0x1fb   : > { %461 = vst.msk [vmem:[#allocation2 + $0xc8] sm:$0xff] %vm435_vm1, %v390_v19  ;;  %1748 = vrot.lane.b32.xlu1 %v2714_v3, %s3044_s28 }
 0x1fc   : > { %1557 = vrot.lane.b32.xlu0 %v2683_v2, %s3043_s14 }
 0x1fd   : > { %v1351_v25 = vpop.permute.xlu1 %1350  ;;  %v1842_v9 = vld [vmem:[#allocation2 + $0xa8] sm:$0xff] }
 0x1fe   : > { %v1159_v8 = vpop.permute.xlu0 %1158  ;;  %1425 = vst.msk [vmem:[#allocation2 + $0xb0] sm:$0xff] %vm1402_vm6, %v1351_v25  ;;  %2913 = vmatmul.mubr.msk.f32.gmra.mrb[20].mxu0 %vm1869_vm9, %v1842_v9 }
 0x1ff   : > { %1232 = vst.msk [vmem:[#allocation2 + $0xb8] sm:$0xff] %vm1208_vm5, %v1159_v8  ;;  %1172 = vrot.lane.b32.xlu1 %v2714_v3, %s3041_s26 }
 0x200   : > { %981 = vrot.lane.b32.xlu0 %v2683_v2, %s3040_s25 }
 0x201   : > { %v775_v16 = vpop.permute.xlu1 %774 }
 0x202   : > { %v583_v17 = vpop.permute.xlu0 %582  ;;  %847 = vst.msk [vmem:[#allocation2 + $0xc0] sm:$0xff] %vm822_vm3, %v775_v16 }
 0x203   : > { %654 = vst.msk [vmem:[#allocation2 + $0xc8] sm:$0xff] %vm628_vm2, %v583_v17  ;;  %1174 = vrot.lane.b32.xlu1 %v2715_v12, %s3041_s26  ;;  %s209_s26 = scalar_lea.vmem %s4280_s4, %s2525_s23 }
 0x204   : > { %1750 = vrot.lane.b32.xlu0 %v2715_v12, %s3044_s28 }
 0x205   : > { %v1544_v24 = vpop.permute.xlu1 %1543 }
 0x206   : > { %v1353_v27 = vpop.permute.xlu0 %1352  ;;  %1618 = vst.msk [vmem:[#allocation2 + $0xb0] sm:$0xff] %vm1595_vm7, %v1544_v24 }
 0x207   : > { %1426 = vst.msk [vmem:[#allocation2 + $0xb8] sm:$0xff] %vm1402_vm6, %v1353_v27  ;;  %1368 = vrot.lane.b32.xlu1 %v2653_v23, %s3042_s5 }
 0x208   : > { %1366 = vrot.lane.b32.xlu0 %v2652_v37, %s3042_s5 }
 0x209   : > { %v968_v46 = vpop.permute.xlu1 %967 }
 0x20a   : > { %v777_v30 = vpop.permute.xlu0 %776  ;;  %1040 = vst.msk [vmem:[#allocation2 + $0xc0] sm:$0xff] %vm1015_vm4, %v968_v46 }
 0x20b   : > { %848 = vst.msk [vmem:[#allocation2 + $0xc8] sm:$0xff] %vm822_vm3, %v777_v30  ;;  %1561 = vrot.lane.b32.xlu1 %v2685_v29, %s3043_s14 }
 0x20c   : > { %1559 = vrot.lane.b32.xlu0 %v2684_v28, %s3043_s14 }
 0x20d   : > { %v1737_v33 = vpop.permute.xlu1 %1736 }
 0x20e   : > { %v1546_v34 = vpop.permute.xlu0 %1545  ;;  %1811 = vst.msk [vmem:[#allocation2 + $0xb0] sm:$0xff] %vm1788_vm8, %v1737_v33 }
 0x20f   : > { %1619 = vst.msk [vmem:[#allocation2 + $0xb8] sm:$0xff] %vm1595_vm7, %v1546_v34  ;;  %1754 = vrot.lane.b32.xlu1 %v2717_v32, %s3044_s28 }
 0x210   : > { %1752 = vrot.lane.b32.xlu0 %v2716_v55, %s3044_s28 }
 0x211   : > { %v970_v35 = vpop.permute.xlu1 %969  ;;  %v2896_v38 = vpop.f32.mrb[8].mxu0 }
 0x212   : > { %v392_v36 = vpop.permute.xlu0 %391  ;;  %1041 = vst.msk [vmem:[#allocation2 + $0xc8] sm:$0xff] %vm1015_vm4, %v970_v35  ;;  %v2078_v40 = vadd.f32 %v2896_v38, %v3703_v0  ;;  %v2072_v52 = vpop.f32.mrb[9].mxu0 }
 0x213   : > { %462 = vst.msk [vmem:[#allocation2 + $0xd0] sm:$0xff] %vm435_vm1, %v392_v36  ;;  %v2073_v43 = vadd.f32 %v3703_v0, %v2072_v52 }
 0x214   : > { %v3980_v61 = vmax.f32 %v2078_v40, 0.0 }
 0x215   : > { %v1739_v44 = vpop.permute.xlu1 %1738  ;;  %v1843_v50 = vld [vmem:[#allocation2 + $0xb0] sm:$0xff]  ;;  %v3982_v53 = vmax.f32 %v2073_v43, 0.0 }
 0x216   : > { %v1161_v49 = vpop.permute.xlu0 %1160  ;;  %1812 = vst.msk [vmem:[#allocation2 + $0xb8] sm:$0xff] %vm1788_vm8, %v1739_v44  ;;  %2915 = vmatprep.mubr.msk.f32.mxu0 %vm1869_vm9, %v1843_v50  ;;  %v3992_v54 = vmul.f32 %v3980_v61, %v3980_v61 }
 0x217   : > { %1233 = vst.msk [vmem:[#allocation2 + $0xc0] sm:$0xff] %vm1208_vm5, %v1161_v49  ;;  %v3999_v7 = vmul.f32 %v3982_v53, %v3982_v53  ;;  %v2964_v56 = vpack.c.bf16 %v3980_v61, %v3982_v53 }
 0x218   : > { %2232 = vst.msk [vmem:[%s3715_s11 + $0x48] sm:$0xff] %vm242_vm0, %v3980_v61  ;;  %2231 = vst.msk [vmem:[%s3715_s11 + $0x40] sm:$0xff] %vm242_vm0, %v3982_v53 }
 0x219   : > { %v585_v41 = vpop.permute.xlu1 %584  ;;  %v2996_v59 = vpack.c.bf16 %v3992_v54, %v3999_v7 }
 0x21a   : > { %v394_v13 = vpop.permute.xlu0 %393  ;;  %655 = vst.msk [vmem:[#allocation2 + $0xd0] sm:$0xff] %vm628_vm2, %v585_v41 }
 0x21b   : > { %463 = vst.msk [vmem:[#allocation2 + $0xd8] sm:$0xff] %vm435_vm1, %v394_v13 }
 0x21d   : > { %v1355_v2 = vpop.permute.xlu1 %1354  ;;  %v1844_v5 = vld [vmem:[#allocation2 + $0xb8] sm:$0xff] }
 0x21e   : > { %v1163_v3 = vpop.permute.xlu0 %1162  ;;  %1427 = vst.msk [vmem:[#allocation2 + $0xc0] sm:$0xff] %vm1402_vm6, %v1355_v2  ;;  %2916 = vmatmul.mubr.msk.f32.gmra.mrb[22].mxu0 %vm1869_vm9, %v1844_v5 }
 0x21f   : > { %1234 = vst.msk [vmem:[#allocation2 + $0xc8] sm:$0xff] %vm1208_vm5, %v1163_v3 }
 0x221   : > { %v779_v19 = vpop.permute.xlu1 %778 }
 0x222   : > { %v587_v25 = vpop.permute.xlu0 %586  ;;  %849 = vst.msk [vmem:[#allocation2 + $0xd0] sm:$0xff] %vm822_vm3, %v779_v19 }
 0x223   : > { %656 = vst.msk [vmem:[#allocation2 + $0xd8] sm:$0xff] %vm628_vm2, %v587_v25 }
 0x225   : > { %v1548_v8 = vpop.permute.xlu1 %1547 }
 0x226   : > { %v1357_v9 = vpop.permute.xlu0 %1356  ;;  %1620 = vst.msk [vmem:[#allocation2 + $0xc0] sm:$0xff] %vm1595_vm7, %v1548_v8 }
 0x227   : > { %1428 = vst.msk [vmem:[#allocation2 + $0xc8] sm:$0xff] %vm1402_vm6, %v1357_v9 }
 0x229   : > { %v972_v12 = vpop.permute.xlu1 %971 }
 0x22a   : > { %v781_v16 = vpop.permute.xlu0 %780  ;;  %1042 = vst.msk [vmem:[#allocation2 + $0xd0] sm:$0xff] %vm1015_vm4, %v972_v12 }
 0x22b   : > { %850 = vst.msk [vmem:[#allocation2 + $0xd8] sm:$0xff] %vm822_vm3, %v781_v16 }
 0x22d   : > { %v1741_v17 = vpop.permute.xlu1 %1740 }
 0x22e   : > { %v1550_v37 = vpop.permute.xlu0 %1549  ;;  %1813 = vst.msk [vmem:[#allocation2 + $0xc0] sm:$0xff] %vm1788_vm8, %v1741_v17 }
 0x22f   : > { %1621 = vst.msk [vmem:[#allocation2 + $0xc8] sm:$0xff] %vm1595_vm7, %v1550_v37 }
 0x231   : > { %v974_v23 = vpop.permute.xlu1 %973  ;;  %v2899_v27 = vpop.f32.mrb[10].mxu0 }
 0x232   : > { %v396_v24 = vpop.permute.xlu0 %395  ;;  %1043 = vst.msk [vmem:[#allocation2 + $0xd8] sm:$0xff] %vm1015_vm4, %v974_v23  ;;  %v2088_v28 = vadd.f32 %v2899_v27, %v3703_v0  ;;  %v2082_v29 = vpop.f32.mrb[11].mxu0 }
 0x233   : > { %464 = vst.msk [vmem:[#allocation2 + $0xe0] sm:$0xff] %vm435_vm1, %v396_v24  ;;  %v2083_v46 = vadd.f32 %v3703_v0, %v2082_v29 }
 0x234   : > { %v4022_v30 = vmax.f32 %v2088_v28, 0.0 }
 0x235   : > { %v1743_v55 = vpop.permute.xlu1 %1742  ;;  %v1845_v33 = vld [vmem:[#allocation2 + $0xc0] sm:$0xff]  ;;  %v4024_v34 = vmax.f32 %v2083_v46, 0.0 }
 0x236   : > { %v1165_v32 = vpop.permute.xlu0 %1164  ;;  %1814 = vst.msk [vmem:[#allocation2 + $0xc8] sm:$0xff] %vm1788_vm8, %v1743_v55  ;;  %2918 = vmatprep.mubr.msk.f32.mxu0 %vm1869_vm9, %v1845_v33  ;;  %v4034_v35 = vmul.f32 %v4022_v30, %v4022_v30 }
 0x237   : > { %1235 = vst.msk [vmem:[#allocation2 + $0xd0] sm:$0xff] %vm1208_vm5, %v1165_v32  ;;  %v4041_v36 = vmul.f32 %v4024_v34, %v4024_v34  ;;  %v2968_v38 = vpack.c.bf16 %v4022_v30, %v4024_v34 }
 0x238   : > { %2234 = vst.msk [vmem:[%s3715_s11 + $0x58] sm:$0xff] %vm242_vm0, %v4022_v30  ;;  %2233 = vst.msk [vmem:[%s3715_s11 + $0x50] sm:$0xff] %vm242_vm0, %v4024_v34 }
 0x239   : > { %v589_v40 = vpop.permute.xlu1 %588  ;;  %v3000_v43 = vpack.c.bf16 %v4034_v35, %v4041_v36 }
 0x23a   : > { %v398_v52 = vpop.permute.xlu0 %397  ;;  %657 = vst.msk [vmem:[#allocation2 + $0xe0] sm:$0xff] %vm628_vm2, %v589_v40 }
 0x23b   : > { %465 = vst.msk [vmem:[#allocation2 + $0xe8] sm:$0xff] %vm435_vm1, %v398_v52 }
 0x23d   : > { %v1359_v44 = vpop.permute.xlu1 %1358  ;;  %v1846_v50 = vld [vmem:[#allocation2 + $0xc8] sm:$0xff] }
 0x23e   : > { %v1167_v49 = vpop.permute.xlu0 %1166  ;;  %1429 = vst.msk [vmem:[#allocation2 + $0xd0] sm:$0xff] %vm1402_vm6, %v1359_v44  ;;  %2919 = vmatmul.mubr.msk.f32.gmra.mrb[24].mxu0 %vm1869_vm9, %v1846_v50 }
 0x23f   : > { %1236 = vst.msk [vmem:[#allocation2 + $0xd8] sm:$0xff] %vm1208_vm5, %v1167_v49 }
 0x241   : > { %v783_v41 = vpop.permute.xlu1 %782 }
 0x242   : > { %v591_v13 = vpop.permute.xlu0 %590  ;;  %851 = vst.msk [vmem:[#allocation2 + $0xe0] sm:$0xff] %vm822_vm3, %v783_v41 }
 0x243   : > { %658 = vst.msk [vmem:[#allocation2 + $0xe8] sm:$0xff] %vm628_vm2, %v591_v13 }
 0x245   : > { %v1552_v2 = vpop.permute.xlu1 %1551 }
 0x246   : > { %v1361_v3 = vpop.permute.xlu0 %1360  ;;  %1622 = vst.msk [vmem:[#allocation2 + $0xd0] sm:$0xff] %vm1595_vm7, %v1552_v2 }
 0x247   : > { %1430 = vst.msk [vmem:[#allocation2 + $0xd8] sm:$0xff] %vm1402_vm6, %v1361_v3 }
 0x249   : > { %v976_v5 = vpop.permute.xlu1 %975 }
 0x24a   : > { %v785_v19 = vpop.permute.xlu0 %784  ;;  %1044 = vst.msk [vmem:[#allocation2 + $0xe0] sm:$0xff] %vm1015_vm4, %v976_v5 }
 0x24b   : > { %852 = vst.msk [vmem:[#allocation2 + $0xe8] sm:$0xff] %vm822_vm3, %v785_v19 }
 0x24d   : > { %v1745_v25 = vpop.permute.xlu1 %1744 }
 0x24e   : > { %v1554_v8 = vpop.permute.xlu0 %1553  ;;  %1815 = vst.msk [vmem:[#allocation2 + $0xd0] sm:$0xff] %vm1788_vm8, %v1745_v25 }
 0x24f   : > { %1623 = vst.msk [vmem:[#allocation2 + $0xd8] sm:$0xff] %vm1595_vm7, %v1554_v8 }
 0x251   : > { %v978_v9 = vpop.permute.xlu1 %977  ;;  %v2902_v16 = vpop.f32.mrb[12].mxu0 }
 0x252   : > { %v400_v12 = vpop.permute.xlu0 %399  ;;  %1045 = vst.msk [vmem:[#allocation2 + $0xe8] sm:$0xff] %vm1015_vm4, %v978_v9  ;;  %v2098_v17 = vadd.f32 %v2902_v16, %v3703_v0  ;;  %v2092_v37 = vpop.f32.mrb[13].mxu0 }
 0x253   : > { %466 = vst.msk [vmem:[#allocation2 + $0xf0] sm:$0xff] %vm435_vm1, %v400_v12  ;;  %v2093_v23 = vadd.f32 %v3703_v0, %v2092_v37 }
 0x254   : > { %v4064_v24 = vmax.f32 %v2098_v17, 0.0 }
 0x255   : > { %v1747_v27 = vpop.permute.xlu1 %1746  ;;  %v1847_v29 = vld [vmem:[#allocation2 + $0xd0] sm:$0xff]  ;;  %v4066_v46 = vmax.f32 %v2093_v23, 0.0 }
 0x256   : > { %v1169_v28 = vpop.permute.xlu0 %1168  ;;  %1816 = vst.msk [vmem:[#allocation2 + $0xd8] sm:$0xff] %vm1788_vm8, %v1747_v27  ;;  %2921 = vmatprep.mubr.msk.f32.mxu0 %vm1869_vm9, %v1847_v29  ;;  %v4076_v55 = vmul.f32 %v4064_v24, %v4064_v24 }
 0x257   : > { %1237 = vst.msk [vmem:[#allocation2 + $0xe0] sm:$0xff] %vm1208_vm5, %v1169_v28  ;;  %v4083_v32 = vmul.f32 %v4066_v46, %v4066_v46  ;;  %v2972_v33 = vpack.c.bf16 %v4064_v24, %v4066_v46 }
 0x258   : > { %2236 = vst.msk [vmem:[%s3715_s11 + $0x68] sm:$0xff] %vm242_vm0, %v4064_v24  ;;  %2235 = vst.msk [vmem:[%s3715_s11 + $0x60] sm:$0xff] %vm242_vm0, %v4066_v46 }
 0x259   : > { %v593_v52 = vpop.permute.xlu1 %592  ;;  %v3004_v44 = vpack.c.bf16 %v4076_v55, %v4083_v32 }
 0x25a   : > { %v402_v40 = vpop.permute.xlu0 %401  ;;  %659 = vst.msk [vmem:[#allocation2 + $0xf0] sm:$0xff] %vm628_vm2, %v593_v52 }
 0x25b   : > { %467 = vst.msk [vmem:[#allocation2 + $0xf8] sm:$0xff] %vm435_vm1, %v402_v40 }
 0x25d   : > { %v1363_v50 = vpop.permute.xlu1 %1362  ;;  %v1848_v41 = vld [vmem:[#allocation2 + $0xd8] sm:$0xff] }
 0x25e   : > { %v1171_v49 = vpop.permute.xlu0 %1170  ;;  %1431 = vst.msk [vmem:[#allocation2 + $0xe0] sm:$0xff] %vm1402_vm6, %v1363_v50  ;;  %2922 = vmatmul.mubr.msk.f32.gmra.mrb[26].mxu0 %vm1869_vm9, %v1848_v41 }
 0x25f   : > { %1238 = vst.msk [vmem:[#allocation2 + $0xe8] sm:$0xff] %vm1208_vm5, %v1171_v49 }
 0x261   : > { %v787_v2 = vpop.permute.xlu1 %786 }
 0x262   : > { %v595_v13 = vpop.permute.xlu0 %594  ;;  %853 = vst.msk [vmem:[#allocation2 + $0xf0] sm:$0xff] %vm822_vm3, %v787_v2 }
 0x263   : > { %660 = vst.msk [vmem:[#allocation2 + $0xf8] sm:$0xff] %vm628_vm2, %v595_v13 }
 0x265   : > { %v1556_v5 = vpop.permute.xlu1 %1555 }
 0x266   : > { %v1365_v3 = vpop.permute.xlu0 %1364  ;;  %1624 = vst.msk [vmem:[#allocation2 + $0xe0] sm:$0xff] %vm1595_vm7, %v1556_v5 }
 0x267   : > { %1432 = vst.msk [vmem:[#allocation2 + $0xe8] sm:$0xff] %vm1402_vm6, %v1365_v3 }
 0x269   : > { %v980_v25 = vpop.permute.xlu1 %979 }
 0x26a   : > { %v789_v19 = vpop.permute.xlu0 %788  ;;  %1046 = vst.msk [vmem:[#allocation2 + $0xf0] sm:$0xff] %vm1015_vm4, %v980_v25 }
 0x26b   : > { %854 = vst.msk [vmem:[#allocation2 + $0xf8] sm:$0xff] %vm822_vm3, %v789_v19 }
 0x26d   : > { %v1749_v9 = vpop.permute.xlu1 %1748 }
 0x26e   : > { %v1558_v8 = vpop.permute.xlu0 %1557  ;;  %1817 = vst.msk [vmem:[#allocation2 + $0xe0] sm:$0xff] %vm1788_vm8, %v1749_v9 }
 0x26f   : > { %1625 = vst.msk [vmem:[#allocation2 + $0xe8] sm:$0xff] %vm1595_vm7, %v1558_v8 }
 0x271   : > { %v2905_v16 = vpop.f32.mrb[14].mxu0  ;;  %v1173_v37 = vpop.permute.xlu1 %1172 }
 0x272   : > { %v982_v12 = vpop.permute.xlu0 %981  ;;  %v2108_v17 = vadd.f32 %v2905_v16, %v3703_v0  ;;  %v2102_v23 = vpop.f32.mrb[15].mxu0  ;;  %1239 = vst.msk [vmem:[#allocation2 + $0xf0] sm:$0xff] %vm1208_vm5, %v1173_v37 }
 0x273   : > { %1047 = vst.msk [vmem:[#allocation2 + $0xf8] sm:$0xff] %vm1015_vm4, %v982_v12  ;;  %v2103_v27 = vadd.f32 %v3703_v0, %v2102_v23 }
 0x274   : > { %v4106_v28 = vmax.f32 %v2108_v17, 0.0 }
 0x275   : > { %v4108_v29 = vmax.f32 %v2103_v27, 0.0  ;;  %v1849_v52 = vld [vmem:[#allocation2 + $0xe0] sm:$0xff]  ;;  %v1175_v50 = vpop.permute.xlu1 %1174 }
 0x276   : > { %v1751_v40 = vpop.permute.xlu0 %1750  ;;  %2238 = vst.msk [vmem:[%s3715_s11 + $0x78] sm:$0xff] %vm242_vm0, %v4106_v28  ;;  %v4115_v49 = vmul.f32 %v4106_v28, %v4106_v28  ;;  %2924 = vmatprep.mubr.msk.f32.mxu0 %vm1869_vm9, %v1849_v52 }
 0x277   : > { %1818 = vst.msk [vmem:[#allocation2 + $0xe8] sm:$0xff] %vm1788_vm8, %v1751_v40  ;;  %v4124_v41 = vmul.f32 %v4108_v29, %v4108_v29  ;;  %v2976_v13 = vpack.c.bf16 %v4106_v28, %v4108_v29 }
 0x278   : > { %2237 = vst.msk [vmem:[%s3715_s11 + $0x70] sm:$0xff] %vm242_vm0, %v4108_v29 }
 0x279   : > { %1240 = vst.msk [vmem:[#allocation2 + $0xf8] sm:$0xff] %vm1208_vm5, %v1175_v50  ;;  %v3008_v3 = vpack.c.bf16 %v4115_v49, %v4124_v41  ;;  %v1369_v5 = vpop.permute.xlu1 %1368 }
 0x27a   : > { %v1367_v2 = vpop.permute.xlu0 %1366  ;;  %1434 = vst.msk [vmem:[#allocation2 + $0xf8] sm:$0xff] %vm1402_vm6, %v1369_v5 }
 0x27b   : > { %1433 = vst.msk [vmem:[#allocation2 + $0xf0] sm:$0xff] %vm1402_vm6, %v1367_v2 }
 0x27d   : > { %v1562_v8 = vpop.permute.xlu1 %1561 }
 0x27e   : > { %v1560_v19 = vpop.permute.xlu0 %1559  ;;  %v1850_v25 = vld [vmem:[#allocation2 + $0xe8] sm:$0xff]  ;;  %1627 = vst.msk [vmem:[#allocation2 + $0xf8] sm:$0xff] %vm1595_vm7, %v1562_v8 }
 0x27f   : > { %1626 = vst.msk [vmem:[#allocation2 + $0xf0] sm:$0xff] %vm1595_vm7, %v1560_v19  ;;  %2925 = vmatmul.mubr.msk.f32.gmra.mrb[28].mxu0 %vm1869_vm9, %v1850_v25 }
 0x281   : > { %v1755_v12 = vpop.permute.xlu1 %1754 }
 0x282   : > { %v1753_v9 = vpop.permute.xlu0 %1752  ;;  %1820 = vst.msk [vmem:[#allocation2 + $0xf8] sm:$0xff] %vm1788_vm8, %v1755_v12 }
 0x283   : > { %1819 = vst.msk [vmem:[#allocation2 + $0xf0] sm:$0xff] %vm1788_vm8, %v1753_v9 }
 0x289   : > { %v1852_v17 = vld [vmem:[#allocation2 + $0xf8] sm:$0xff] }
 0x28a   : > { %v1851_v16 = vld [vmem:[#allocation2 + $0xf0] sm:$0xff] }
 0x28b   : > { %2927 = vmatprep.mubr.msk.f32.mxu0 %vm1869_vm9, %v1851_v16 }
 0x28c   : > { %2928 = vmatmul.mubr.msk.f32.gmra.mrb[30].mxu0 %vm1869_vm9, %v1852_v17 }
 0x291   : > { %v2908_v37 = vpop.f32.mrb[16].mxu0 }
 0x292   : > { %v2118_v23 = vadd.f32 %v2908_v37, %v3703_v0  ;;  %v2112_v27 = vpop.f32.mrb[17].mxu0 }
 0x293   : > { %v2113_v40 = vadd.f32 %v3703_v0, %v2112_v27 }
 0x294   : > { %v2208_v52 = vmax.f32 %v2118_v23, 0.0 }
 0x295   : > { %v2207_v50 = vmax.f32 %v2113_v40, 0.0 }
 0x296   : > { %2240 = vst.msk [vmem:[%s3715_s11 + $0x88] sm:$0xff] %vm242_vm0, %v2208_v52  ;;  %v4144_v2 = vmul.f32 %v2208_v52, %v2208_v52 }
 0x297   : > { %2239 = vst.msk [vmem:[%s3715_s11 + $0x80] sm:$0xff] %vm242_vm0, %v2207_v50  ;;  %v4148_v5 = vmul.f32 %v2207_v50, %v2207_v50  ;;  %v2946_v19 = vpack.c.bf16 %v2208_v52, %v2207_v50 }
 0x299   : > { %2947 = vmatprep.subr.bf16.mxu1 %v2946_v19  ;;  %v2978_v25 = vpack.c.bf16 %v4144_v2, %v4148_v5 }
 0x29a   : > { %2949 = vmatpush3.bf16.msra.mxu1 %v2948_v47 }
 0x2b1   : > { %v2911_v8 = vpop.f32.mrb[18].mxu0 }
 0x2b2   : > { %v2128_v9 = vadd.f32 %v2911_v8, %v3703_v0  ;;  %v2122_v12 = vpop.f32.mrb[19].mxu0 }
 0x2b3   : > { %v2123_v16 = vadd.f32 %v3703_v0, %v2122_v12 }
 0x2b4   : > { %v2210_v17 = vmax.f32 %v2128_v9, 0.0 }
 0x2b5   : > { %v2209_v37 = vmax.f32 %v2123_v16, 0.0  ;;  %v3028_v16 = vld [vmem:[%s4278_s2] ss:$0 sm:$0xff] }
 0x2b6   : > { %2242 = vst.msk [vmem:[%s3715_s11 + $0x98] sm:$0xff] %vm242_vm0, %v2210_v17  ;;  %v4159_v23 = vmul.f32 %v2210_v17, %v2210_v17 }
 0x2b7   : > { %2241 = vst.msk [vmem:[%s3715_s11 + $0x90] sm:$0xff] %vm242_vm0, %v2209_v37  ;;  %v4163_v27 = vmul.f32 %v2209_v37, %v2209_v37  ;;  %v2950_v45 = vpack.c.bf16 %v2210_v17, %v2209_v37 }
 0x2b9   : > { %2951 = vmatprep.subr.bf16.mxu1 %v2950_v45  ;;  %v2982_v11 = vpack.c.bf16 %v4159_v23, %v4163_v27 }
 0x2ba   : > { %2953 = vmatpush3.bf16.msra.mxu1 %v2952_v51 }
 0x2d1   : > { %v2914_v47 = vpop.f32.mrb[20].mxu0 }
 0x2d2   : > { %v2138_v40 = vadd.f32 %v2914_v47, %v3703_v0  ;;  %v2132_v52 = vpop.f32.mrb[21].mxu0 }
 0x2d3   : > { %v2133_v50 = vadd.f32 %v3703_v0, %v2132_v52  ;;  %v3045_v0 = vmov 1.0  }
 0x2d4   : > { %v2212_v19 = vmax.f32 %v2138_v40, 0.0  ;;  %2319 = vmatprep.mubr.f32.mxu1 %v3045_v0 }
 0x2d5   : > { %v2211_v8 = vmax.f32 %v2133_v50, 0.0 }
 0x2d6   : > { %2244 = vst.msk [vmem:[%s3715_s11 + $0xa8] sm:$0xff] %vm242_vm0, %v2212_v19  ;;  %v4174_v9 = vmul.f32 %v2212_v19, %v2212_v19 }
 0x2d7   : > { %2243 = vst.msk [vmem:[%s3715_s11 + $0xa0] sm:$0xff] %vm242_vm0, %v2211_v8  ;;  %v4178_v12 = vmul.f32 %v2211_v8, %v2211_v8  ;;  %v2954_v42 = vpack.c.bf16 %v2212_v19, %v2211_v8 }
 0x2d9   : > { %2955 = vmatprep.subr.bf16.mxu1 %v2954_v42  ;;  %v2986_v39 = vpack.c.bf16 %v4174_v9, %v4178_v12 }
 0x2da   : > { %2957 = vmatpush3.bf16.msra.mxu1 %v2956_v26 }
 0x2f1   : > { %v2917_v51 = vpop.f32.mrb[22].mxu0 }
 0x2f2   : > { %v2148_v17 = vadd.f32 %v3028_v16, %v2917_v51  ;;  %v2142_v37 = vpop.f32.mrb[23].mxu0 }
 0x2f3   : > { %v2143_v45 = vadd.f32 %v3028_v16, %v2142_v37 }
 0x2f4   : > { %v2214_v47 = vmax.f32 %v2148_v17, 0.0 }
 0x2f5   : > { %v2213_v40 = vmax.f32 %v2143_v45, 0.0 }
 0x2f6   : > { %2246 = vst.msk [vmem:[%s3715_s11 + $0xb8] sm:$0xff] %vm242_vm0, %v2214_v47  ;;  %v4191_v52 = vmul.f32 %v2214_v47, %v2214_v47 }
 0x2f7   : > { %2245 = vst.msk [vmem:[%s3715_s11 + $0xb0] sm:$0xff] %vm242_vm0, %v2213_v40  ;;  %v4195_v10 = vmul.f32 %v2213_v40, %v2213_v40  ;;  %v2958_v20 = vpack.c.bf16 %v2214_v47, %v2213_v40 }
 0x2f9   : > { %2959 = vmatprep.subr.bf16.mxu1 %v2958_v20  ;;  %v2990_v26 = vpack.c.bf16 %v4191_v52, %v4195_v10 }
 0x2fa   : > { %2961 = vmatpush3.bf16.msra.mxu1 %v2960_v4 }
 0x311   : > { %v2920_v50 = vpop.f32.mrb[24].mxu0 }
 0x312   : > { %v2158_v19 = vadd.f32 %v3028_v16, %v2920_v50  ;;  %v2152_v8 = vpop.f32.mrb[25].mxu0 }
 0x313   : > { %v2153_v42 = vadd.f32 %v3028_v16, %v2152_v8 }
 0x314   : > { %v2216_v51 = vmax.f32 %v2158_v19, 0.0 }
 0x315   : > { %v2215_v17 = vmax.f32 %v2153_v42, 0.0 }
 0x316   : > { %2248 = vst.msk [vmem:[%s3715_s11 + $0xc8] sm:$0xff] %vm242_vm0, %v2216_v51  ;;  %v2352_v37 = vmul.f32 %v2216_v51, %v2216_v51 }
 0x317   : > { %2247 = vst.msk [vmem:[%s3715_s11 + $0xc0] sm:$0xff] %vm242_vm0, %v2215_v17  ;;  %v2351_v45 = vmul.f32 %v2215_v17, %v2215_v17  ;;  %v2962_v47 = vpack.c.bf16 %v2216_v51, %v2215_v17 }
 0x319   : > { %2963 = vmatprep.subr.bf16.mxu1 %v2962_v47  ;;  %v2994_v40 = vpack.c.bf16 %v2352_v37, %v2351_v45 }
 0x31a   : > { %2965 = vmatpush3.bf16.msra.mxu1 %v2964_v56 }
 0x331   : > { %v2923_v57 = vpop.f32.mrb[26].mxu0 }
 0x332   : > { %v2168_v60 = vadd.f32 %v3028_v16, %v2923_v57  ;;  %v2162_v4 = vpop.f32.mrb[27].mxu0 }
 0x333   : > { %v2163_v20 = vadd.f32 %v3028_v16, %v2162_v4 }
 0x334   : > { %v2218_v50 = vmax.f32 %v2168_v60, 0.0 }
 0x335   : > { %v2217_v19 = vmax.f32 %v2163_v20, 0.0 }
 0x336   : > { %2250 = vst.msk [vmem:[%s3715_s11 + $0xd8] sm:$0xff] %vm242_vm0, %v2218_v50  ;;  %v2354_v8 = vmul.f32 %v2218_v50, %v2218_v50 }
 0x337   : > { %2249 = vst.msk [vmem:[%s3715_s11 + $0xd0] sm:$0xff] %vm242_vm0, %v2217_v19  ;;  %v2353_v42 = vmul.f32 %v2217_v19, %v2217_v19  ;;  %v2966_v51 = vpack.c.bf16 %v2218_v50, %v2217_v19 }
 0x339   : > { %2967 = vmatprep.subr.bf16.mxu1 %v2966_v51  ;;  %v2998_v17 = vpack.c.bf16 %v2354_v8, %v2353_v42 }
 0x33a   : > { %2969 = vmatpush3.bf16.msra.mxu1 %v2968_v38 }
 0x352   : > { %v2926_v61 = vpop.f32.mrb[28].mxu0 }
 0x353   : > { %v2178_v53 = vadd.f32 %v3028_v16, %v2926_v61  ;;  %v2172_v56 = vpop.f32.mrb[29].mxu0 }
 0x354   : > { %v2173_v37 = vadd.f32 %v3028_v16, %v2172_v56 }
 0x355   : > { %v2220_v45 = vmax.f32 %v2178_v53, 0.0 }
 0x356   : > { %v2219_v47 = vmax.f32 %v2173_v37, 0.0 }
 0x357   : > { %2252 = vst.msk [vmem:[%s3715_s11 + $0xe8] sm:$0xff] %vm242_vm0, %v2220_v45  ;;  %v2356_v57 = vmul.f32 %v2220_v45, %v2220_v45 }
 0x358   : > { %2251 = vst.msk [vmem:[%s3715_s11 + $0xe0] sm:$0xff] %vm242_vm0, %v2219_v47  ;;  %v2355_v60 = vmul.f32 %v2219_v47, %v2219_v47  ;;  %v2970_v4 = vpack.c.bf16 %v2220_v45, %v2219_v47 }
 0x35a   : > { %2971 = vmatprep.subr.bf16.mxu1 %v2970_v4  ;;  %v3002_v20 = vpack.c.bf16 %v2356_v57, %v2355_v60 }
 0x35b   : > { %2973 = vmatpush3.bf16.msra.mxu1 %v2972_v33 }
 0x35f   : > { %v2929_v30 = vpop.f32.mrb[30].mxu0 }
 0x360   : > { %v2188_v34 = vadd.f32 %v3028_v16, %v2929_v30  ;;  %v2182_v38 = vpop.f32.mrb[31].mxu0 }
 0x361   : > { %v2183_v50 = vadd.f32 %v3028_v16, %v2182_v38 }
 0x362   : > { %v2222_v19 = vmax.f32 %v2188_v34, 0.0 }
 0x363   : > { %v2221_v8 = vmax.f32 %v2183_v50, 0.0 }
 0x364   : > { %2254 = vst.msk [vmem:[%s3715_s11 + $0xf8] sm:$0xff] %vm242_vm0, %v2222_v19  ;;  %v2358_v42 = vmul.f32 %v2222_v19, %v2222_v19 }
 0x365   : > { %2253 = vst.msk [vmem:[%s3715_s11 + $0xf0] sm:$0xff] %vm242_vm0, %v2221_v8  ;;  %v2357_v51 = vmul.f32 %v2221_v8, %v2221_v8  ;;  %v2974_v61 = vpack.c.bf16 %v2222_v19, %v2221_v8 }
 0x367   : > { %2975 = vmatprep.subr.bf16.mxu1 %v2974_v61  ;;  %v3006_v53 = vpack.c.bf16 %v2358_v42, %v2357_v51 }
 0x368   : > { %2977 = vmatpush3.bf16.msra.mxu1 %v2976_v13 }
 0x369   : > { %2979 = vmatprep.subr.bf16.mxu1 %v2978_v25 }
 0x36b   : > { %2320 = vmatmul.mubr.f32.vlgmr.msra.gmra.mrb[0].mxu1 %v3045_v0 }
 0x36c   : > { %2981 = vmatpush3.bf16.msra.mxu1 %v2980_v31  ;;  %2423 = vmatprep.mubr.f32.mxu1 %v3045_v0 }
 0x36d   : > { %2983 = vmatprep.subr.bf16.mxu1 %v2982_v11 }
 0x370   : > { %2985 = vmatpush3.bf16.msra.mxu1 %v2984_v58 }
 0x371   : > { %2987 = vmatprep.subr.bf16.mxu1 %v2986_v39 }
 0x374   : > { %2989 = vmatpush3.bf16.msra.mxu1 %v2988_v18 }
 0x375   : > { %2991 = vmatprep.subr.bf16.mxu1 %v2990_v26 }
 0x378   : > { %2993 = vmatpush3.bf16.msra.mxu1 %v2992_v6 }
 0x379   : > { %2995 = vmatprep.subr.bf16.mxu1 %v2994_v40 }
 0x37c   : > { %2997 = vmatpush3.bf16.msra.mxu1 %v2996_v59 }
 0x37d   : > { %2999 = vmatprep.subr.bf16.mxu1 %v2998_v17 }
 0x380   : > { %3001 = vmatpush3.bf16.msra.mxu1 %v3000_v43 }
 0x381   : > { %3003 = vmatprep.subr.bf16.mxu1 %v3002_v20 }
 0x384   : > { %3005 = vmatpush3.bf16.msra.mxu1 %v3004_v44 }
 0x385   : > { %3007 = vmatprep.subr.bf16.mxu1 %v3006_v53 }
 0x388   : > { %3009 = vmatpush3.bf16.msra.mxu1 %v3008_v3 }
 0x38b   : > { %2424 = vmatmul.mubr.f32.vlgmr.msra.gmra.mrb[2].mxu1 %v3045_v0 }
 0x43e   : > { %v2826_v14 = vpop.f32.mrb[0].mxu1 }
 0x43f   : > { %v2827_v15 = vpop.f32.mrb[1].mxu1 }
 0x440   : > { %v2828_v31 = vadd.f32 %v2827_v15, %v2826_v14 }
 0x442   : > { %2326 = vst.msk [vmem:[%s209_s26] sm:$0x1] %vm2325_vm10, %v2828_v31 }
 0x45e   : > { %v2861_v1 = vpop.f32.mrb[2].mxu1 }
 0x45f   : > { %v2862_v48 = vpop.f32.mrb[3].mxu1 }
 0x460   : > { %v2863_v58 = vadd.f32 %v2862_v48, %v2861_v1 }
 0x462   : > { %2429 = vst.msk [vmem:[%s209_s26 + $0x1] sm:$0x1] %vm2325_vm10, %v2863_v58 }
 0x463 PF: > { %s15_s15 = sadd.s32 1, %s3035_s15  }
 0x464   : > { %p12_p5 = scmp.ge.s32.totalorder %s15_s15, 4  }
 0x466   :  { %14 = sbr.rel (!%p12_p5) target bundleno = 1 (0x1), region = 76 }

</bundles_post_ra>
